<compile_context>
chip_gen: v6e
topology: v6e:2x2x1
jax: 0.10.0
libtpu: 0.0.40
codegen_flags: <defaults>
</compile_context>

<pallas_src>
import functools

import jax
import jax.numpy as jnp
from jax import lax
from jax.experimental import pallas as pl
from jax.experimental.pallas import tpu as pltpu


def _round_up(x, m):
    return (x + m - 1) // m * m


def _block_kernel(xpad_ref, w1_ref, s1_ref, b1_ref,
                  w2_ref, s2_ref, b2_ref,
                  w3_ref, s3_ref, b3_ref,
                  o_ref, mid_ref):
    # xpad_ref : (Nb, H+2, Wp, Cin)  halo-padded input block, f32 (Wp % 8 == 0)
    # w1_ref   : (9, Cin, Cin)       3x3 conv taps as matrices
    # w2_ref   : (Cin, Cout)         1x1 conv
    # w3_ref   : (9, Cout, Cout)     3x3 conv taps as matrices
    # s*/b*    : (1, C)              folded BN scale / bias (f32)
    # o_ref    : (Nb, H, W, Cout)    f32 output block (real channels only)
    # mid_ref  : VMEM (Nb, H+2, Wp, Cout) scratch for the padded intermediate
    nb, hp, wp, cin = xpad_ref.shape
    h = o_ref.shape[1]
    w = o_ref.shape[2]
    cout = o_ref.shape[3]
    m = nb * h * w

    x = xpad_ref[...]                                      # (Nb, H+2, Wp, Cin)

    # ---- conv1: 3x3, pad=1 -> BN -> ReLU -----------------------------------
    # Hoist the 3 W-axis (sublane) shifts; H-axis shifts are outer-dim
    # addressing and free.
    x_dx = [x[:, :, dx:dx + w, :] for dx in range(3)]
    acc1 = jnp.zeros((m, cin), jnp.float32)
    for dy in range(3):
        for dx in range(3):
            patch = x_dx[dx][:, dy:dy + h, :, :].reshape(m, cin)
            acc1 = acc1 + jnp.dot(patch, w1_ref[dy * 3 + dx],
                                  preferred_element_type=jnp.float32)
    y1 = jnp.maximum(acc1 * s1_ref[...] + b1_ref[...], 0.0)      # (M, Cin)

    # ---- conv2: 1x1 (no bias) -> BN -> ReLU --------------------------------
    y2 = jnp.dot(y1, w2_ref[...], preferred_element_type=jnp.float32)
    y2 = jnp.maximum(y2 * s2_ref[...] + b2_ref[...], 0.0)        # (M, Cout)

    # ---- re-pad the intermediate in a tiny VMEM scratch --------------------
    # Scratch is ~14 KiB; zeroing the whole thing every step is cheap and
    # stays correct when the "parallel" grid axis is sharded across cores.
    mid_ref[...] = jnp.zeros_like(mid_ref)
    mid_ref[:, 1:h + 1, 1:w + 1, :] = y2.reshape(nb, h, w, cout)

    # ---- conv3: 3x3, pad=1 -> BN -> ReLU -----------------------------------
    mid = mid_ref[...]                                     # (Nb, H+2, Wp, Cout)
    mid_dx = [mid[:, :, dx:dx + w, :] for dx in range(3)]
    acc3 = jnp.zeros((m, cout), jnp.float32)
    for dy in range(3):
        for dx in range(3):
            patch = mid_dx[dx][:, dy:dy + h, :, :].reshape(m, cout)
            acc3 = acc3 + jnp.dot(patch, w3_ref[dy * 3 + dx],
                                  preferred_element_type=jnp.float32)
    y3 = jnp.maximum(acc3 * s3_ref[...] + b3_ref[...], 0.0)      # (M, Cout)

    # Store only the real channels (16x fewer HBM bytes than lane-padded).
    o_ref[...] = y3.reshape(nb, h, w, cout).astype(o_ref.dtype)


@jax.jit
def basic_conv_block(x_nchw, w1_hwio, s1, b1, w2_hwio, s2, b2, w3_hwio, s3, b3):
    """x_nchw: (N, Cin, H, W) f32 -> (N, Cout, H, W) f32 (inference-mode BN)."""
    x = jnp.transpose(x_nchw, (0, 2, 3, 1))                  # NHWC
    n, h, w, cin = x.shape
    cout = w3_hwio.shape[-1]

    # Halo-padded width rounded up to a sublane multiple (W+2 -> multiple of 8).
    wp = _round_up(w + 2, 8)

    # Batch block: >= 2 grid steps whenever N >= 2 (v7x has 2 TensorCores and
    # the auto-pipeline needs multiple steps to overlap DMA), never pad N.
    if n >= 8:
        nb = 4
    elif n >= 2:
        nb = n // 2
    else:
        nb = 1
    while n % nb != 0:
        nb -= 1

    # Halo pad only (no channel padding, no batch padding): tiny HBM copy.
    xp = jnp.pad(x, ((0, 0), (1, 1), (1, wp - w - 1), (0, 0))).astype(jnp.float32)

    # 3x3 weights as (9, in, out) tap matrices; everything stays un-padded f32.
    w1 = w1_hwio.reshape(9, cin, cin).astype(jnp.float32)
    w2 = w2_hwio.reshape(cin, cout).astype(jnp.float32)
    w3 = w3_hwio.reshape(9, cout, cout).astype(jnp.float32)

    s1p = s1.reshape(1, cin).astype(jnp.float32)
    b1p = b1.reshape(1, cin).astype(jnp.float32)
    s2p = s2.reshape(1, cout).astype(jnp.float32)
    b2p = b2.reshape(1, cout).astype(jnp.float32)
    s3p = s3.reshape(1, cout).astype(jnp.float32)
    b3p = b3.reshape(1, cout).astype(jnp.float32)

    out = pl.pallas_call(
        _block_kernel,
        out_shape=jax.ShapeDtypeStruct((n, h, w, cout), jnp.float32),
        grid_spec=pltpu.PrefetchScalarGridSpec(
            num_scalar_prefetch=0,
            grid=(n // nb,),
            in_specs=[
                pl.BlockSpec((nb, h + 2, wp, cin), lambda i: (i, 0, 0, 0)),
                pl.BlockSpec((9, cin, cin), lambda i: (0, 0, 0)),
                pl.BlockSpec((1, cin), lambda i: (0, 0)),
                pl.BlockSpec((1, cin), lambda i: (0, 0)),
                pl.BlockSpec((cin, cout), lambda i: (0, 0)),
                pl.BlockSpec((1, cout), lambda i: (0, 0)),
                pl.BlockSpec((1, cout), lambda i: (0, 0)),
                pl.BlockSpec((9, cout, cout), lambda i: (0, 0, 0)),
                pl.BlockSpec((1, cout), lambda i: (0, 0)),
                pl.BlockSpec((1, cout), lambda i: (0, 0)),
            ],
            out_specs=pl.BlockSpec((nb, h, w, cout), lambda i: (i, 0, 0, 0)),
            scratch_shapes=[pltpu.VMEM((nb, h + 2, wp, cout), jnp.float32)],
        ),
        compiler_params=pltpu.CompilerParams(
            dimension_semantics=("parallel",)),
    )(xp, w1, s1p, b1p, w2, s2p, b2p, w3, s3p, b3p)

    # NHWC -> NCHW on the real-size (un-padded) output; tiny.
    # TODO(synk): return NHWC directly if the consumer allows it.
    return jnp.transpose(out, (0, 3, 1, 2))


def _reference(x_nchw, w1_hwio, s1, b1, w2_io, s2, b2, w3_hwio, s3, b3):
    """Pure-JAX f32 reference (same folded-BN semantics)."""
    dn = ('NHWC', 'HWIO', 'NHWC')
    x = jnp.transpose(x_nchw, (0, 2, 3, 1))
    y = lax.conv_general_dilated(x, w1_hwio, (1, 1), 'SAME',
                                 dimension_numbers=dn)
    y = jnp.maximum(y * s1 + b1, 0.0)
    y = lax.conv_general_dilated(y, w2_io, (1, 1), 'SAME',
                                 dimension_numbers=dn)
    y = jnp.maximum(y * s2 + b2, 0.0)
    y = lax.conv_general_dilated(y, w3_hwio, (1, 1), 'SAME',
                                 dimension_numbers=dn)
    y = jnp.maximum(y * s3 + b3, 0.0)
    return jnp.transpose(y, (0, 3, 1, 2))


def _make_params(key, Cin, Cout, eps=1e-5):
    ks = jax.random.split(key, 16)
    f32 = jnp.float32

    w1 = 0.1 * jax.random.normal(ks[0], (3, 3, Cin, Cin), f32)
    cb1 = 0.1 * jax.random.normal(ks[1], (Cin,), f32)
    w2 = 0.1 * jax.random.normal(ks[2], (1, 1, Cin, Cout), f32)      # no bias
    w3 = 0.1 * jax.random.normal(ks[3], (3, 3, Cout, Cout), f32)
    cb3 = 0.1 * jax.random.normal(ks[4], (Cout,), f32)

    def bn_params(kg, kb, km, kv, C):
        gamma = 1.0 + 0.1 * jax.random.normal(kg, (C,), f32)
        beta = 0.1 * jax.random.normal(kb, (C,), f32)
        mean = 0.1 * jax.random.normal(km, (C,), f32)
        var = 0.5 + jnp.abs(jax.random.normal(kv, (C,), f32))
        scale = gamma / jnp.sqrt(var + eps)
        bias = beta - mean * scale
        return scale, bias

    s1, b1 = bn_params(ks[5], ks[6], ks[7], ks[8], Cin)
    s2, b2 = bn_params(ks[9], ks[10], ks[11], ks[12], Cout)
    s3, b3 = bn_params(ks[13], ks[14], ks[15], ks[5], Cout)

    # fold conv biases through the following BN affine
    b1 = b1 + cb1 * s1
    b3 = b3 + cb3 * s3
    return w1, s1, b1, w2, s2, b2, w3, s3, b3


if __name__ == "__main__":
    key = jax.random.PRNGKey(0)
    kx, kp = jax.random.split(key)

    N, Cin, H, W = 2, 4, 16, 16
    Cout = 8

    x = jax.random.normal(kx, (N, Cin, H, W), jnp.float32)
    params = _make_params(kp, Cin, Cout)
    ref = _reference(x, *params)

    out = jax.block_until_ready(basic_conv_block(x, *params))
    assert out.shape == (N, Cout, H, W), out.shape
    assert jnp.allclose(out, ref, rtol=1e-3, atol=1e-3), (
        float(jnp.max(jnp.abs(out - ref))))

    print("KERNEL_OK")
</pallas_src>

<mosaic_0001>
module attributes {stable_mosaic.version = 11 : i64} {
  func.func @_block_kernel(%arg0: i32, %arg1: memref<1x18x24x4xf32, #tpu.memory_space<vmem>>, %arg2: memref<9x4x4xf32, #tpu.memory_space<vmem>>, %arg3: memref<1x4xf32, #tpu.memory_space<vmem>>, %arg4: memref<1x4xf32, #tpu.memory_space<vmem>>, %arg5: memref<4x8xf32, #tpu.memory_space<vmem>>, %arg6: memref<1x8xf32, #tpu.memory_space<vmem>>, %arg7: memref<1x8xf32, #tpu.memory_space<vmem>>, %arg8: memref<9x8x8xf32, #tpu.memory_space<vmem>>, %arg9: memref<1x8xf32, #tpu.memory_space<vmem>>, %arg10: memref<1x8xf32, #tpu.memory_space<vmem>>, %arg11: memref<1x16x16x8xf32, #tpu.memory_space<vmem>>, %arg12: memref<1x18x24x8xf32, #tpu.memory_space<vmem>>) attributes {dimension_semantics = [#tpu.dimension_semantics<parallel>], iteration_bounds = array<i64: 2>, scalar_prefetch = 0 : i64, scratch_operands = 1 : i64, tpu.core_type = #tpu.core_type<tc>, window_params = [{transform_indices = @transform_0, window_bounds = array<i64: 1, 18, 24, 4>}, {pipeline_mode = #tpu.pipeline_mode<synchronous>, transform_indices = @transform_1, window_bounds = array<i64: 9, 4, 4>}, {pipeline_mode = #tpu.pipeline_mode<synchronous>, transform_indices = @transform_2, window_bounds = array<i64: 1, 4>}, {pipeline_mode = #tpu.pipeline_mode<synchronous>, transform_indices = @transform_3, window_bounds = array<i64: 1, 4>}, {pipeline_mode = #tpu.pipeline_mode<synchronous>, transform_indices = @transform_4, window_bounds = array<i64: 4, 8>}, {pipeline_mode = #tpu.pipeline_mode<synchronous>, transform_indices = @transform_5, window_bounds = array<i64: 1, 8>}, {pipeline_mode = #tpu.pipeline_mode<synchronous>, transform_indices = @transform_6, window_bounds = array<i64: 1, 8>}, {pipeline_mode = #tpu.pipeline_mode<synchronous>, transform_indices = @transform_7, window_bounds = array<i64: 9, 8, 8>}, {pipeline_mode = #tpu.pipeline_mode<synchronous>, transform_indices = @transform_8, window_bounds = array<i64: 1, 8>}, {pipeline_mode = #tpu.pipeline_mode<synchronous>, transform_indices = @transform_9, window_bounds = array<i64: 1, 8>}, {transform_indices = @transform_10, window_bounds = array<i64: 1, 16, 16, 8>}]} {
    %c0 = arith.constant 0 : index
    %c0_0 = arith.constant 0 : index
    %c0_1 = arith.constant 0 : index
    %c0_2 = arith.constant 0 : index
    %0 = vector.load %arg1[%c0, %c0_0, %c0_1, %c0_2] : memref<1x18x24x4xf32, #tpu.memory_space<vmem>>, vector<1x18x24x4xf32>
    %1 = vector.extract_strided_slice %0 {offsets = [0, 0, 0, 0], sizes = [1, 18, 16, 4], strides = [1, 1, 1, 1]} : vector<1x18x24x4xf32> to vector<1x18x16x4xf32>
    %2 = vector.extract_strided_slice %0 {offsets = [0, 0, 1, 0], sizes = [1, 18, 16, 4], strides = [1, 1, 1, 1]} : vector<1x18x24x4xf32> to vector<1x18x16x4xf32>
    %3 = vector.extract_strided_slice %0 {offsets = [0, 0, 2, 0], sizes = [1, 18, 16, 4], strides = [1, 1, 1, 1]} : vector<1x18x24x4xf32> to vector<1x18x16x4xf32>
    %cst = arith.constant 0.000000e+00 : f32
    %4 = vector.broadcast %cst : f32 to vector<256x4xf32>
    %5 = vector.extract_strided_slice %1 {offsets = [0, 0, 0, 0], sizes = [1, 16, 16, 4], strides = [1, 1, 1, 1]} : vector<1x18x16x4xf32> to vector<1x16x16x4xf32>
    %6 = vector.shape_cast %5 : vector<1x16x16x4xf32> to vector<256x4xf32>
    %c0_3 = arith.constant 0 : index
    %c0_4 = arith.constant 0 : index
    %c0_5 = arith.constant 0 : index
    %7 = vector.load %arg2[%c0_3, %c0_4, %c0_5] : memref<9x4x4xf32, #tpu.memory_space<vmem>>, vector<1x4x4xf32>
    %8 = vector.shape_cast %7 : vector<1x4x4xf32> to vector<4x4xf32>
    %cst_6 = arith.constant dense<0.000000e+00> : vector<256x4xf32>
    %9 = tpu.matmul %6, %8, %cst_6 {dimension_numbers = #tpu.dot_dimension_numbers<[1], [0], [0], [1], [0, 0, 1, 1], [], []>} : vector<256x4xf32>, vector<4x4xf32>, vector<256x4xf32> -> vector<256x4xf32>
    %10 = arith.addf %4, %9 : vector<256x4xf32>
    %11 = vector.extract_strided_slice %2 {offsets = [0, 0, 0, 0], sizes = [1, 16, 16, 4], strides = [1, 1, 1, 1]} : vector<1x18x16x4xf32> to vector<1x16x16x4xf32>
    %12 = vector.shape_cast %11 : vector<1x16x16x4xf32> to vector<256x4xf32>
    %c1 = arith.constant 1 : index
    %c0_7 = arith.constant 0 : index
    %c0_8 = arith.constant 0 : index
    %13 = vector.load %arg2[%c1, %c0_7, %c0_8] : memref<9x4x4xf32, #tpu.memory_space<vmem>>, vector<1x4x4xf32>
    %14 = vector.shape_cast %13 : vector<1x4x4xf32> to vector<4x4xf32>
    %cst_9 = arith.constant dense<0.000000e+00> : vector<256x4xf32>
    %15 = tpu.matmul %12, %14, %cst_9 {dimension_numbers = #tpu.dot_dimension_numbers<[1], [0], [0], [1], [0, 0, 1, 1], [], []>} : vector<256x4xf32>, vector<4x4xf32>, vector<256x4xf32> -> vector<256x4xf32>
    %16 = arith.addf %10, %15 : vector<256x4xf32>
    %17 = vector.extract_strided_slice %3 {offsets = [0, 0, 0, 0], sizes = [1, 16, 16, 4], strides = [1, 1, 1, 1]} : vector<1x18x16x4xf32> to vector<1x16x16x4xf32>
    %18 = vector.shape_cast %17 : vector<1x16x16x4xf32> to vector<256x4xf32>
    %c2 = arith.constant 2 : index
    %c0_10 = arith.constant 0 : index
    %c0_11 = arith.constant 0 : index
    %19 = vector.load %arg2[%c2, %c0_10, %c0_11] : memref<9x4x4xf32, #tpu.memory_space<vmem>>, vector<1x4x4xf32>
    %20 = vector.shape_cast %19 : vector<1x4x4xf32> to vector<4x4xf32>
    %cst_12 = arith.constant dense<0.000000e+00> : vector<256x4xf32>
    %21 = tpu.matmul %18, %20, %cst_12 {dimension_numbers = #tpu.dot_dimension_numbers<[1], [0], [0], [1], [0, 0, 1, 1], [], []>} : vector<256x4xf32>, vector<4x4xf32>, vector<256x4xf32> -> vector<256x4xf32>
    %22 = arith.addf %16, %21 : vector<256x4xf32>
    %23 = vector.extract_strided_slice %1 {offsets = [0, 1, 0, 0], sizes = [1, 16, 16, 4], strides = [1, 1, 1, 1]} : vector<1x18x16x4xf32> to vector<1x16x16x4xf32>
    %24 = vector.shape_cast %23 : vector<1x16x16x4xf32> to vector<256x4xf32>
    %c3 = arith.constant 3 : index
    %c0_13 = arith.constant 0 : index
    %c0_14 = arith.constant 0 : index
    %25 = vector.load %arg2[%c3, %c0_13, %c0_14] : memref<9x4x4xf32, #tpu.memory_space<vmem>>, vector<1x4x4xf32>
    %26 = vector.shape_cast %25 : vector<1x4x4xf32> to vector<4x4xf32>
    %cst_15 = arith.constant dense<0.000000e+00> : vector<256x4xf32>
    %27 = tpu.matmul %24, %26, %cst_15 {dimension_numbers = #tpu.dot_dimension_numbers<[1], [0], [0], [1], [0, 0, 1, 1], [], []>} : vector<256x4xf32>, vector<4x4xf32>, vector<256x4xf32> -> vector<256x4xf32>
    %28 = arith.addf %22, %27 : vector<256x4xf32>
    %29 = vector.extract_strided_slice %2 {offsets = [0, 1, 0, 0], sizes = [1, 16, 16, 4], strides = [1, 1, 1, 1]} : vector<1x18x16x4xf32> to vector<1x16x16x4xf32>
    %30 = vector.shape_cast %29 : vector<1x16x16x4xf32> to vector<256x4xf32>
    %c4 = arith.constant 4 : index
    %c0_16 = arith.constant 0 : index
    %c0_17 = arith.constant 0 : index
    %31 = vector.load %arg2[%c4, %c0_16, %c0_17] : memref<9x4x4xf32, #tpu.memory_space<vmem>>, vector<1x4x4xf32>
    %32 = vector.shape_cast %31 : vector<1x4x4xf32> to vector<4x4xf32>
    %cst_18 = arith.constant dense<0.000000e+00> : vector<256x4xf32>
    %33 = tpu.matmul %30, %32, %cst_18 {dimension_numbers = #tpu.dot_dimension_numbers<[1], [0], [0], [1], [0, 0, 1, 1], [], []>} : vector<256x4xf32>, vector<4x4xf32>, vector<256x4xf32> -> vector<256x4xf32>
    %34 = arith.addf %28, %33 : vector<256x4xf32>
    %35 = vector.extract_strided_slice %3 {offsets = [0, 1, 0, 0], sizes = [1, 16, 16, 4], strides = [1, 1, 1, 1]} : vector<1x18x16x4xf32> to vector<1x16x16x4xf32>
    %36 = vector.shape_cast %35 : vector<1x16x16x4xf32> to vector<256x4xf32>
    %c5 = arith.constant 5 : index
    %c0_19 = arith.constant 0 : index
    %c0_20 = arith.constant 0 : index
    %37 = vector.load %arg2[%c5, %c0_19, %c0_20] : memref<9x4x4xf32, #tpu.memory_space<vmem>>, vector<1x4x4xf32>
    %38 = vector.shape_cast %37 : vector<1x4x4xf32> to vector<4x4xf32>
    %cst_21 = arith.constant dense<0.000000e+00> : vector<256x4xf32>
    %39 = tpu.matmul %36, %38, %cst_21 {dimension_numbers = #tpu.dot_dimension_numbers<[1], [0], [0], [1], [0, 0, 1, 1], [], []>} : vector<256x4xf32>, vector<4x4xf32>, vector<256x4xf32> -> vector<256x4xf32>
    %40 = arith.addf %34, %39 : vector<256x4xf32>
    %41 = vector.extract_strided_slice %1 {offsets = [0, 2, 0, 0], sizes = [1, 16, 16, 4], strides = [1, 1, 1, 1]} : vector<1x18x16x4xf32> to vector<1x16x16x4xf32>
    %42 = vector.shape_cast %41 : vector<1x16x16x4xf32> to vector<256x4xf32>
    %c6 = arith.constant 6 : index
    %c0_22 = arith.constant 0 : index
    %c0_23 = arith.constant 0 : index
    %43 = vector.load %arg2[%c6, %c0_22, %c0_23] : memref<9x4x4xf32, #tpu.memory_space<vmem>>, vector<1x4x4xf32>
    %44 = vector.shape_cast %43 : vector<1x4x4xf32> to vector<4x4xf32>
    %cst_24 = arith.constant dense<0.000000e+00> : vector<256x4xf32>
    %45 = tpu.matmul %42, %44, %cst_24 {dimension_numbers = #tpu.dot_dimension_numbers<[1], [0], [0], [1], [0, 0, 1, 1], [], []>} : vector<256x4xf32>, vector<4x4xf32>, vector<256x4xf32> -> vector<256x4xf32>
    %46 = arith.addf %40, %45 : vector<256x4xf32>
    %47 = vector.extract_strided_slice %2 {offsets = [0, 2, 0, 0], sizes = [1, 16, 16, 4], strides = [1, 1, 1, 1]} : vector<1x18x16x4xf32> to vector<1x16x16x4xf32>
    %48 = vector.shape_cast %47 : vector<1x16x16x4xf32> to vector<256x4xf32>
    %c7 = arith.constant 7 : index
    %c0_25 = arith.constant 0 : index
    %c0_26 = arith.constant 0 : index
    %49 = vector.load %arg2[%c7, %c0_25, %c0_26] : memref<9x4x4xf32, #tpu.memory_space<vmem>>, vector<1x4x4xf32>
    %50 = vector.shape_cast %49 : vector<1x4x4xf32> to vector<4x4xf32>
    %cst_27 = arith.constant dense<0.000000e+00> : vector<256x4xf32>
    %51 = tpu.matmul %48, %50, %cst_27 {dimension_numbers = #tpu.dot_dimension_numbers<[1], [0], [0], [1], [0, 0, 1, 1], [], []>} : vector<256x4xf32>, vector<4x4xf32>, vector<256x4xf32> -> vector<256x4xf32>
    %52 = arith.addf %46, %51 : vector<256x4xf32>
    %53 = vector.extract_strided_slice %3 {offsets = [0, 2, 0, 0], sizes = [1, 16, 16, 4], strides = [1, 1, 1, 1]} : vector<1x18x16x4xf32> to vector<1x16x16x4xf32>
    %54 = vector.shape_cast %53 : vector<1x16x16x4xf32> to vector<256x4xf32>
    %c8 = arith.constant 8 : index
    %c0_28 = arith.constant 0 : index
    %c0_29 = arith.constant 0 : index
    %55 = vector.load %arg2[%c8, %c0_28, %c0_29] : memref<9x4x4xf32, #tpu.memory_space<vmem>>, vector<1x4x4xf32>
    %56 = vector.shape_cast %55 : vector<1x4x4xf32> to vector<4x4xf32>
    %cst_30 = arith.constant dense<0.000000e+00> : vector<256x4xf32>
    %57 = tpu.matmul %54, %56, %cst_30 {dimension_numbers = #tpu.dot_dimension_numbers<[1], [0], [0], [1], [0, 0, 1, 1], [], []>} : vector<256x4xf32>, vector<4x4xf32>, vector<256x4xf32> -> vector<256x4xf32>
    %58 = arith.addf %52, %57 : vector<256x4xf32>
    %c0_31 = arith.constant 0 : index
    %c0_32 = arith.constant 0 : index
    %59 = vector.load %arg3[%c0_31, %c0_32] : memref<1x4xf32, #tpu.memory_space<vmem>>, vector<1x4xf32>
    %60 = vector.broadcast %59 : vector<1x4xf32> to vector<256x4xf32>
    %61 = arith.mulf %58, %60 : vector<256x4xf32>
    %c0_33 = arith.constant 0 : index
    %c0_34 = arith.constant 0 : index
    %62 = vector.load %arg4[%c0_33, %c0_34] : memref<1x4xf32, #tpu.memory_space<vmem>>, vector<1x4xf32>
    %63 = vector.broadcast %62 : vector<1x4xf32> to vector<256x4xf32>
    %64 = arith.addf %61, %63 : vector<256x4xf32>
    %cst_35 = arith.constant 0.000000e+00 : f32
    %65 = vector.broadcast %cst_35 : f32 to vector<256x4xf32>
    %66 = arith.maximumf %64, %65 : vector<256x4xf32>
    %c0_36 = arith.constant 0 : index
    %c0_37 = arith.constant 0 : index
    %67 = vector.load %arg5[%c0_36, %c0_37] : memref<4x8xf32, #tpu.memory_space<vmem>>, vector<4x8xf32>
    %cst_38 = arith.constant dense<0.000000e+00> : vector<256x8xf32>
    %68 = tpu.matmul %66, %67, %cst_38 {dimension_numbers = #tpu.dot_dimension_numbers<[1], [0], [0], [1], [0, 0, 1, 1], [], []>} : vector<256x4xf32>, vector<4x8xf32>, vector<256x8xf32> -> vector<256x8xf32>
    %c0_39 = arith.constant 0 : index
    %c0_40 = arith.constant 0 : index
    %69 = vector.load %arg6[%c0_39, %c0_40] : memref<1x8xf32, #tpu.memory_space<vmem>>, vector<1x8xf32>
    %70 = vector.broadcast %69 : vector<1x8xf32> to vector<256x8xf32>
    %71 = arith.mulf %68, %70 : vector<256x8xf32>
    %c0_41 = arith.constant 0 : index
    %c0_42 = arith.constant 0 : index
    %72 = vector.load %arg7[%c0_41, %c0_42] : memref<1x8xf32, #tpu.memory_space<vmem>>, vector<1x8xf32>
    %73 = vector.broadcast %72 : vector<1x8xf32> to vector<256x8xf32>
    %74 = arith.addf %71, %73 : vector<256x8xf32>
    %cst_43 = arith.constant 0.000000e+00 : f32
    %75 = vector.broadcast %cst_43 : f32 to vector<256x8xf32>
    %76 = arith.maximumf %74, %75 : vector<256x8xf32>
    %cst_44 = arith.constant 0.000000e+00 : f32
    %77 = vector.broadcast %cst_44 : f32 to vector<1x18x24x8xf32>
    %c0_45 = arith.constant 0 : index
    %c0_46 = arith.constant 0 : index
    %c0_47 = arith.constant 0 : index
    %c0_48 = arith.constant 0 : index
    %78 = vector.load %arg12[%c0_45, %c0_46, %c0_47, %c0_48] : memref<1x18x24x8xf32, #tpu.memory_space<vmem>>, vector<1x18x24x8xf32>
    tpu.vector_store %arg12[%c0_45, %c0_46, %c0_47, %c0_48], %77 {strides = array<i32>} : memref<1x18x24x8xf32, #tpu.memory_space<vmem>>, vector<1x18x24x8xf32>,
    %79 = vector.shape_cast %76 : vector<256x8xf32> to vector<1x16x16x8xf32>
    %c0_49 = arith.constant 0 : index
    %c1_50 = arith.constant 1 : index
    %c1_51 = arith.constant 1 : index
    %c0_52 = arith.constant 0 : index
    %80 = vector.load %arg12[%c0_49, %c1_50, %c1_51, %c0_52] : memref<1x18x24x8xf32, #tpu.memory_space<vmem>>, vector<1x16x16x8xf32>
    tpu.vector_store %arg12[%c0_49, %c1_50, %c1_51, %c0_52], %79 {strides = array<i32>} : memref<1x18x24x8xf32, #tpu.memory_space<vmem>>, vector<1x16x16x8xf32>,
    %c0_53 = arith.constant 0 : index
    %c0_54 = arith.constant 0 : index
    %c0_55 = arith.constant 0 : index
    %c0_56 = arith.constant 0 : index
    %81 = vector.load %arg12[%c0_53, %c0_54, %c0_55, %c0_56] : memref<1x18x24x8xf32, #tpu.memory_space<vmem>>, vector<1x18x24x8xf32>
    %82 = vector.extract_strided_slice %81 {offsets = [0, 0, 0, 0], sizes = [1, 18, 16, 8], strides = [1, 1, 1, 1]} : vector<1x18x24x8xf32> to vector<1x18x16x8xf32>
    %83 = vector.extract_strided_slice %81 {offsets = [0, 0, 1, 0], sizes = [1, 18, 16, 8], strides = [1, 1, 1, 1]} : vector<1x18x24x8xf32> to vector<1x18x16x8xf32>
    %84 = vector.extract_strided_slice %81 {offsets = [0, 0, 2, 0], sizes = [1, 18, 16, 8], strides = [1, 1, 1, 1]} : vector<1x18x24x8xf32> to vector<1x18x16x8xf32>
    %cst_57 = arith.constant 0.000000e+00 : f32
    %85 = vector.broadcast %cst_57 : f32 to vector<256x8xf32>
    %86 = vector.extract_strided_slice %82 {offsets = [0, 0, 0, 0], sizes = [1, 16, 16, 8], strides = [1, 1, 1, 1]} : vector<1x18x16x8xf32> to vector<1x16x16x8xf32>
    %87 = vector.shape_cast %86 : vector<1x16x16x8xf32> to vector<256x8xf32>
    %c0_58 = arith.constant 0 : index
    %c0_59 = arith.constant 0 : index
    %c0_60 = arith.constant 0 : index
    %88 = vector.load %arg8[%c0_58, %c0_59, %c0_60] : memref<9x8x8xf32, #tpu.memory_space<vmem>>, vector<1x8x8xf32>
    %89 = vector.shape_cast %88 : vector<1x8x8xf32> to vector<8x8xf32>
    %cst_61 = arith.constant dense<0.000000e+00> : vector<256x8xf32>
    %90 = tpu.matmul %87, %89, %cst_61 {dimension_numbers = #tpu.dot_dimension_numbers<[1], [0], [0], [1], [0, 0, 1, 1], [], []>} : vector<256x8xf32>, vector<8x8xf32>, vector<256x8xf32> -> vector<256x8xf32>
    %91 = arith.addf %85, %90 : vector<256x8xf32>
    %92 = vector.extract_strided_slice %83 {offsets = [0, 0, 0, 0], sizes = [1, 16, 16, 8], strides = [1, 1, 1, 1]} : vector<1x18x16x8xf32> to vector<1x16x16x8xf32>
    %93 = vector.shape_cast %92 : vector<1x16x16x8xf32> to vector<256x8xf32>
    %c1_62 = arith.constant 1 : index
    %c0_63 = arith.constant 0 : index
    %c0_64 = arith.constant 0 : index
    %94 = vector.load %arg8[%c1_62, %c0_63, %c0_64] : memref<9x8x8xf32, #tpu.memory_space<vmem>>, vector<1x8x8xf32>
    %95 = vector.shape_cast %94 : vector<1x8x8xf32> to vector<8x8xf32>
    %cst_65 = arith.constant dense<0.000000e+00> : vector<256x8xf32>
    %96 = tpu.matmul %93, %95, %cst_65 {dimension_numbers = #tpu.dot_dimension_numbers<[1], [0], [0], [1], [0, 0, 1, 1], [], []>} : vector<256x8xf32>, vector<8x8xf32>, vector<256x8xf32> -> vector<256x8xf32>
    %97 = arith.addf %91, %96 : vector<256x8xf32>
    %98 = vector.extract_strided_slice %84 {offsets = [0, 0, 0, 0], sizes = [1, 16, 16, 8], strides = [1, 1, 1, 1]} : vector<1x18x16x8xf32> to vector<1x16x16x8xf32>
    %99 = vector.shape_cast %98 : vector<1x16x16x8xf32> to vector<256x8xf32>
    %c2_66 = arith.constant 2 : index
    %c0_67 = arith.constant 0 : index
    %c0_68 = arith.constant 0 : index
    %100 = vector.load %arg8[%c2_66, %c0_67, %c0_68] : memref<9x8x8xf32, #tpu.memory_space<vmem>>, vector<1x8x8xf32>
    %101 = vector.shape_cast %100 : vector<1x8x8xf32> to vector<8x8xf32>
    %cst_69 = arith.constant dense<0.000000e+00> : vector<256x8xf32>
    %102 = tpu.matmul %99, %101, %cst_69 {dimension_numbers = #tpu.dot_dimension_numbers<[1], [0], [0], [1], [0, 0, 1, 1], [], []>} : vector<256x8xf32>, vector<8x8xf32>, vector<256x8xf32> -> vector<256x8xf32>
    %103 = arith.addf %97, %102 : vector<256x8xf32>
    %104 = vector.extract_strided_slice %82 {offsets = [0, 1, 0, 0], sizes = [1, 16, 16, 8], strides = [1, 1, 1, 1]} : vector<1x18x16x8xf32> to vector<1x16x16x8xf32>
    %105 = vector.shape_cast %104 : vector<1x16x16x8xf32> to vector<256x8xf32>
    %c3_70 = arith.constant 3 : index
    %c0_71 = arith.constant 0 : index
    %c0_72 = arith.constant 0 : index
    %106 = vector.load %arg8[%c3_70, %c0_71, %c0_72] : memref<9x8x8xf32, #tpu.memory_space<vmem>>, vector<1x8x8xf32>
    %107 = vector.shape_cast %106 : vector<1x8x8xf32> to vector<8x8xf32>
    %cst_73 = arith.constant dense<0.000000e+00> : vector<256x8xf32>
    %108 = tpu.matmul %105, %107, %cst_73 {dimension_numbers = #tpu.dot_dimension_numbers<[1], [0], [0], [1], [0, 0, 1, 1], [], []>} : vector<256x8xf32>, vector<8x8xf32>, vector<256x8xf32> -> vector<256x8xf32>
    %109 = arith.addf %103, %108 : vector<256x8xf32>
    %110 = vector.extract_strided_slice %83 {offsets = [0, 1, 0, 0], sizes = [1, 16, 16, 8], strides = [1, 1, 1, 1]} : vector<1x18x16x8xf32> to vector<1x16x16x8xf32>
    %111 = vector.shape_cast %110 : vector<1x16x16x8xf32> to vector<256x8xf32>
    %c4_74 = arith.constant 4 : index
    %c0_75 = arith.constant 0 : index
    %c0_76 = arith.constant 0 : index
    %112 = vector.load %arg8[%c4_74, %c0_75, %c0_76] : memref<9x8x8xf32, #tpu.memory_space<vmem>>, vector<1x8x8xf32>
    %113 = vector.shape_cast %112 : vector<1x8x8xf32> to vector<8x8xf32>
    %cst_77 = arith.constant dense<0.000000e+00> : vector<256x8xf32>
    %114 = tpu.matmul %111, %113, %cst_77 {dimension_numbers = #tpu.dot_dimension_numbers<[1], [0], [0], [1], [0, 0, 1, 1], [], []>} : vector<256x8xf32>, vector<8x8xf32>, vector<256x8xf32> -> vector<256x8xf32>
    %115 = arith.addf %109, %114 : vector<256x8xf32>
    %116 = vector.extract_strided_slice %84 {offsets = [0, 1, 0, 0], sizes = [1, 16, 16, 8], strides = [1, 1, 1, 1]} : vector<1x18x16x8xf32> to vector<1x16x16x8xf32>
    %117 = vector.shape_cast %116 : vector<1x16x16x8xf32> to vector<256x8xf32>
    %c5_78 = arith.constant 5 : index
    %c0_79 = arith.constant 0 : index
    %c0_80 = arith.constant 0 : index
    %118 = vector.load %arg8[%c5_78, %c0_79, %c0_80] : memref<9x8x8xf32, #tpu.memory_space<vmem>>, vector<1x8x8xf32>
    %119 = vector.shape_cast %118 : vector<1x8x8xf32> to vector<8x8xf32>
    %cst_81 = arith.constant dense<0.000000e+00> : vector<256x8xf32>
    %120 = tpu.matmul %117, %119, %cst_81 {dimension_numbers = #tpu.dot_dimension_numbers<[1], [0], [0], [1], [0, 0, 1, 1], [], []>} : vector<256x8xf32>, vector<8x8xf32>, vector<256x8xf32> -> vector<256x8xf32>
    %121 = arith.addf %115, %120 : vector<256x8xf32>
    %122 = vector.extract_strided_slice %82 {offsets = [0, 2, 0, 0], sizes = [1, 16, 16, 8], strides = [1, 1, 1, 1]} : vector<1x18x16x8xf32> to vector<1x16x16x8xf32>
    %123 = vector.shape_cast %122 : vector<1x16x16x8xf32> to vector<256x8xf32>
    %c6_82 = arith.constant 6 : index
    %c0_83 = arith.constant 0 : index
    %c0_84 = arith.constant 0 : index
    %124 = vector.load %arg8[%c6_82, %c0_83, %c0_84] : memref<9x8x8xf32, #tpu.memory_space<vmem>>, vector<1x8x8xf32>
    %125 = vector.shape_cast %124 : vector<1x8x8xf32> to vector<8x8xf32>
    %cst_85 = arith.constant dense<0.000000e+00> : vector<256x8xf32>
    %126 = tpu.matmul %123, %125, %cst_85 {dimension_numbers = #tpu.dot_dimension_numbers<[1], [0], [0], [1], [0, 0, 1, 1], [], []>} : vector<256x8xf32>, vector<8x8xf32>, vector<256x8xf32> -> vector<256x8xf32>
    %127 = arith.addf %121, %126 : vector<256x8xf32>
    %128 = vector.extract_strided_slice %83 {offsets = [0, 2, 0, 0], sizes = [1, 16, 16, 8], strides = [1, 1, 1, 1]} : vector<1x18x16x8xf32> to vector<1x16x16x8xf32>
    %129 = vector.shape_cast %128 : vector<1x16x16x8xf32> to vector<256x8xf32>
    %c7_86 = arith.constant 7 : index
    %c0_87 = arith.constant 0 : index
    %c0_88 = arith.constant 0 : index
    %130 = vector.load %arg8[%c7_86, %c0_87, %c0_88] : memref<9x8x8xf32, #tpu.memory_space<vmem>>, vector<1x8x8xf32>
    %131 = vector.shape_cast %130 : vector<1x8x8xf32> to vector<8x8xf32>
    %cst_89 = arith.constant dense<0.000000e+00> : vector<256x8xf32>
    %132 = tpu.matmul %129, %131, %cst_89 {dimension_numbers = #tpu.dot_dimension_numbers<[1], [0], [0], [1], [0, 0, 1, 1], [], []>} : vector<256x8xf32>, vector<8x8xf32>, vector<256x8xf32> -> vector<256x8xf32>
    %133 = arith.addf %127, %132 : vector<256x8xf32>
    %134 = vector.extract_strided_slice %84 {offsets = [0, 2, 0, 0], sizes = [1, 16, 16, 8], strides = [1, 1, 1, 1]} : vector<1x18x16x8xf32> to vector<1x16x16x8xf32>
    %135 = vector.shape_cast %134 : vector<1x16x16x8xf32> to vector<256x8xf32>
    %c8_90 = arith.constant 8 : index
    %c0_91 = arith.constant 0 : index
    %c0_92 = arith.constant 0 : index
    %136 = vector.load %arg8[%c8_90, %c0_91, %c0_92] : memref<9x8x8xf32, #tpu.memory_space<vmem>>, vector<1x8x8xf32>
    %137 = vector.shape_cast %136 : vector<1x8x8xf32> to vector<8x8xf32>
    %cst_93 = arith.constant dense<0.000000e+00> : vector<256x8xf32>
    %138 = tpu.matmul %135, %137, %cst_93 {dimension_numbers = #tpu.dot_dimension_numbers<[1], [0], [0], [1], [0, 0, 1, 1], [], []>} : vector<256x8xf32>, vector<8x8xf32>, vector<256x8xf32> -> vector<256x8xf32>
    %139 = arith.addf %133, %138 : vector<256x8xf32>
    %c0_94 = arith.constant 0 : index
    %c0_95 = arith.constant 0 : index
    %140 = vector.load %arg9[%c0_94, %c0_95] : memref<1x8xf32, #tpu.memory_space<vmem>>, vector<1x8xf32>
    %141 = vector.broadcast %140 : vector<1x8xf32> to vector<256x8xf32>
    %142 = arith.mulf %139, %141 : vector<256x8xf32>
    %c0_96 = arith.constant 0 : index
    %c0_97 = arith.constant 0 : index
    %143 = vector.load %arg10[%c0_96, %c0_97] : memref<1x8xf32, #tpu.memory_space<vmem>>, vector<1x8xf32>
    %144 = vector.broadcast %143 : vector<1x8xf32> to vector<256x8xf32>
    %145 = arith.addf %142, %144 : vector<256x8xf32>
    %cst_98 = arith.constant 0.000000e+00 : f32
    %146 = vector.broadcast %cst_98 : f32 to vector<256x8xf32>
    %147 = arith.maximumf %145, %146 : vector<256x8xf32>
    %148 = vector.shape_cast %147 : vector<256x8xf32> to vector<1x16x16x8xf32>
    %c0_99 = arith.constant 0 : index
    %c0_100 = arith.constant 0 : index
    %c0_101 = arith.constant 0 : index
    %c0_102 = arith.constant 0 : index
    %149 = vector.load %arg11[%c0_99, %c0_100, %c0_101, %c0_102] : memref<1x16x16x8xf32, #tpu.memory_space<vmem>>, vector<1x16x16x8xf32>
    tpu.vector_store %arg11[%c0_99, %c0_100, %c0_101, %c0_102], %148 {strides = array<i32>} : memref<1x16x16x8xf32, #tpu.memory_space<vmem>>, vector<1x16x16x8xf32>,
    return
  }
  func.func @transform_0(%arg0: i32) -> (i32, i32, i32, i32) {
    %c0_i32 = arith.constant 0 : i32
    %c0_i32_0 = arith.constant 0 : i32
    %c0_i32_1 = arith.constant 0 : i32
    %c0_i32_2 = arith.constant 0 : i32
    return %arg0, %c0_i32, %c0_i32_0, %c0_i32_1 : i32, i32, i32, i32
  }
  func.func @transform_1(%arg0: i32) -> (i32, i32, i32) {
    %c0_i32 = arith.constant 0 : i32
    %c0_i32_0 = arith.constant 0 : i32
    %c0_i32_1 = arith.constant 0 : i32
    %c0_i32_2 = arith.constant 0 : i32
    return %c0_i32, %c0_i32_0, %c0_i32_1 : i32, i32, i32
  }
  func.func @transform_2(%arg0: i32) -> (i32, i32) {
    %c0_i32 = arith.constant 0 : i32
    %c0_i32_0 = arith.constant 0 : i32
    %c0_i32_1 = arith.constant 0 : i32
    return %c0_i32, %c0_i32_0 : i32, i32
  }
  func.func @transform_3(%arg0: i32) -> (i32, i32) {
    %c0_i32 = arith.constant 0 : i32
    %c0_i32_0 = arith.constant 0 : i32
    %c0_i32_1 = arith.constant 0 : i32
    return %c0_i32, %c0_i32_0 : i32, i32
  }
  func.func @transform_4(%arg0: i32) -> (i32, i32) {
    %c0_i32 = arith.constant 0 : i32
    %c0_i32_0 = arith.constant 0 : i32
    %c0_i32_1 = arith.constant 0 : i32
    return %c0_i32, %c0_i32_0 : i32, i32
  }
  func.func @transform_5(%arg0: i32) -> (i32, i32) {
    %c0_i32 = arith.constant 0 : i32
    %c0_i32_0 = arith.constant 0 : i32
    %c0_i32_1 = arith.constant 0 : i32
    return %c0_i32, %c0_i32_0 : i32, i32
  }
  func.func @transform_6(%arg0: i32) -> (i32, i32) {
    %c0_i32 = arith.constant 0 : i32
    %c0_i32_0 = arith.constant 0 : i32
    %c0_i32_1 = arith.constant 0 : i32
    return %c0_i32, %c0_i32_0 : i32, i32
  }
  func.func @transform_7(%arg0: i32) -> (i32, i32, i32) {
    %c0_i32 = arith.constant 0 : i32
    %c0_i32_0 = arith.constant 0 : i32
    %c0_i32_1 = arith.constant 0 : i32
    %c0_i32_2 = arith.constant 0 : i32
    return %c0_i32, %c0_i32_0, %c0_i32_1 : i32, i32, i32
  }
  func.func @transform_8(%arg0: i32) -> (i32, i32) {
    %c0_i32 = arith.constant 0 : i32
    %c0_i32_0 = arith.constant 0 : i32
    %c0_i32_1 = arith.constant 0 : i32
    return %c0_i32, %c0_i32_0 : i32, i32
  }
  func.func @transform_9(%arg0: i32) -> (i32, i32) {
    %c0_i32 = arith.constant 0 : i32
    %c0_i32_0 = arith.constant 0 : i32
    %c0_i32_1 = arith.constant 0 : i32
    return %c0_i32, %c0_i32_0 : i32, i32
  }
  func.func @transform_10(%arg0: i32) -> (i32, i32, i32, i32) {
    %c0_i32 = arith.constant 0 : i32
    %c0_i32_0 = arith.constant 0 : i32
    %c0_i32_1 = arith.constant 0 : i32
    %c0_i32_2 = arith.constant 0 : i32
    return %arg0, %c0_i32, %c0_i32_0, %c0_i32_1 : i32, i32, i32, i32
  }
}

</mosaic_0001>

<bundles_post_ra>
// kernel: basic_conv_block.1
= control target key start
LH: loop header
LB: loop body
LE: loop exit
PB: predicated region body
PF: predicated region fallthrough
CT: control target
= control target key end

     0   :  { %s9067_s13 = smov 0   ;;  %s12687_s0 = inlined_call_operand.vmem [shape: f32[2,18,24,4], index: 0, kind: input, shape index: {}]   ;;  %s12688_s1 = inlined_call_operand.vmem [shape: f32[9,4,4], index: 1, kind: input, shape index: {}]   ;;  %s12689_s2 = inlined_call_operand.vmem [shape: f32[1,4], index: 2, kind: input, shape index: {}]   ;;  %s12690_s3 = inlined_call_operand.vmem [shape: f32[1,4], index: 3, kind: input, shape index: {}]   ;;  %s12691_s4 = inlined_call_operand.vmem [shape: f32[4,8], index: 4, kind: input, shape index: {}]   ;;  %s12692_s5 = inlined_call_operand.vmem [shape: f32[1,8], index: 5, kind: input, shape index: {}]   ;;  %s12693_s6 = inlined_call_operand.vmem [shape: f32[1,8], index: 6, kind: input, shape index: {}]   ;;  %s12694_s7 = inlined_call_operand.vmem [shape: f32[9,8,8], index: 7, kind: input, shape index: {}]   ;;  %s12695_s8 = inlined_call_operand.vmem [shape: f32[1,8], index: 8, kind: input, shape index: {}]   ;;  %s12696_s9 = inlined_call_operand.vmem [shape: f32[1,8], index: 9, kind: input, shape index: {}]   ;;  %s12697_s10 = inlined_call_operand.vmem [shape: f32[2,16,16,8], index: 10, kind: output, shape index: {}]  }
   0x1 LB: > { %s6761_s14 = sadd.s32 4294967295, %s9009_s13   ;;  %p6765_p0 = scmp.ge.s32.totalorder %s9009_s13, 1  ;;  %s9009_s13 = sphi %s9067_s13, %s20_s13  }
   0x2   : > { %p312_p1 = scmp.lt.s32.totalorder %s9009_s13, 3 }
   0x4   : > { %p313_p2 = pnand %p6765_p0, %p312_p1 }
   0x6   : > { %316 = sbr.rel (%p313_p2) target bundleno = 1184 (0x4a0), region = 60 }
   0xb   : > { %v6769_v0 = vld [vmem:[%s12688_s1 + $0x4] sm:$0xf]  ;;  %vm611_vm0 = vcmask 1043456   ;;  %p350_p3 = scmp.lt.s32.totalorder %s6761_s14, 1  ;;  %v414_v1 = vld [vmem:[%s12688_s1] sm:$0xf] }
   0xc   : > { %8989 = vmatprep.subr.msk.mxu1 %vm611_vm0, %v6769_v0  ;;  %8039 = vmatprep.subr.msk.mxu0 %vm611_vm0, %v6769_v0  ;;  %v6836_v2 = vld [vmem:[%s12688_s1 + $0x8] sm:$0xf]  ;;  %vm463_vm1 = vcmask 1046528   ;;  %vm546_vm2 = vcmask 31744   ;;  %v9143_v23 = vld [vmem:[%s12688_s1 + $0xc] sm:$0xf] }
   0xd   : > { %8990 = vmatpush3.msk.msra.mxu1 %vm611_vm0, %v6769_v0  ;;  %8040 = vmatpush3.msk.msra.mxu0 %vm611_vm0, %v6769_v0  ;;  %s13313_s14 = smov (!%p350_p3, %s6761_s14), 1  ;;  %v9166_v31 = vld [vmem:[%s12688_s1 + $0x10] sm:$0xf]  ;;  %vm1132_vm3 = vcmask 1045504   ;;  %vm3706_vm4 = vcmask 64512  }
   0xe   : > { %8089 = vmatprep.subr.msk.mxu1 %vm611_vm0, %v414_v1  ;;  %8139 = vmatprep.subr.msk.mxu0 %vm611_vm0, %v6836_v2  ;;  %s8991_s21 = smul.u32 432, %s13313_s14  ;;  %s7411_s15 = sshll.u32 %s13313_s14, 8 }
   0xf   : > { %s12446_s17 = scalar_lea.vmem %s12697_s10, %s7411_s15 }
  0x10   : > { %s9096_s24 = scalar_lea.vmem %s12687_s0, %s8991_s21 }
  0x11   : > { %v9099_v3 = vld [vmem:[%s9096_s24] sm:$0xff]  ;;  %v9102_v4 = vld [vmem:[%s9096_s24 + $0x8] sm:$0xff]  ;;  %v9114_v10 = vld [vmem:[%s9096_s24 + $0x10] sm:$0xff] }
  0x12   : > { %v9105_v5 = vld [vmem:[%s9096_s24 + $0xc0] sm:$0xff]  ;;  %v464_v6 = vrot.slane %v9099_v3, 1  ;;  %v465_v7 = vrot.slane %v9102_v4, 1  ;;  %v9110_v8 = vld [vmem:[%s9096_s24 + $0xc8] sm:$0xff]  ;;  %v9117_v11 = vld [vmem:[%s9096_s24 + $0xd0] sm:$0xff]  ;;  %v467_v13 = vrot.slane %v9114_v10, 1 }
  0x13   : > { %v504_v9 = vrot.slane %v9105_v5, 1  ;;  %v505_v12 = vrot.slane %v9110_v8, 1  ;;  %v507_v14 = vrot.slane %v9117_v11, 1  ;;  %v9123_v15 = vld [vmem:[%s9096_s24 + $0x18] sm:$0xff]  ;;  %v9126_v16 = vld [vmem:[%s9096_s24 + $0x20] sm:$0xff]  ;;  %v9138_v22 = vld [vmem:[%s9096_s24 + $0x28] sm:$0xff] }
  0x14   : > { %v466_v17 = vsel %vm463_vm1, %v464_v6, %v465_v7  ;;  %v469_v18 = vrot.slane %v9123_v15, 1  ;;  %v470_v19 = vrot.slane %v9126_v16, 1  ;;  %v9132_v20 = vld [vmem:[%s9096_s24 + $0xd8] sm:$0xff]  ;;  %v9135_v21 = vld [vmem:[%s9096_s24 + $0xe0] sm:$0xff]  ;;  %v468_v25 = vsel %vm463_vm1, %v465_v7, %v467_v13  ;;  %v9155_v28 = vld [vmem:[%s9096_s24 + $0xe8] sm:$0xff] }
  0x15   : > { %8041 = vmatprep.mubr.msk.f32.mxu0 %vm546_vm2, %v466_v17  ;;  %v9147_v24 = vsel %vm463_vm1, %v504_v9, %v505_v12  ;;  %v9151_v26 = vsel %vm463_vm1, %v505_v12, %v507_v14  ;;  %v509_v27 = vrot.slane %v9132_v20, 1  ;;  %v9158_v29 = vld [vmem:[%s9096_s24 + $0x30] sm:$0xff]  ;;  %v9161_v30 = vld [vmem:[%s9096_s24 + $0x38] sm:$0xff]  ;;  %v510_v33 = vrot.slane %v9135_v21, 1  ;;  %v9184_v38 = vld [vmem:[%s9096_s24 + $0x40] sm:$0xff] }
  0x16   : > { %12854 = vst [vmem:[#allocation3_spill] sm:$0xff] %v9147_v24  ;;  %12855 = vst [vmem:[#allocation4_spill] sm:$0xff] %v9151_v26  ;;  %8065 = vmatprep.mubr.msk.f32.mxu1 %vm546_vm2, %v9147_v24  ;;  %8042 = vmatmul.mubr.msk.f32.vlgmr.msra.gmra.mxu0 %vm546_vm2, %v468_v25  ;;  %v9172_v32 = vsel %vm463_vm1, %v469_v18, %v470_v19  ;;  %v472_v34 = vrot.slane %v9138_v22, 1  ;;  %v512_v35 = vrot.slane %v9155_v28, 1  ;;  %v9178_v36 = vld [vmem:[%s9096_s24 + $0xf0] sm:$0xff]  ;;  %v9181_v37 = vld [vmem:[%s9096_s24 + $0xf8] sm:$0xff] }
  0x17   : > { %12856 = vst [vmem:[#allocation5_spill] sm:$0xff] %v9172_v32  ;;  %8066 = vmatmul.mubr.msk.f32.vlgmr.msra.gmra.mxu1 %vm546_vm2, %v9151_v26  ;;  %8140 = vmatpush3.msk.msra.mxu0 %vm611_vm0, %v6836_v2  ;;  %v474_v39 = vrot.slane %v9158_v29, 1  ;;  %v475_v40 = vrot.slane %v9161_v30, 1  ;;  %v514_v41 = vrot.slane %v9178_v36, 1  ;;  %v515_v42 = vrot.slane %v9181_v37, 1  ;;  %v9194_v43 = vld [vmem:[%s9096_s24 + $0x100] sm:$0xff] }
  0x18   : > { %v9197_v44 = vld [vmem:[%s9096_s24 + $0x48] sm:$0xff]  ;;  %8090 = vmatpush3.msk.msra.mxu1 %vm611_vm0, %v414_v1  ;;  %8044 = vmatprep.mubr.msk.f32.mxu0 %vm546_vm2, %v9172_v32  ;;  %v9203_v45 = vsel %vm463_vm1, %v509_v27, %v510_v33  ;;  %v9206_v46 = vsel %vm463_vm1, %v470_v19, %v472_v34  ;;  %v9209_v47 = vsel %vm463_vm1, %v510_v33, %v512_v35  ;;  %v477_v48 = vrot.slane %v9184_v38, 1  ;;  %v9213_v49 = vld [vmem:[%s9096_s24 + $0x50] sm:$0xff]  ;;  %v9232_v56 = vld [vmem:[%s9096_s24 + $0x58] sm:$0xff] }
  0x19   : > { %12857 = vst [vmem:[#allocation6_spill] sm:$0xff] %v9203_v45  ;;  %12858 = vst [vmem:[#allocation7_spill] sm:$0xff] %v9206_v46  ;;  %v9216_v50 = vld [vmem:[%s9096_s24 + $0x108] sm:$0xff]  ;;  %v9219_v51 = vld [vmem:[%s9096_s24 + $0x110] sm:$0xff]  ;;  %8068 = vmatprep.mubr.msk.f32.mxu1 %vm546_vm2, %v9203_v45  ;;  %v9224_v52 = vsel %vm463_vm1, %v474_v39, %v475_v40  ;;  %v9227_v53 = vsel %vm463_vm1, %v514_v41, %v515_v42  ;;  %v517_v54 = vrot.slane %v9194_v43, 1  ;;  %v479_v55 = vrot.slane %v9197_v44, 1 }
  0x1a   : > { %12859 = vst [vmem:[#allocation8_spill] sm:$0xff] %v9209_v47  ;;  %12860 = vst [vmem:[#allocation9_spill] sm:$0xff] %v9224_v52  ;;  %v9235_v57 = vld [vmem:[%s9096_s24 + $0x118] sm:$0xff]  ;;  %v9238_v58 = vld [vmem:[%s9096_s24 + $0x60] sm:$0xff]  ;;  %8189 = vmatprep.subr.msk.mxu1 %vm611_vm0, %v9143_v23  ;;  %8045 = vmatmul.mubr.msk.f32.gmra.mxu0 %vm546_vm2, %v9206_v46  ;;  %v480_v59 = vrot.slane %v9213_v49, 1  ;;  %v519_v60 = vrot.slane %v9216_v50, 1  ;;  %v9263_v1 = vsel %vm463_vm1, %v475_v40, %v477_v48 }
  0x1b   : > { %12861 = vst [vmem:[#allocation10_spill] sm:$0xff] %v9227_v53  ;;  %v520_v61 = vrot.slane %v9219_v51, 1  ;;  %v9248_v62 = vld [vmem:[%s9096_s24 + $0x68] sm:$0xff]  ;;  %v9251_v63 = vld [vmem:[%s9096_s24 + $0x120] sm:$0xff]  ;;  %8239 = vmatprep.subr.msk.mxu0 %vm611_vm0, %v9166_v31  ;;  %8069 = vmatmul.mubr.msk.f32.gmra.mxu1 %vm546_vm2, %v9209_v47  ;;  %12862 = vst [vmem:[#allocation11_spill] sm:$0xff] %v9263_v1  ;;  %v482_v2 = vrot.slane %v9232_v56, 1  ;;  %v9270_v7 = vsel %vm463_vm1, %v515_v42, %v517_v54 }
  0x1c   : > { %v9254_v0 = vld [vmem:[%s9096_s24 + $0x128] sm:$0xff]  ;;  %8047 = vmatprep.mubr.msk.f32.mxu0 %vm546_vm2, %v9224_v52  ;;  %v522_v6 = vrot.slane %v9235_v57, 1  ;;  %8071 = vmatprep.mubr.msk.f32.mxu1 %vm546_vm2, %v9227_v53  ;;  %12863 = vst [vmem:[#allocation12_spill] sm:$0xff] %v9270_v7  ;;  %v9273_v9 = vsel %vm463_vm1, %v479_v55, %v480_v59  ;;  %v484_v12 = vrot.slane %v9238_v58, 1  ;;  %v485_v13 = vrot.slane %v9248_v62, 1  ;;  %v9278_v14 = vld [vmem:[%s9096_s24 + $0x70] sm:$0xff] }
  0x1d   : > { %12864 = vst [vmem:[#allocation13_spill] sm:$0xff] %v9273_v9  ;;  %v9281_v17 = vsel %vm463_vm1, %v519_v60, %v520_v61  ;;  %v524_v18 = vrot.slane %v9251_v63, 1  ;;  %v525_v19 = vrot.slane %v9254_v0, 1  ;;  %v9286_v25 = vld [vmem:[%s9096_s24 + $0x130] sm:$0xff]  ;;  %v9289_v27 = vld [vmem:[%s9096_s24 + $0x78] sm:$0xff]  ;;  %v9292_v33 = vld [vmem:[%s9096_s24 + $0x80] sm:$0xff]  ;;  %v9307_v39 = vsel %vm463_vm1, %v480_v59, %v482_v2 }
  0x1e   : > { %12865 = vst [vmem:[#allocation14_spill] sm:$0xff] %v9281_v17  ;;  %8048 = vmatmul.mubr.msk.f32.gmra.mxu0 %vm546_vm2, %v9263_v1  ;;  %v9297_v34 = vld [vmem:[%s9096_s24 + $0x138] sm:$0xff]  ;;  %v9300_v35 = vld [vmem:[%s9096_s24 + $0x140] sm:$0xff]  ;;  %12866 = vst [vmem:[#allocation15_spill] sm:$0xff] %v9307_v39  ;;  %v9310_v40 = vsel %vm463_vm1, %v520_v61, %v522_v6  ;;  %v487_v41 = vrot.slane %v9278_v14, 1  ;;  %v9316_v42 = vsel %vm463_vm1, %v484_v12, %v485_v13  ;;  %v527_v48 = vrot.slane %v9286_v25, 1 }
  0x1f   : > { %8072 = vmatmul.mubr.msk.f32.gmra.mxu1 %vm546_vm2, %v9270_v7  ;;  %8050 = vmatprep.mubr.msk.f32.mxu0 %vm546_vm2, %v9273_v9  ;;  %12867 = vst [vmem:[#allocation16_spill] sm:$0xff] %v9310_v40  ;;  %12868 = vst [vmem:[#allocation17_spill] sm:$0xff] %v9316_v42  ;;  %v489_v54 = vrot.slane %v9289_v27, 1  ;;  %v490_v55 = vrot.slane %v9292_v33, 1  ;;  %v9322_v59 = vld [vmem:[%s9096_s24 + $0x88] sm:$0xff]  ;;  %v9328_v61 = vsel %vm463_vm1, %v524_v18, %v525_v19  ;;  %v529_v2 = vrot.slane %v9297_v34, 1 }
  0x20   : > { %8074 = vmatprep.mubr.msk.f32.mxu1 %vm546_vm2, %v9281_v17  ;;  %v9325_v60 = vld [vmem:[%s9096_s24 + $0x148] sm:$0xff]  ;;  %12869 = vst [vmem:[#allocation18_spill] sm:$0xff] %v9328_v61  ;;  %v530_v6 = vrot.slane %v9300_v35, 1  ;;  %v9333_v12 = vld [vmem:[%s9096_s24 + $0x90] sm:$0xff]  ;;  %v9336_v17 = vld [vmem:[%s9096_s24 + $0x98] sm:$0xff]  ;;  %v9351_v18 = vsel %vm463_vm1, %v485_v13, %v487_v41  ;;  %v492_v47 = vrot.slane %v9322_v59, 1  ;;  %v9358_v26 = vsel %vm463_vm1, %v525_v19, %v527_v48 }
  0x21   : > { %v9341_v7 = vld [vmem:[%s9096_s24 + $0x150] sm:$0xff]  ;;  %v9344_v53 = vld [vmem:[%s9096_s24 + $0x158] sm:$0xff]  ;;  %12871 = vst [vmem:[#allocation20_spill] sm:$0xff] %v9351_v18  ;;  %v532_v45 = vrot.slane %v9325_v60, 1  ;;  %12872 = vst [vmem:[#allocation21_spill] sm:$0xff] %v9358_v26  ;;  %v494_v24 = vrot.slane %v9333_v12, 1 }
  0x22   : > { %8051 = vmatmul.mubr.msk.f32.gmra.mxu0 %vm546_vm2, %v9307_v39  ;;  %12870 = vst [vmem:[#allocation19_spill] sm:$0xff] %v9344_v53  ;;  %v495_v13 = vrot.slane %v9336_v17, 1  ;;  %v9366_v41 = vld [vmem:[%s9096_s24 + $0xa0] sm:$0xff]  ;;  %v534_v39 = vrot.slane %v9341_v7, 1  ;;  %v535_v9 = vrot.slane %v9344_v53, 1  ;;  %v9377_v19 = vld [vmem:[%s9096_s24 + $0xa8] sm:$0xff] }
  0x23   : > { %8075 = vmatmul.mubr.msk.f32.gmra.mxu1 %vm546_vm2, %v9310_v40  ;;  %8053 = vmatprep.mubr.msk.f32.mxu0 %vm546_vm2, %v9316_v42  ;;  %v9361_v40 = vsel %vm463_vm1, %v489_v54, %v490_v55  ;;  %v9369_v42 = vsel %vm463_vm1, %v529_v2, %v530_v6  ;;  %v9380_v48 = vld [vmem:[%s9096_s24 + $0xb0] sm:$0xff]  ;;  %v9385_v54 = vld [vmem:[%s9096_s24 + $0x168] sm:$0xff]  ;;  %v9395_v2 = vsel %vm463_vm1, %v490_v55, %v492_v47  ;;  %v497_v46 = vrot.slane %v9366_v41, 1  ;;  %v9410_v53 = vld [vmem:[%s9096_s24 + $0xb8] sm:$0xff] }
  0x24   : > { %8077 = vmatprep.mubr.msk.f32.mxu1 %vm546_vm2, %v9328_v61  ;;  %12873 = vst [vmem:[#allocation22_spill] sm:$0xff] %v9361_v40  ;;  %12874 = vst [vmem:[#allocation23_spill] sm:$0xff] %v9369_v42  ;;  %v9374_v61 = vld [vmem:[%s9096_s24 + $0x160] sm:$0xff]  ;;  %v9388_v1 = vld [vmem:[%s9096_s24 + $0x170] sm:$0xff]  ;;  %v9398_v52 = vsel %vm463_vm1, %v530_v6, %v532_v45  ;;  %v9413_v47 = vsel %vm463_vm1, %v534_v39, %v535_v9  ;;  %v539_v45 = vrot.slane %v9385_v54, 1  ;;  %v502_v39 = vrot.slane %v9410_v53, 1 }
  0x25   : > { %12875 = vst [vmem:[#allocation24_spill] sm:$0xff] %v9388_v1  ;;  %12876 = vst [vmem:[#allocation25_spill] sm:$0xff] %v9395_v2  ;;  %v537_v32 = vrot.slane %v9374_v61, 1  ;;  %v540_v55 = vrot.slane %v9388_v1, 1  ;;  %v9418_v6 = vld [vmem:[%s9096_s24 + $0x178] sm:$0xff] }
  0x26   : > { %8054 = vmatmul.mubr.msk.f32.gmra.mxu0 %vm546_vm2, %v9351_v18  ;;  %12877 = vst [vmem:[#allocation26_spill] sm:$0xff] %v9398_v52  ;;  %v9404_v18 = vsel %vm463_vm1, %v494_v24, %v495_v13  ;;  %12879 = vst [vmem:[#allocation28_spill] sm:$0xff] %v9413_v47  ;;  %v9427_v24 = vsel %vm463_vm1, %v495_v13, %v497_v46  ;;  %v1136_v13 = vrot.slane %v9114_v10, 2  ;;  %v1138_v10 = vrot.slane %v9123_v15, 2 }
  0x27   : > { %8078 = vmatmul.mubr.msk.f32.gmra.mxu1 %vm546_vm2, %v9358_v26  ;;  %8056 = vmatprep.mubr.msk.f32.mxu0 %vm546_vm2, %v9361_v40  ;;  %12878 = vst [vmem:[#allocation27_spill] sm:$0xff] %v9404_v18  ;;  %v499_v26 = vrot.slane %v9377_v19, 1  ;;  %v500_v40 = vrot.slane %v9380_v48, 1  ;;  %12880 = vst [vmem:[#allocation29_spill] sm:$0xff] %v9427_v24  ;;  %v9434_v1 = vsel %vm463_vm1, %v535_v9, %v537_v32 }
  0x28   : > { %8080 = vmatprep.mubr.msk.f32.mxu1 %vm546_vm2, %v9369_v42  ;;  %v1133_v42 = vrot.slane %v9099_v3, 2  ;;  %12881 = vst [vmem:[#allocation30_spill] sm:$0xff] %v9434_v1  ;;  %v9442_v46 = vsel %vm463_vm1, %v539_v45, %v540_v55  ;;  %v1139_v45 = vrot.slane %v9126_v16, 2 }
  0x2a   : > { %8057 = vmatmul.mubr.msk.f32.gmra.mxu0 %vm546_vm2, %v9395_v2  ;;  %v9437_v2 = vsel %vm463_vm1, %v499_v26, %v500_v40  ;;  %v9452_v26 = vsel %vm463_vm1, %v500_v40, %v502_v39  ;;  %v1141_v39 = vrot.slane %v9138_v22, 2  ;;  %v1146_v22 = vrot.slane %v9184_v38, 2 }
  0x2b   : > { %8081 = vmatmul.mubr.msk.f32.gmra.mxu1 %vm546_vm2, %v9398_v52  ;;  %8059 = vmatprep.mubr.msk.f32.mxu0 %vm546_vm2, %v9404_v18  ;;  %12882 = vst [vmem:[#allocation31_spill] sm:$0xff] %v9437_v2  ;;  %v542_v52 = vrot.slane %v9418_v6, 1  ;;  %v1134_v18 = vrot.slane %v9102_v4, 2  ;;  %12883 = vst [vmem:[#allocation32_spill] sm:$0xff] %v9452_v26  ;;  %v1151_v38 = vrot.slane %v9232_v56, 2 }
  0x2c   : > { %8083 = vmatprep.mubr.msk.f32.mxu1 %vm546_vm2, %v9413_v47 }
  0x2d   : > { %v9457_v32 = vsel %vm463_vm1, %v540_v55, %v542_v52  ;;  %v1135_v9 = vsel %vm1132_vm3, %v1133_v42, %v1134_v18  ;;  %v1137_v40 = vsel %vm1132_vm3, %v1134_v18, %v1136_v13  ;;  %v1143_v52 = vrot.slane %v9158_v29, 2  ;;  %v9493_v18 = vld [vmem:[%s12688_s1 + $0x18] sm:$0xf] }
  0x2e   : > { %8060 = vmatmul.mubr.msk.f32.gmra.mxu0 %vm546_vm2, %v9427_v24  ;;  %v1144_v42 = vrot.slane %v9161_v30, 2  ;;  %v9475_v55 = vsel %vm1132_vm3, %v1138_v10, %v1139_v45  ;;  %v1149_v13 = vrot.slane %v9213_v49, 2 }
  0x2f   : > { %8084 = vmatmul.mubr.msk.f32.gmra.mxu1 %vm546_vm2, %v9434_v1  ;;  %8062 = vmatprep.mubr.msk.f32.mxu0 %vm546_vm2, %v9437_v2 }
  0x30   : > { %8086 = vmatprep.mubr.msk.f32.mxu1 %vm546_vm2, %v9442_v46  ;;  %v9534_v56 = vsel %vm1132_vm3, %v1149_v13, %v1151_v38  ;;  %v1163_v38 = vrot.slane %v9333_v12, 2 }
  0x32   : > { %8063 = vmatmul.mubr.msk.f32.gmra.mxu0 %vm546_vm2, %v9452_v26 }
  0x33   : > { %8087 = vmatmul.mubr.msk.f32.gmra.mxu1 %vm546_vm2, %v9457_v32  ;;  %8141 = vmatprep.mubr.msk.f32.mxu0 %vm546_vm2, %v1135_v9  ;;  %v9480_v9 = vld [vmem:[%s12688_s1 + $0x14] sm:$0xf] }
  0x34   : > { %8091 = vmatprep.mubr.msk.f32.mxu1 %vm546_vm2, %v9099_v3  ;;  %v9487_v3 = vsel %vm1132_vm3, %v1139_v45, %v1141_v39  ;;  %v1153_v45 = vrot.slane %v9238_v58, 2  ;;  %v1156_v39 = vrot.slane %v9278_v14, 2 }
  0x36   : > { %8142 = vmatmul.mubr.msk.f32.vlgmr.msra.gmra.mxu0 %vm546_vm2, %v1137_v40  ;;  %v1154_v40 = vrot.slane %v9248_v62, 2 }
  0x37   : > { %8092 = vmatmul.mubr.msk.f32.vlgmr.msra.gmra.mxu1 %vm546_vm2, %v9102_v4  ;;  %8240 = vmatpush3.msk.msra.mxu0 %vm611_vm0, %v9166_v31  ;;  %v9500_v4 = vsel %vm1132_vm3, %v1143_v52, %v1144_v42  ;;  %v1148_v31 = vrot.slane %v9197_v44, 2 }
  0x38   : > { %8190 = vmatpush3.msk.msra.mxu1 %vm611_vm0, %v9143_v23  ;;  %8094 = vmatprep.mubr.msk.f32.mxu1 %vm546_vm2, %v9123_v15  ;;  %v9517_v23 = vsel %vm1132_vm3, %v1144_v42, %v1146_v22  ;;  %v9540_v52 = vsel %vm1132_vm3, %v1153_v45, %v1154_v40  ;;  %v1158_v42 = vrot.slane %v9289_v27, 2  ;;  %v1159_v22 = vrot.slane %v9292_v33, 2 }
  0x39   : > { %8144 = vmatprep.mubr.msk.f32.mxu0 %vm546_vm2, %v9475_v55  ;;  %8289 = vmatprep.subr.msk.mxu1 %vm611_vm0, %v9480_v9  ;;  %v9523_v10 = vsel %vm1132_vm3, %v1148_v31, %v1149_v13  ;;  %v9551_v14 = vsel %vm1132_vm3, %v1154_v40, %v1156_v39  ;;  %v1161_v31 = vrot.slane %v9322_v59, 2  ;;  %v1164_v45 = vrot.slane %v9336_v17, 2 }
  0x3a   : > { %8145 = vmatmul.mubr.msk.f32.gmra.mxu0 %vm546_vm2, %v9487_v3  ;;  %8339 = vmatprep.subr.msk.mxu0 %vm611_vm0, %v9493_v18  ;;  %12884 = vst [vmem:[#allocation33_spill] sm:$0xff] %v9551_v14  ;;  %v9557_v13 = vsel %vm1132_vm3, %v1158_v42, %v1159_v22  ;;  %v1166_v40 = vrot.slane %v9366_v41, 2  ;;  %v1168_v42 = vrot.slane %v9377_v19, 2 }
  0x3b   : > { %8095 = vmatmul.mubr.msk.f32.gmra.mxu1 %vm546_vm2, %v9126_v16  ;;  %8147 = vmatprep.mubr.msk.f32.mxu0 %vm546_vm2, %v9500_v4  ;;  %v9568_v59 = vsel %vm1132_vm3, %v1159_v22, %v1161_v31  ;;  %v9574_v39 = vsel %vm1132_vm3, %v1163_v38, %v1164_v45  ;;  %v1171_v22 = vrot.slane %v9410_v53, 2  ;;  %v1173_v38 = vrot.slane %v9105_v5, 2 }
  0x3c   : > { %8097 = vmatprep.mubr.msk.f32.mxu1 %vm546_vm2, %v9158_v29  ;;  %12885 = vst [vmem:[#allocation34_spill] sm:$0xff] %v9568_v59  ;;  %v9585_v41 = vsel %vm1132_vm3, %v1164_v45, %v1166_v40  ;;  %v1176_v45 = vrot.slane %v9117_v11, 2 }
  0x3d   : > { %12886 = vst [vmem:[#allocation35_spill] sm:$0xff] %v9585_v41 }
  0x3e   : > { %8148 = vmatmul.mubr.msk.f32.gmra.mxu0 %vm546_vm2, %v9517_v23 }
  0x3f   : > { %8098 = vmatmul.mubr.msk.f32.gmra.mxu1 %vm546_vm2, %v9161_v30  ;;  %8150 = vmatprep.mubr.msk.f32.mxu0 %vm546_vm2, %v9523_v10 }
  0x40   : > { %8100 = vmatprep.mubr.msk.f32.mxu1 %vm546_vm2, %v9197_v44 }
  0x42   : > { %8151 = vmatmul.mubr.msk.f32.gmra.mxu0 %vm546_vm2, %v9534_v56 }
  0x43   : > { %8101 = vmatmul.mubr.msk.f32.gmra.mxu1 %vm546_vm2, %v9213_v49  ;;  %8153 = vmatprep.mubr.msk.f32.mxu0 %vm546_vm2, %v9540_v52 }
  0x44   : > { %8103 = vmatprep.mubr.msk.f32.mxu1 %vm546_vm2, %v9238_v58 }
  0x46   : > { %8154 = vmatmul.mubr.msk.f32.gmra.mxu0 %vm546_vm2, %v9551_v14  ;;  %v1169_v14 = vrot.slane %v9380_v48, 2 }
  0x47   : > { %8104 = vmatmul.mubr.msk.f32.gmra.mxu1 %vm546_vm2, %v9248_v62  ;;  %8156 = vmatprep.mubr.msk.f32.mxu0 %vm546_vm2, %v9557_v13 }
  0x48   : > { %8106 = vmatprep.mubr.msk.f32.mxu1 %vm546_vm2, %v9289_v27  ;;  %v9591_v31 = vsel %vm1132_vm3, %v1168_v42, %v1169_v14  ;;  %v9602_v53 = vsel %vm1132_vm3, %v1169_v14, %v1171_v22  ;;  %v1178_v42 = vrot.slane %v9132_v20, 2  ;;  %v1181_v14 = vrot.slane %v9155_v28, 2 }
  0x49   : > { %12887 = vst [vmem:[#allocation36_spill] sm:$0xff] %v9602_v53 }
  0x4a   : > { %8157 = vmatmul.mubr.msk.f32.gmra.mxu0 %vm546_vm2, %v9568_v59  ;;  %v1174_v59 = vrot.slane %v9110_v8, 2 }
  0x4b   : > { %8107 = vmatmul.mubr.msk.f32.gmra.mxu1 %vm546_vm2, %v9292_v33  ;;  %8159 = vmatprep.mubr.msk.f32.mxu0 %vm546_vm2, %v9574_v39 }
  0x4c   : > { %8109 = vmatprep.mubr.msk.f32.mxu1 %vm546_vm2, %v9333_v12  ;;  %v9608_v40 = vsel %vm1132_vm3, %v1173_v38, %v1174_v59  ;;  %v9619_v11 = vsel %vm1132_vm3, %v1174_v59, %v1176_v45  ;;  %v1183_v38 = vrot.slane %v9178_v36, 2  ;;  %v1186_v59 = vrot.slane %v9194_v43, 2 }
  0x4d   : > { %12888 = vst [vmem:[#allocation37_spill] sm:$0xff] %v9619_v11 }
  0x4e   : > { %8160 = vmatmul.mubr.msk.f32.gmra.mxu0 %vm546_vm2, %v9585_v41  ;;  %v1179_v41 = vrot.slane %v9135_v21, 2 }
  0x4f   : > { %8110 = vmatmul.mubr.msk.f32.gmra.mxu1 %vm546_vm2, %v9336_v17  ;;  %8162 = vmatprep.mubr.msk.f32.mxu0 %vm546_vm2, %v9591_v31 }
  0x50   : > { %8112 = vmatprep.mubr.msk.f32.mxu1 %vm546_vm2, %v9377_v19  ;;  %v9625_v22 = vsel %vm1132_vm3, %v1178_v42, %v1179_v41  ;;  %v9636_v28 = vsel %vm1132_vm3, %v1179_v41, %v1181_v14  ;;  %v1188_v42 = vrot.slane %v9216_v50, 2  ;;  %v1191_v41 = vrot.slane %v9235_v57, 2 }
  0x51   : > { %12889 = vst [vmem:[#allocation38_spill] sm:$0xff] %v9636_v28 }
  0x52   : > { %8163 = vmatmul.mubr.msk.f32.gmra.mxu0 %vm546_vm2, %v9602_v53  ;;  %v1184_v53 = vrot.slane %v9181_v37, 2 }
  0x53   : > { %8113 = vmatmul.mubr.msk.f32.gmra.mxu1 %vm546_vm2, %v9380_v48  ;;  %8165 = vmatprep.mubr.msk.f32.mxu0 %vm546_vm2, %v9608_v40 }
  0x54   : > { %8115 = vmatprep.mubr.msk.f32.mxu1 %vm546_vm2, %v9105_v5  ;;  %v9642_v45 = vsel %vm1132_vm3, %v1183_v38, %v1184_v53  ;;  %v9653_v43 = vsel %vm1132_vm3, %v1184_v53, %v1186_v59  ;;  %v1193_v38 = vrot.slane %v9251_v63, 2  ;;  %v1196_v53 = vrot.slane %v9286_v25, 2 }
  0x55   : > { %12890 = vst [vmem:[#allocation39_spill] sm:$0xff] %v9653_v43 }
  0x56   : > { %8166 = vmatmul.mubr.msk.f32.gmra.mxu0 %vm546_vm2, %v9619_v11  ;;  %v1189_v11 = vrot.slane %v9219_v51, 2 }
  0x57   : > { %8116 = vmatmul.mubr.msk.f32.gmra.mxu1 %vm546_vm2, %v9110_v8  ;;  %8168 = vmatprep.mubr.msk.f32.mxu0 %vm546_vm2, %v9625_v22 }
  0x58   : > { %8118 = vmatprep.mubr.msk.f32.mxu1 %vm546_vm2, %v9132_v20  ;;  %v9659_v14 = vsel %vm1132_vm3, %v1188_v42, %v1189_v11  ;;  %v9670_v57 = vsel %vm1132_vm3, %v1189_v11, %v1191_v41  ;;  %v1198_v42 = vrot.slane %v9297_v34, 2  ;;  %v1201_v11 = vrot.slane %v9325_v60, 2 }
  0x59   : > { %12891 = vst [vmem:[#allocation40_spill] sm:$0xff] %v9659_v14  ;;  %12892 = vst [vmem:[#allocation41_spill] sm:$0xff] %v9670_v57 }
  0x5a   : > { %8169 = vmatmul.mubr.msk.f32.gmra.mxu0 %vm546_vm2, %v9636_v28  ;;  %v1194_v28 = vrot.slane %v9254_v0, 2 }
  0x5b   : > { %8119 = vmatmul.mubr.msk.f32.gmra.mxu1 %vm546_vm2, %v9135_v21  ;;  %8171 = vmatprep.mubr.msk.f32.mxu0 %vm546_vm2, %v9642_v45 }
  0x5c   : > { %8121 = vmatprep.mubr.msk.f32.mxu1 %vm546_vm2, %v9178_v36  ;;  %v9676_v59 = vsel %vm1132_vm3, %v1193_v38, %v1194_v28  ;;  %v9687_v25 = vsel %vm1132_vm3, %v1194_v28, %v1196_v53  ;;  %v1203_v38 = vrot.slane %v9341_v7, 2  ;;  %v1206_v28 = vrot.slane %v9374_v61, 2 }
  0x5d   : > { %12893 = vst [vmem:[#allocation42_spill] sm:$0xff] %v9676_v59  ;;  %12894 = vst [vmem:[#allocation43_spill] sm:$0xff] %v9687_v25 }
  0x5e   : > { %8172 = vmatmul.mubr.msk.f32.gmra.mxu0 %vm546_vm2, %v9653_v43  ;;  %v1199_v43 = vrot.slane %v9300_v35, 2 }
  0x5f   : > { %8122 = vmatmul.mubr.msk.f32.gmra.mxu1 %vm546_vm2, %v9181_v37  ;;  %8174 = vmatprep.mubr.msk.f32.mxu0 %vm546_vm2, %v9659_v14 }
  0x60   : > { %8124 = vmatprep.mubr.msk.f32.mxu1 %vm546_vm2, %v9216_v50  ;;  %v9693_v41 = vsel %vm1132_vm3, %v1198_v42, %v1199_v43  ;;  %v9704_v60 = vsel %vm1132_vm3, %v1199_v43, %v1201_v11  ;;  %v1208_v42 = vrot.slane %v9385_v54, 2  ;;  %v1211_v43 = vrot.slane %v9418_v6, 2  ;;  %v12897_v6 = vld [vmem:[#allocation5_spill] sm:$0xff] }
  0x62   : > { %8175 = vmatmul.mubr.msk.f32.gmra.mxu0 %vm546_vm2, %v9670_v57  ;;  %v12895_v57 = vld [vmem:[#allocation19_spill] sm:$0xff] }
  0x63   : > { %8125 = vmatmul.mubr.msk.f32.gmra.mxu1 %vm546_vm2, %v9219_v51  ;;  %8177 = vmatprep.mubr.msk.f32.mxu0 %vm546_vm2, %v9676_v59  ;;  %v1204_v14 = vrot.slane %v12895_v57, 2 }
  0x64   : > { %8127 = vmatprep.mubr.msk.f32.mxu1 %vm546_vm2, %v9251_v63 }
  0x65   : > { %v9710_v53 = vsel %vm1132_vm3, %v1203_v38, %v1204_v14  ;;  %v9721_v61 = vsel %vm1132_vm3, %v1204_v14, %v1206_v28  ;;  %v12898_v38 = vld [vmem:[#allocation7_spill] sm:$0xff]  ;;  %v9762_v28 = vld [vmem:[%s12688_s1 + $0x20] sm:$0xf] }
  0x66   : > { %8178 = vmatmul.mubr.msk.f32.gmra.mxu0 %vm546_vm2, %v9687_v25  ;;  %v12896_v25 = vld [vmem:[#allocation24_spill] sm:$0xff] }
  0x67   : > { %8128 = vmatmul.mubr.msk.f32.gmra.mxu1 %vm546_vm2, %v9254_v0  ;;  %8180 = vmatprep.mubr.msk.f32.mxu0 %vm546_vm2, %v9693_v41  ;;  %v1209_v59 = vrot.slane %v12896_v25, 2 }
  0x68   : > { %8130 = vmatprep.mubr.msk.f32.mxu1 %vm546_vm2, %v9297_v34 }
  0x69   : > { %v9727_v11 = vsel %vm1132_vm3, %v1208_v42, %v1209_v59  ;;  %v9736_v14 = vsel %vm1132_vm3, %v1209_v59, %v1211_v43  ;;  %v9753_v59 = vld [vmem:[%s12688_s1 + $0x1c] sm:$0xf]  ;;  %v12903_v42 = vld [vmem:[#allocation17_spill] sm:$0xff] }
  0x6a   : > { %8181 = vmatmul.mubr.msk.f32.gmra.mxu0 %vm546_vm2, %v9704_v60  ;;  %v12904_v43 = vld [vmem:[#allocation20_spill] sm:$0xff] }
  0x6b   : > { %8131 = vmatmul.mubr.msk.f32.gmra.mxu1 %vm546_vm2, %v9300_v35  ;;  %8183 = vmatprep.mubr.msk.f32.mxu0 %vm546_vm2, %v9710_v53 }
  0x6c   : > { %8133 = vmatprep.mubr.msk.f32.mxu1 %vm546_vm2, %v9341_v7 }
  0x6e   : > { %8184 = vmatmul.mubr.msk.f32.gmra.mxu0 %vm546_vm2, %v9721_v61 }
  0x6f   : > { %8134 = vmatmul.mubr.msk.f32.gmra.mxu1 %vm546_vm2, %v12895_v57  ;;  %8186 = vmatprep.mubr.msk.f32.mxu0 %vm546_vm2, %v9727_v11 }
  0x70   : > { %8136 = vmatprep.mubr.msk.f32.mxu1 %vm546_vm2, %v9385_v54 }
  0x72   : > { %8187 = vmatmul.mubr.msk.f32.gmra.mxu0 %vm546_vm2, %v9736_v14 }
  0x73   : > { %8137 = vmatmul.mubr.msk.f32.gmra.mxu1 %vm546_vm2, %v12896_v25  ;;  %8241 = vmatprep.mubr.msk.f32.mxu0 %vm546_vm2, %v12897_v6  ;;  %v12905_v6 = vld [vmem:[#allocation22_spill] sm:$0xff] }
  0x74   : > { %8191 = vmatprep.mubr.msk.f32.mxu1 %vm546_vm2, %v9123_v15  ;;  %v12899_v15 = vld [vmem:[#allocation9_spill] sm:$0xff] }
  0x76   : > { %8242 = vmatmul.mubr.msk.f32.vlgmr.msra.gmra.mxu0 %vm546_vm2, %v12898_v38  ;;  %v12906_v38 = vld [vmem:[#allocation25_spill] sm:$0xff] }
  0x77   : > { %8192 = vmatmul.mubr.msk.f32.vlgmr.msra.gmra.mxu1 %vm546_vm2, %v9126_v16  ;;  %8340 = vmatpush3.msk.msra.mxu0 %vm611_vm0, %v9493_v18  ;;  %v12900_v16 = vld [vmem:[#allocation11_spill] sm:$0xff]  ;;  %v12901_v18 = vld [vmem:[#allocation13_spill] sm:$0xff] }
  0x78   : > { %8290 = vmatpush3.msk.msra.mxu1 %vm611_vm0, %v9480_v9  ;;  %8194 = vmatprep.mubr.msk.f32.mxu1 %vm546_vm2, %v9158_v29  ;;  %v12902_v9 = vld [vmem:[#allocation15_spill] sm:$0xff] }
  0x79   : > { %8244 = vmatprep.mubr.msk.f32.mxu0 %vm546_vm2, %v12899_v15  ;;  %8389 = vmatprep.subr.msk.mxu1 %vm611_vm0, %v9753_v59 }
  0x7a   : > { %8245 = vmatmul.mubr.msk.f32.gmra.mxu0 %vm546_vm2, %v12900_v16  ;;  %8439 = vmatprep.subr.msk.mxu0 %vm611_vm0, %v9762_v28 }
  0x7b   : > { %8195 = vmatmul.mubr.msk.f32.gmra.mxu1 %vm546_vm2, %v9161_v30  ;;  %8247 = vmatprep.mubr.msk.f32.mxu0 %vm546_vm2, %v12901_v18 }
  0x7c   : > { %8197 = vmatprep.mubr.msk.f32.mxu1 %vm546_vm2, %v9197_v44 }
  0x7e   : > { %8248 = vmatmul.mubr.msk.f32.gmra.mxu0 %vm546_vm2, %v12902_v9 }
  0x7f   : > { %8198 = vmatmul.mubr.msk.f32.gmra.mxu1 %vm546_vm2, %v9213_v49  ;;  %8250 = vmatprep.mubr.msk.f32.mxu0 %vm546_vm2, %v12903_v42  ;;  %v12907_v42 = vld [vmem:[#allocation27_spill] sm:$0xff] }
  0x80   : > { %8200 = vmatprep.mubr.msk.f32.mxu1 %vm546_vm2, %v9238_v58 }
  0x82   : > { %8251 = vmatmul.mubr.msk.f32.gmra.mxu0 %vm546_vm2, %v12904_v43 }
  0x83   : > { %8201 = vmatmul.mubr.msk.f32.gmra.mxu1 %vm546_vm2, %v9248_v62  ;;  %8253 = vmatprep.mubr.msk.f32.mxu0 %vm546_vm2, %v12905_v6  ;;  %v9879_v6 = vld [vmem:[%s9096_s24 + $0x190] sm:$0xff] }
  0x84   : > { %8203 = vmatprep.mubr.msk.f32.mxu1 %vm546_vm2, %v9289_v27 }
  0x86   : > { %8254 = vmatmul.mubr.msk.f32.gmra.mxu0 %vm546_vm2, %v12906_v38  ;;  %v9866_v38 = vld [vmem:[%s9096_s24 + $0x188] sm:$0xff] }
  0x87   : > { %8204 = vmatmul.mubr.msk.f32.gmra.mxu1 %vm546_vm2, %v9292_v33  ;;  %8256 = vmatprep.mubr.msk.f32.mxu0 %vm546_vm2, %v12907_v42  ;;  %v12908_v42 = vld [vmem:[#allocation3_spill] sm:$0xff] }
  0x88   : > { %8206 = vmatprep.mubr.msk.f32.mxu1 %vm546_vm2, %v9333_v12 }
  0x8a   : > { %8257 = vmatmul.mubr.msk.f32.gmra.mxu0 %vm546_vm2, %v9427_v24  ;;  %v12909_v24 = vld [vmem:[#allocation4_spill] sm:$0xff] }
  0x8b   : > { %8207 = vmatmul.mubr.msk.f32.gmra.mxu1 %vm546_vm2, %v9336_v17  ;;  %8259 = vmatprep.mubr.msk.f32.mxu0 %vm546_vm2, %v9437_v2  ;;  %v12910_v2 = vld [vmem:[#allocation6_spill] sm:$0xff] }
  0x8c   : > { %8209 = vmatprep.mubr.msk.f32.mxu1 %vm546_vm2, %v9377_v19 }
  0x8e   : > { %8260 = vmatmul.mubr.msk.f32.gmra.mxu0 %vm546_vm2, %v9452_v26  ;;  %v12911_v26 = vld [vmem:[#allocation8_spill] sm:$0xff] }
  0x8f   : > { %8210 = vmatmul.mubr.msk.f32.gmra.mxu1 %vm546_vm2, %v9380_v48  ;;  %8262 = vmatprep.mubr.msk.f32.mxu0 %vm546_vm2, %v12908_v42  ;;  %v12912_v42 = vld [vmem:[#allocation10_spill] sm:$0xff] }
  0x90   : > { %8212 = vmatprep.mubr.msk.f32.mxu1 %vm546_vm2, %v9105_v5 }
  0x92   : > { %8263 = vmatmul.mubr.msk.f32.gmra.mxu0 %vm546_vm2, %v12909_v24  ;;  %v12913_v24 = vld [vmem:[#allocation12_spill] sm:$0xff] }
  0x93   : > { %8213 = vmatmul.mubr.msk.f32.gmra.mxu1 %vm546_vm2, %v9110_v8  ;;  %8265 = vmatprep.mubr.msk.f32.mxu0 %vm546_vm2, %v12910_v2  ;;  %v12914_v2 = vld [vmem:[#allocation14_spill] sm:$0xff] }
  0x94   : > { %8215 = vmatprep.mubr.msk.f32.mxu1 %vm546_vm2, %v9132_v20 }
  0x96   : > { %8266 = vmatmul.mubr.msk.f32.gmra.mxu0 %vm546_vm2, %v12911_v26  ;;  %v12915_v26 = vld [vmem:[#allocation16_spill] sm:$0xff] }
  0x97   : > { %8216 = vmatmul.mubr.msk.f32.gmra.mxu1 %vm546_vm2, %v9135_v21  ;;  %8268 = vmatprep.mubr.msk.f32.mxu0 %vm546_vm2, %v12912_v42  ;;  %v12916_v42 = vld [vmem:[#allocation18_spill] sm:$0xff] }
  0x98   : > { %8218 = vmatprep.mubr.msk.f32.mxu1 %vm546_vm2, %v9178_v36 }
  0x9a   : > { %8269 = vmatmul.mubr.msk.f32.gmra.mxu0 %vm546_vm2, %v12913_v24  ;;  %v12917_v24 = vld [vmem:[#allocation21_spill] sm:$0xff] }
  0x9b   : > { %8219 = vmatmul.mubr.msk.f32.gmra.mxu1 %vm546_vm2, %v9181_v37  ;;  %8271 = vmatprep.mubr.msk.f32.mxu0 %vm546_vm2, %v12914_v2  ;;  %v12918_v2 = vld [vmem:[#allocation23_spill] sm:$0xff] }
  0x9c   : > { %8221 = vmatprep.mubr.msk.f32.mxu1 %vm546_vm2, %v9216_v50 }
  0x9e   : > { %8272 = vmatmul.mubr.msk.f32.gmra.mxu0 %vm546_vm2, %v12915_v26  ;;  %v9863_v26 = vld [vmem:[%s9096_s24 + $0x180] sm:$0xff] }
  0x9f   : > { %8222 = vmatmul.mubr.msk.f32.gmra.mxu1 %vm546_vm2, %v9219_v51  ;;  %8274 = vmatprep.mubr.msk.f32.mxu0 %vm546_vm2, %v12916_v42  ;;  %v12919_v42 = vld [vmem:[#allocation26_spill] sm:$0xff] }
  0xa0   : > { %8224 = vmatprep.mubr.msk.f32.mxu1 %vm546_vm2, %v9251_v63 }
  0xa2   : > { %8275 = vmatmul.mubr.msk.f32.gmra.mxu0 %vm546_vm2, %v12917_v24  ;;  %v1809_v24 = vrot.slane %v9866_v38, 1 }
  0xa3   : > { %8225 = vmatmul.mubr.msk.f32.gmra.mxu1 %vm546_vm2, %v9254_v0  ;;  %8277 = vmatprep.mubr.msk.f32.mxu0 %vm546_vm2, %v12918_v2  ;;  %v1808_v2 = vrot.slane %v9863_v26, 1 }
  0xa4   : > { %8227 = vmatprep.mubr.msk.f32.mxu1 %vm546_vm2, %v9297_v34 }
  0xa6   : > { %8278 = vmatmul.mubr.msk.f32.gmra.mxu0 %vm546_vm2, %v12919_v42  ;;  %v9891_v42 = vsel %vm463_vm1, %v1808_v2, %v1809_v24 }
  0xa7   : > { %8228 = vmatmul.mubr.msk.f32.gmra.mxu1 %vm546_vm2, %v9300_v35  ;;  %8280 = vmatprep.mubr.msk.f32.mxu0 %vm546_vm2, %v9413_v47  ;;  %v1811_v47 = vrot.slane %v9879_v6, 1  ;;  %12920 = vst [vmem:[#allocation19_spill] sm:$0xff] %v9891_v42 }
  0xa8   : > { %8230 = vmatprep.mubr.msk.f32.mxu1 %vm546_vm2, %v9341_v7 }
  0xaa   : > { %8281 = vmatmul.mubr.msk.f32.gmra.mxu0 %vm546_vm2, %v9434_v1  ;;  %v9900_v1 = vsel %vm463_vm1, %v1809_v24, %v1811_v47  ;;  %v12935_v24 = vld [vmem:[#allocation43_spill] sm:$0xff] }
  0xab   : > { %8231 = vmatmul.mubr.msk.f32.gmra.mxu1 %vm546_vm2, %v12895_v57  ;;  %8283 = vmatprep.mubr.msk.f32.mxu0 %vm546_vm2, %v9442_v46  ;;  %12921 = vst [vmem:[#allocation24_spill] sm:$0xff] %v9900_v1 }
  0xac   : > { %8233 = vmatprep.mubr.msk.f32.mxu1 %vm546_vm2, %v9385_v54 }
  0xae   : > { %8284 = vmatmul.mubr.msk.f32.gmra.mxu0 %vm546_vm2, %v9457_v32 }
  0xaf   : > { %8234 = vmatmul.mubr.msk.f32.gmra.mxu1 %vm546_vm2, %v12896_v25  ;;  %8286 = vmatprep.mubr.msk.f32.mxu0 %vm546_vm2, %v9891_v42  ;;  %v10096_v42 = vld [vmem:[%s9096_s24 + $0x1a0] sm:$0xff] }
  0xb0   : > { %8236 = vmatprep.mubr.msk.f32.mxu1 %vm546_vm2, %v9863_v26 }
  0xb2   : > { %8287 = vmatmul.mubr.msk.f32.gmra.mxu0 %vm546_vm2, %v9900_v1 }
  0xb3   : > { %8237 = vmatmul.mubr.msk.f32.gmra.mxu1 %vm546_vm2, %v9866_v38  ;;  %8341 = vmatprep.mubr.msk.f32.mxu0 %vm546_vm2, %v9158_v29  ;;  %v12922_v29 = vld [vmem:[#allocation33_spill] sm:$0xff] }
  0xb4   : > { %8291 = vmatprep.mubr.msk.f32.mxu1 %vm546_vm2, %v9475_v55 }
  0xb6   : > { %8342 = vmatmul.mubr.msk.f32.vlgmr.msra.gmra.mxu0 %vm546_vm2, %v9161_v30  ;;  %v12923_v30 = vld [vmem:[#allocation34_spill] sm:$0xff] }
  0xb7   : > { %8292 = vmatmul.mubr.msk.f32.vlgmr.msra.gmra.mxu1 %vm546_vm2, %v9487_v3  ;;  %8440 = vmatpush3.msk.msra.mxu0 %vm611_vm0, %v9762_v28 }
  0xb8   : > { %8390 = vmatpush3.msk.msra.mxu1 %vm611_vm0, %v9753_v59  ;;  %8294 = vmatprep.mubr.msk.f32.mxu1 %vm546_vm2, %v9500_v4  ;;  %v2079_v59 = vrot.slane %v9863_v26, 2 }
  0xb9   : > { %8344 = vmatprep.mubr.msk.f32.mxu0 %vm546_vm2, %v9197_v44  ;;  %v12924_v44 = vld [vmem:[#allocation35_spill] sm:$0xff] }
  0xba   : > { %8345 = vmatmul.mubr.msk.f32.gmra.mxu0 %vm546_vm2, %v9213_v49  ;;  %v12925_v49 = vld [vmem:[#allocation36_spill] sm:$0xff] }
  0xbb   : > { %8295 = vmatmul.mubr.msk.f32.gmra.mxu1 %vm546_vm2, %v9517_v23  ;;  %8347 = vmatprep.mubr.msk.f32.mxu0 %vm546_vm2, %v9238_v58  ;;  %v12926_v58 = vld [vmem:[#allocation37_spill] sm:$0xff] }
  0xbc   : > { %8297 = vmatprep.mubr.msk.f32.mxu1 %vm546_vm2, %v9523_v10 }
  0xbe   : > { %8348 = vmatmul.mubr.msk.f32.gmra.mxu0 %vm546_vm2, %v9248_v62 }
  0xbf   : > { %8298 = vmatmul.mubr.msk.f32.gmra.mxu1 %vm546_vm2, %v9534_v56  ;;  %8350 = vmatprep.mubr.msk.f32.mxu0 %vm546_vm2, %v9289_v27  ;;  %v12930_v27 = vld [vmem:[#allocation40_spill] sm:$0xff] }
  0xc0   : > { %8300 = vmatprep.mubr.msk.f32.mxu1 %vm546_vm2, %v9540_v52 }
  0xc2   : > { %8351 = vmatmul.mubr.msk.f32.gmra.mxu0 %vm546_vm2, %v9292_v33 }
  0xc3   : > { %8301 = vmatmul.mubr.msk.f32.gmra.mxu1 %vm546_vm2, %v12922_v29  ;;  %8353 = vmatprep.mubr.msk.f32.mxu0 %vm546_vm2, %v9333_v12 }
  0xc4   : > { %8303 = vmatprep.mubr.msk.f32.mxu1 %vm546_vm2, %v9557_v13 }
  0xc6   : > { %8354 = vmatmul.mubr.msk.f32.gmra.mxu0 %vm546_vm2, %v9336_v17  ;;  %v12929_v17 = vld [vmem:[#allocation39_spill] sm:$0xff] }
  0xc7   : > { %8304 = vmatmul.mubr.msk.f32.gmra.mxu1 %vm546_vm2, %v12923_v30  ;;  %8356 = vmatprep.mubr.msk.f32.mxu0 %vm546_vm2, %v9377_v19  ;;  %v12932_v19 = vld [vmem:[#allocation41_spill] sm:$0xff] }
  0xc8   : > { %8306 = vmatprep.mubr.msk.f32.mxu1 %vm546_vm2, %v9574_v39 }
  0xca   : > { %8357 = vmatmul.mubr.msk.f32.gmra.mxu0 %vm546_vm2, %v9380_v48  ;;  %v12933_v48 = vld [vmem:[#allocation42_spill] sm:$0xff] }
  0xcb   : > { %8307 = vmatmul.mubr.msk.f32.gmra.mxu1 %vm546_vm2, %v12924_v44  ;;  %8359 = vmatprep.mubr.msk.f32.mxu0 %vm546_vm2, %v9105_v5 }
  0xcc   : > { %8309 = vmatprep.mubr.msk.f32.mxu1 %vm546_vm2, %v9591_v31 }
  0xce   : > { %8360 = vmatmul.mubr.msk.f32.gmra.mxu0 %vm546_vm2, %v9110_v8 }
  0xcf   : > { %8310 = vmatmul.mubr.msk.f32.gmra.mxu1 %vm546_vm2, %v12925_v49  ;;  %8362 = vmatprep.mubr.msk.f32.mxu0 %vm546_vm2, %v9132_v20  ;;  %v12927_v20 = vld [vmem:[#allocation38_spill] sm:$0xff] }
  0xd0   : > { %8312 = vmatprep.mubr.msk.f32.mxu1 %vm546_vm2, %v9608_v40 }
  0xd2   : > { %8363 = vmatmul.mubr.msk.f32.gmra.mxu0 %vm546_vm2, %v9135_v21 }
  0xd3   : > { %8313 = vmatmul.mubr.msk.f32.gmra.mxu1 %vm546_vm2, %v12926_v58  ;;  %8365 = vmatprep.mubr.msk.f32.mxu0 %vm546_vm2, %v9178_v36 }
  0xd4   : > { %8315 = vmatprep.mubr.msk.f32.mxu1 %vm546_vm2, %v9625_v22 }
  0xd6   : > { %v9980_v5 = vpop.f32.mrf.mxu0  ;;  %8366 = vmatmul.mubr.msk.f32.gmra.mxu0 %vm546_vm2, %v9181_v37 }
  0xd7   : > { %v9984_v8 = vpop.f32.mrf.mxu1  ;;  %8316 = vmatmul.mubr.msk.f32.gmra.mxu1 %vm546_vm2, %v12927_v20  ;;  %8368 = vmatprep.mubr.msk.f32.mxu0 %vm546_vm2, %v9216_v50 }
  0xd8   : > { %v9990_v21 = vpop.f32.mrf.mxu0  ;;  %8318 = vmatprep.mubr.msk.f32.mxu1 %vm546_vm2, %v9642_v45 }
  0xd9   : > { %v9994_v36 = vpop.f32.mrf.mxu1 }
  0xda   : > { %12928 = vst [vmem:[#allocation5_spill] sm:$0xff] %v9994_v36  ;;  %v9996_v62 = vpop.f32.mrf.mxu0  ;;  %8369 = vmatmul.mubr.msk.f32.gmra.mxu0 %vm546_vm2, %v9219_v51 }
  0xdb   : > { %v10000_v37 = vpop.f32.mrf.mxu1  ;;  %8319 = vmatmul.mubr.msk.f32.gmra.mxu1 %vm546_vm2, %v12929_v17  ;;  %8371 = vmatprep.mubr.msk.f32.mxu0 %vm546_vm2, %v9251_v63 }
  0xdc   : > { %v10006_v50 = vpop.f32.mrf.mxu0  ;;  %8321 = vmatprep.mubr.msk.f32.mxu1 %vm546_vm2, %v12930_v27 }
  0xdd   : > { %v10010_v33 = vpop.f32.mrf.mxu1 }
  0xde   : > { %12931 = vst [vmem:[#allocation7_spill] sm:$0xff] %v10010_v33  ;;  %v10012_v12 = vpop.f32.mrf.mxu0  ;;  %8372 = vmatmul.mubr.msk.f32.gmra.mxu0 %vm546_vm2, %v9254_v0  ;;  %v2082_v33 = vrot.slane %v9879_v6, 2 }
  0xdf   : > { %v10016_v51 = vpop.f32.mrf.mxu1  ;;  %8322 = vmatmul.mubr.msk.f32.gmra.mxu1 %vm546_vm2, %v12932_v19  ;;  %8374 = vmatprep.mubr.msk.f32.mxu0 %vm546_vm2, %v9297_v34 }
  0xe0   : > { %v10022_v63 = vpop.f32.mrf.mxu0  ;;  %8324 = vmatprep.mubr.msk.f32.mxu1 %vm546_vm2, %v12933_v48 }
  0xe1   : > { %v10026_v2 = vpop.f32.mrf.mxu1 }
  0xe2   : > { %12934 = vst [vmem:[#allocation9_spill] sm:$0xff] %v10026_v2  ;;  %v10028_v47 = vpop.f32.mrf.mxu0  ;;  %8375 = vmatmul.mubr.msk.f32.gmra.mxu0 %vm546_vm2, %v9300_v35 }
  0xe3   : > { %v10032_v0 = vpop.f32.mrf.mxu1  ;;  %8325 = vmatmul.mubr.msk.f32.gmra.mxu1 %vm546_vm2, %v12935_v24  ;;  %8377 = vmatprep.mubr.msk.f32.mxu0 %vm546_vm2, %v9341_v7 }
  0xe4   : > { %v10038_v34 = vpop.f32.mrf.mxu0  ;;  %8327 = vmatprep.mubr.msk.f32.mxu1 %vm546_vm2, %v9693_v41 }
  0xe5   : > { %v10042_v55 = vpop.f32.mrf.mxu1 }
  0xe6   : > { %12936 = vst [vmem:[#allocation11_spill] sm:$0xff] %v10042_v55  ;;  %v10044_v3 = vpop.f32.mrf.mxu0  ;;  %8378 = vmatmul.mubr.msk.f32.gmra.mxu0 %vm546_vm2, %v12895_v57  ;;  %v2080_v57 = vrot.slane %v9866_v38, 2 }
  0xe7   : > { %v10048_v35 = vpop.f32.mrf.mxu1  ;;  %8328 = vmatmul.mubr.msk.f32.gmra.mxu1 %vm546_vm2, %v9704_v60  ;;  %8380 = vmatprep.mubr.msk.f32.mxu0 %vm546_vm2, %v9385_v54 }
  0xe8   : > { %v10054_v7 = vpop.f32.mrf.mxu0  ;;  %8330 = vmatprep.mubr.msk.f32.mxu1 %vm546_vm2, %v9710_v53 }
  0xe9   : > { %v10059_v28 = vpop.f32.mrf.mxu1 }
  0xea   : > { %12937 = vst [vmem:[#allocation13_spill] sm:$0xff] %v10059_v28  ;;  %v10062_v55 = vpop.f32.mrf.mxu0  ;;  %8381 = vmatmul.mubr.msk.f32.gmra.mxu0 %vm546_vm2, %v12896_v25  ;;  %v10077_v28 = vld [vmem:[%s9096_s24 + $0x198] sm:$0xff]  ;;  %v10083_v25 = vsel %vm1132_vm3, %v2079_v59, %v2080_v57  ;;  %v10103_v59 = vsel %vm1132_vm3, %v2080_v57, %v2082_v33 }
  0xeb   : > { %v10066_v2 = vpop.f32.mrf.mxu1  ;;  %8331 = vmatmul.mubr.msk.f32.gmra.mxu1 %vm546_vm2, %v9721_v61  ;;  %8383 = vmatprep.mubr.msk.f32.mxu0 %vm546_vm2, %v9863_v26  ;;  %12940 = vst [vmem:[#allocation33_spill] sm:$0xff] %v10083_v25  ;;  %12942 = vst [vmem:[#allocation35_spill] sm:$0xff] %v10103_v59 }
  0xec   : > { %12938 = vst [vmem:[#allocation15_spill] sm:$0xff] %v10066_v2  ;;  %v10072_v54 = vpop.f32.mrf.mxu0  ;;  %8333 = vmatprep.mubr.msk.f32.mxu1 %vm546_vm2, %v9727_v11 }
  0xed   : > { %v10080_v36 = vpop.f32.mrf.mxu1 }
  0xee   : > { %12939 = vst [vmem:[#allocation20_spill] sm:$0xff] %v10080_v36  ;;  %v10085_v1 = vpop.f32.mrf.mxu0  ;;  %8384 = vmatmul.mubr.msk.f32.gmra.mxu0 %vm546_vm2, %v9866_v38 }
  0xef   : > { %v10089_v26 = vpop.f32.mrf.mxu1  ;;  %8334 = vmatmul.mubr.msk.f32.gmra.mxu1 %vm546_vm2, %v9736_v14  ;;  %8386 = vmatprep.mubr.msk.f32.mxu0 %vm546_vm2, %v10077_v28 }
  0xf0   : > { %12941 = vst [vmem:[#allocation34_spill] sm:$0xff] %v10089_v26  ;;  %v10098_v6 = vpop.f32.mrf.mxu0  ;;  %8336 = vmatprep.mubr.msk.f32.mxu1 %vm546_vm2, %v10083_v25 }
  0xf1   : > { %v10105_v36 = vpop.f32.mrf.mxu1 }
  0xf2   : > { %12943 = vst [vmem:[#allocation36_spill] sm:$0xff] %v10105_v36  ;;  %v10107_v38 = vpop.f32.mrf.mxu0  ;;  %8387 = vmatmul.mubr.msk.f32.gmra.mxu0 %vm546_vm2, %v10096_v42 }
  0xf3   : > { %v10111_v26 = vpop.f32.mrf.mxu1  ;;  %8337 = vmatmul.mubr.msk.f32.gmra.mxu1 %vm546_vm2, %v10103_v59  ;;  %8441 = vmatprep.mubr.msk.f32.mxu0 %vm546_vm2, %v9500_v4 }
  0xf4   : > { %12944 = vst [vmem:[#allocation37_spill] sm:$0xff] %v10111_v26  ;;  %v10117_v2 = vpop.f32.mrf.mxu0  ;;  %8391 = vmatprep.mubr.msk.f32.mxu1 %vm546_vm2, %v12899_v15 }
  0xf5   : > { %v10121_v33 = vpop.f32.mrf.mxu1 }
  0xf6   : > { %12945 = vst [vmem:[#allocation38_spill] sm:$0xff] %v10121_v33  ;;  %v8143_v57 = vpop.f32.mrf.mxu0  ;;  %8442 = vmatmul.mubr.msk.f32.vlgmr.msra.gmra.mxu0 %vm546_vm2, %v9517_v23 }
  0xf7   : > { %v8093_v36 = vpop.f32.mrf.mxu1  ;;  %8392 = vmatmul.mubr.msk.f32.vlgmr.msra.gmra.mxu1 %vm546_vm2, %v12900_v16  ;;  %8444 = vmatprep.mubr.msk.f32.mxu0 %vm546_vm2, %v9523_v10 }
  0xf8   : > { %v979_v4 = vadd.f32 %v8093_v36, %v9980_v5  ;;  %v1348_v26 = vpop.f32.mrf.mxu0  ;;  %8394 = vmatprep.mubr.msk.f32.mxu1 %vm546_vm2, %v12901_v18  ;;  %v12946_v5 = vld [vmem:[#allocation17_spill] sm:$0xff] }
  0xf9   : > { %v973_v15 = vpop.f32.mrf.mxu1 }
  0xfa   : > { %v10132_v59 = vadd.f32 %v8143_v57, %v979_v4  ;;  %v974_v33 = vadd.f32 %v973_v15, %v9990_v21  ;;  %v8146_v25 = vpop.f32.mrf.mxu0  ;;  %8445 = vmatmul.mubr.msk.f32.gmra.mxu0 %vm546_vm2, %v9534_v56  ;;  %v12948_v15 = vld [vmem:[#allocation25_spill] sm:$0xff] }
  0xfb   : > { %v8096_v23 = vpop.f32.mrf.mxu1  ;;  %8395 = vmatmul.mubr.msk.f32.gmra.mxu1 %vm546_vm2, %v12902_v9  ;;  %8447 = vmatprep.mubr.msk.f32.mxu0 %vm546_vm2, %v9540_v52 }
  0xfc   : > { %v10141_v10 = vadd.f32 %v1348_v26, %v974_v33  ;;  %v989_v16 = vadd.f32 %v8096_v23, %v9996_v62  ;;  %v1358_v18 = vpop.f32.mrf.mxu0  ;;  %8397 = vmatprep.mubr.msk.f32.mxu1 %vm546_vm2, %v12946_v5 }
  0xfd   : > { %v983_v21 = vpop.f32.mrf.mxu1 }
  0xfe   : > { %v10146_v36 = vadd.f32 %v8146_v25, %v989_v16  ;;  %v984_v56 = vadd.f32 %v983_v21, %v10006_v50  ;;  %v8149_v57 = vpop.f32.mrf.mxu0  ;;  %8448 = vmatmul.mubr.msk.f32.gmra.mxu0 %vm546_vm2, %v12922_v29  ;;  %v12947_v25 = vld [vmem:[#allocation22_spill] sm:$0xff]  ;;  %v12949_v16 = vld [vmem:[#allocation27_spill] sm:$0xff] }
  0xff   : > { %v8099_v9 = vpop.f32.mrf.mxu1  ;;  %8398 = vmatmul.mubr.msk.f32.gmra.mxu1 %vm546_vm2, %v12904_v43  ;;  %8450 = vmatprep.mubr.msk.f32.mxu0 %vm546_vm2, %v9557_v13 }
 0x100   : > { %v10155_v52 = vadd.f32 %v1358_v18, %v984_v56  ;;  %v999_v62 = vadd.f32 %v8099_v9, %v10012_v12  ;;  %v1368_v26 = vpop.f32.mrf.mxu0  ;;  %8400 = vmatprep.mubr.msk.f32.mxu1 %vm546_vm2, %v12947_v25  ;;  %v12950_v56 = vld [vmem:[#allocation29_spill] sm:$0xff]  ;;  %v12951_v9 = vld [vmem:[#allocation31_spill] sm:$0xff] }
 0x101   : > { %v993_v50 = vpop.f32.mrf.mxu1 }
 0x102   : > { %v10160_v33 = vadd.f32 %v8149_v57, %v999_v62  ;;  %v994_v29 = vadd.f32 %v993_v50, %v10022_v63  ;;  %v8152_v4 = vpop.f32.mrf.mxu0  ;;  %8451 = vmatmul.mubr.msk.f32.gmra.mxu0 %vm546_vm2, %v12923_v30  ;;  %v12952_v50 = vld [vmem:[#allocation32_spill] sm:$0xff] }
 0x103   : > { %v8102_v43 = vpop.f32.mrf.mxu1  ;;  %8401 = vmatmul.mubr.msk.f32.gmra.mxu1 %vm546_vm2, %v12948_v15  ;;  %8453 = vmatprep.mubr.msk.f32.mxu0 %vm546_vm2, %v9574_v39  ;;  %v3271_v39 = vld [vmem:[%s12691_s4] sm:$0xf] }
 0x104   : > { %v10169_v13 = vadd.f32 %v1368_v26, %v994_v29  ;;  %v1009_v12 = vadd.f32 %v8102_v43, %v10028_v47  ;;  %v1378_v23 = vpop.f32.mrf.mxu0  ;;  %8403 = vmatprep.mubr.msk.f32.mxu1 %vm546_vm2, %v12949_v16  ;;  %8489 = vmatprep.subr.msk.mxu1 %vm611_vm0, %v3271_v39  ;;  %v12953_v43 = vld [vmem:[#allocation3_spill] sm:$0xff]  ;;  %v12954_v16 = vld [vmem:[#allocation4_spill] sm:$0xff] }
 0x105   : > { %v1003_v63 = vpop.f32.mrf.mxu1  ;;  %8490 = vmatpush3.msk.msra.mxu1 %vm611_vm0, %v3271_v39 }
 0x106   : > { %v10174_v18 = vadd.f32 %v8152_v4, %v1009_v12  ;;  %v1004_v30 = vadd.f32 %v1003_v63, %v10038_v34  ;;  %v8155_v5 = vpop.f32.mrf.mxu0  ;;  %8454 = vmatmul.mubr.msk.f32.gmra.mxu0 %vm546_vm2, %v12924_v44 }
 0x107   : > { %v8105_v21 = vpop.f32.mrf.mxu1  ;;  %8404 = vmatmul.mubr.msk.f32.gmra.mxu1 %vm546_vm2, %v12950_v56  ;;  %8456 = vmatprep.mubr.msk.f32.mxu0 %vm546_vm2, %v9591_v31  ;;  %v12956_v56 = vld [vmem:[#allocation8_spill] sm:$0xff] }
 0x108   : > { %v10186_v47 = vadd.f32 %v1378_v23, %v1004_v30  ;;  %v1019_v57 = vadd.f32 %v8105_v21, %v10044_v3  ;;  %v1388_v34 = vpop.f32.mrf.mxu0  ;;  %8406 = vmatprep.mubr.msk.f32.mxu1 %vm546_vm2, %v12951_v9  ;;  %v12955_v30 = vld [vmem:[#allocation6_spill] sm:$0xff] }
 0x109   : > { %v1013_v44 = vpop.f32.mrf.mxu1 }
 0x10a   : > { %v10193_v62 = vadd.f32 %v8155_v5, %v1019_v57  ;;  %v1014_v26 = vadd.f32 %v1013_v44, %v10054_v7  ;;  %v8158_v25 = vpop.f32.mrf.mxu0  ;;  %8457 = vmatmul.mubr.msk.f32.gmra.mxu0 %vm546_vm2, %v12925_v49 }
 0x10b   : > { %v8108_v31 = vpop.f32.mrf.mxu1  ;;  %8407 = vmatmul.mubr.msk.f32.gmra.mxu1 %vm546_vm2, %v12952_v50  ;;  %8459 = vmatprep.mubr.msk.f32.mxu0 %vm546_vm2, %v9608_v40  ;;  %v12962_v50 = vld [vmem:[#allocation14_spill] sm:$0xff] }
 0x10c   : > { %v10202_v3 = vadd.f32 %v1388_v34, %v1014_v26  ;;  %v1029_v29 = vadd.f32 %v8108_v31, %v10062_v55  ;;  %v1398_v4 = vpop.f32.mrf.mxu0  ;;  %8409 = vmatprep.mubr.msk.f32.mxu1 %vm546_vm2, %v12953_v43  ;;  %v12958_v34 = vld [vmem:[#allocation10_spill] sm:$0xff]  ;;  %v12963_v43 = vld [vmem:[#allocation16_spill] sm:$0xff] }
 0x10d   : > { %v1023_v7 = vpop.f32.mrf.mxu1 }
 0x10e   : > { %v10207_v15 = vadd.f32 %v8158_v25, %v1029_v29  ;;  %v1024_v49 = vadd.f32 %v1023_v7, %v10072_v54  ;;  %v8161_v12 = vpop.f32.mrf.mxu0  ;;  %8460 = vmatmul.mubr.msk.f32.gmra.mxu0 %vm546_vm2, %v12926_v58  ;;  %v12959_v25 = vld [vmem:[#allocation12_spill] sm:$0xff]  ;;  %v12965_v7 = vld [vmem:[#allocation18_spill] sm:$0xff] }
 0x10f   : > { %v8111_v23 = vpop.f32.mrf.mxu1  ;;  %8410 = vmatmul.mubr.msk.f32.gmra.mxu1 %vm546_vm2, %v12954_v16  ;;  %8462 = vmatprep.mubr.msk.f32.mxu0 %vm546_vm2, %v9625_v22  ;;  %v12967_v16 = vld [vmem:[#allocation21_spill] sm:$0xff] }
 0x110   : > { %v10216_v40 = vadd.f32 %v1398_v4, %v1024_v49  ;;  %v1039_v55 = vadd.f32 %v8111_v23, %v10085_v1  ;;  %v1408_v63 = vpop.f32.mrf.mxu0  ;;  %8412 = vmatprep.mubr.msk.f32.mxu1 %vm546_vm2, %v12955_v30 }
 0x111   : > { %v1033_v54 = vpop.f32.mrf.mxu1 }
 0x112   : > { %v10221_v5 = vadd.f32 %v8161_v12, %v1039_v55  ;;  %v1034_v58 = vadd.f32 %v1033_v54, %v10098_v6  ;;  %v8164_v39 = vpop.f32.mrf.mxu0  ;;  %8463 = vmatmul.mubr.msk.f32.gmra.mxu0 %vm546_vm2, %v12927_v20  ;;  %v12969_v55 = vld [vmem:[#allocation23_spill] sm:$0xff] }
 0x113   : > { %v8114_v21 = vpop.f32.mrf.mxu1  ;;  %8413 = vmatmul.mubr.msk.f32.gmra.mxu1 %vm546_vm2, %v12956_v56  ;;  %8465 = vmatprep.mubr.msk.f32.mxu0 %vm546_vm2, %v9642_v45 }
 0x114   : > { %v10230_v1 = vadd.f32 %v1408_v63, %v1034_v58  ;;  %v1049_v22 = vadd.f32 %v8114_v21, %v10107_v38  ;;  %v1418_v57 = vpop.f32.mrf.mxu0  ;;  %8415 = vmatprep.mubr.msk.f32.mxu1 %vm546_vm2, %v12958_v34  ;;  %v12971_v58 = vld [vmem:[#allocation26_spill] sm:$0xff] }
 0x115   : > { %v1043_v6 = vpop.f32.mrf.mxu1 }
 0x116   : > { %12957 = vst [vmem:[#allocation39_spill] sm:$0xff] %v10230_v1  ;;  %v10235_v9 = vadd.f32 %v8164_v39, %v1049_v22  ;;  %v1044_v20 = vadd.f32 %v1043_v6, %v10117_v2  ;;  %v8167_v44 = vpop.f32.mrf.mxu0  ;;  %8466 = vmatmul.mubr.msk.f32.gmra.mxu0 %vm546_vm2, %v12929_v17  ;;  %v12973_v39 = vld [vmem:[#allocation28_spill] sm:$0xff] }
 0x117   : > { %v8117_v26 = vpop.f32.mrf.mxu1  ;;  %8416 = vmatmul.mubr.msk.f32.gmra.mxu1 %vm546_vm2, %v12959_v25  ;;  %8468 = vmatprep.mubr.msk.f32.mxu0 %vm546_vm2, %v12930_v27 }
 0x118   : > { %v10244_v45 = vadd.f32 %v1418_v57, %v1044_v20  ;;  %v1059_v38 = vadd.f32 %v8117_v26, %v9984_v8  ;;  %v10247_v31 = vpop.f32.mrf.mxu0  ;;  %8418 = vmatprep.mubr.msk.f32.mxu1 %vm546_vm2, %v12962_v50  ;;  %v12975_v57 = vld [vmem:[#allocation30_spill] sm:$0xff]  ;;  %v2620_v20 = vrot.slane %v10096_v42, 1 }
 0x119   : > { %12961 = vst [vmem:[#allocation41_spill] sm:$0xff] %v10247_v31  ;;  %v10251_v2 = vpop.f32.mrf.mxu1  ;;  %v413_v26 = vld [vmem:[%s9096_s24 + $0x1a8] sm:$0xff] }
 0x11a   : > { %12960 = vst [vmem:[#allocation40_spill] sm:$0xff] %v10244_v45  ;;  %v10253_v29 = vadd.f32 %v8167_v44, %v1059_v38  ;;  %v8170_v17 = vpop.f32.mrf.mxu0  ;;  %8469 = vmatmul.mubr.msk.f32.gmra.mxu0 %vm546_vm2, %v12932_v19 }
 0x11b   : > { %v8120_v4 = vpop.f32.mrf.mxu1  ;;  %8419 = vmatmul.mubr.msk.f32.gmra.mxu1 %vm546_vm2, %v12963_v43  ;;  %8471 = vmatprep.mubr.msk.f32.mxu0 %vm546_vm2, %v12933_v48 }
 0x11c   : > { %v1069_v8 = vadd.f32 %v8120_v4, %v10000_v37  ;;  %v10262_v27 = vpop.f32.mrf.mxu0  ;;  %8421 = vmatprep.mubr.msk.f32.mxu1 %vm546_vm2, %v12965_v7  ;;  %v2622_v4 = vrot.slane %v413_v26, 1 }
 0x11d   : > { %12964 = vst [vmem:[#allocation42_spill] sm:$0xff] %v10262_v27  ;;  %v10266_v49 = vpop.f32.mrf.mxu1 }
 0x11e   : > { %12966 = vst [vmem:[#allocation43_spill] sm:$0xff] %v10266_v49  ;;  %v10268_v12 = vadd.f32 %v8170_v17, %v1069_v8  ;;  %v8173_v23 = vpop.f32.mrf.mxu0  ;;  %8472 = vmatmul.mubr.msk.f32.gmra.mxu0 %vm546_vm2, %v12935_v24  ;;  %v12981_v17 = vld [vmem:[#allocation19_spill] sm:$0xff] }
 0x11f   : > { %v8123_v19 = vpop.f32.mrf.mxu1  ;;  %8422 = vmatmul.mubr.msk.f32.gmra.mxu1 %vm546_vm2, %v12967_v16  ;;  %8474 = vmatprep.mubr.msk.f32.mxu0 %vm546_vm2, %v9693_v41  ;;  %v12984_v16 = vld [vmem:[#allocation24_spill] sm:$0xff] }
 0x120   : > { %v1079_v37 = vadd.f32 %v8123_v19, %v10016_v51  ;;  %v10277_v48 = vpop.f32.mrf.mxu0  ;;  %8424 = vmatprep.mubr.msk.f32.mxu1 %vm546_vm2, %v12969_v55  ;;  %v12985_v55 = vld [vmem:[#allocation34_spill] sm:$0xff] }
 0x121   : > { %12968 = vst [vmem:[#allocation17_spill] sm:$0xff] %v10277_v48  ;;  %v10281_v63 = vpop.f32.mrf.mxu1 }
 0x122   : > { %12970 = vst [vmem:[#allocation22_spill] sm:$0xff] %v10281_v63  ;;  %v10283_v30 = vadd.f32 %v8173_v23, %v1079_v37  ;;  %v8176_v54 = vpop.f32.mrf.mxu0  ;;  %8475 = vmatmul.mubr.msk.f32.gmra.mxu0 %vm546_vm2, %v9704_v60  ;;  %v12983_v23 = vld [vmem:[#allocation35_spill] sm:$0xff] }
 0x123   : > { %v8126_v24 = vpop.f32.mrf.mxu1  ;;  %8425 = vmatmul.mubr.msk.f32.gmra.mxu1 %vm546_vm2, %v12971_v58  ;;  %8477 = vmatprep.mubr.msk.f32.mxu0 %vm546_vm2, %v9710_v53  ;;  %v2890_v53 = vrot.slane %v10077_v28, 2  ;;  %v2623_v58 = vsel %vm463_vm1, %v2620_v20, %v2622_v4 }
 0x124   : > { %v1089_v41 = vadd.f32 %v8126_v24, %v10032_v0  ;;  %v10292_v51 = vpop.f32.mrf.mxu0  ;;  %8427 = vmatprep.mubr.msk.f32.mxu1 %vm546_vm2, %v12973_v39  ;;  %v2891_v0 = vrot.slane %v10096_v42, 2 }
 0x125   : > { %12972 = vst [vmem:[#allocation25_spill] sm:$0xff] %v10292_v51  ;;  %v10296_v21 = vpop.f32.mrf.mxu1 }
 0x126   : > { %12974 = vst [vmem:[#allocation27_spill] sm:$0xff] %v10296_v21  ;;  %v10298_v56 = vadd.f32 %v8176_v54, %v1089_v41  ;;  %v8179_v60 = vpop.f32.mrf.mxu0  ;;  %8478 = vmatmul.mubr.msk.f32.gmra.mxu0 %vm546_vm2, %v9721_v61  ;;  %v2619_v61 = vrot.slane %v10077_v28, 1  ;;  %v12979_v28 = vld [vmem:[#allocation15_spill] sm:$0xff]  ;;  %v2892_v43 = vsel %vm1132_vm3, %v2890_v53, %v2891_v0 }
 0x127   : > { %v8129_v22 = vpop.f32.mrf.mxu1  ;;  %8428 = vmatmul.mubr.msk.f32.gmra.mxu1 %vm546_vm2, %v12975_v57  ;;  %8480 = vmatprep.mubr.msk.f32.mxu0 %vm546_vm2, %v9727_v11  ;;  %v12988_v57 = vld [vmem:[#allocation37_spill] sm:$0xff] }
 0x128   : > { %v1099_v34 = vadd.f32 %v8129_v22, %v10048_v35  ;;  %v10309_v6 = vpop.f32.mrf.mxu0  ;;  %8430 = vmatprep.mubr.msk.f32.mxu1 %vm546_vm2, %v9442_v46  ;;  %v12978_v35 = vld [vmem:[#allocation33_spill] sm:$0xff]  ;;  %v2893_v46 = vrot.slane %v413_v26, 2 }
 0x129   : > { %12976 = vst [vmem:[#allocation29_spill] sm:$0xff] %v10309_v6  ;;  %v10315_v44 = vpop.f32.mrf.mxu1 }
 0x12a   : > { %12977 = vst [vmem:[#allocation31_spill] sm:$0xff] %v10315_v44  ;;  %v10318_v25 = vadd.f32 %v8179_v60, %v1099_v34  ;;  %v8182_v11 = vpop.f32.mrf.mxu0  ;;  %8481 = vmatmul.mubr.msk.f32.gmra.mxu0 %vm546_vm2, %v9736_v14  ;;  %v2621_v14 = vsel %vm463_vm1, %v2619_v61, %v2620_v20  ;;  %v2894_v37 = vsel %vm1132_vm3, %v2891_v0, %v2893_v46 }
 0x12b   : > { %v8132_v38 = vpop.f32.mrf.mxu1  ;;  %8431 = vmatmul.mubr.msk.f32.gmra.mxu1 %vm546_vm2, %v9457_v32  ;;  %8483 = vmatprep.mubr.msk.f32.mxu0 %vm546_vm2, %v12978_v35 }
 0x12c   : > { %v1109_v50 = vadd.f32 %v8132_v38, %v12979_v28  ;;  %v10327_v42 = vpop.f32.mrf.mxu0  ;;  %8433 = vmatprep.mubr.msk.f32.mxu1 %vm546_vm2, %v12981_v17 }
 0x12d   : > { %12980 = vst [vmem:[#allocation32_spill] sm:$0xff] %v10327_v42  ;;  %v10332_v8 = vpop.f32.mrf.mxu1 }
 0x12e   : > { %12982 = vst [vmem:[#allocation3_spill] sm:$0xff] %v10332_v8  ;;  %v10335_v7 = vadd.f32 %v8182_v11, %v1109_v50  ;;  %v8185_v32 = vpop.f32.mrf.mxu0  ;;  %8484 = vmatmul.mubr.msk.f32.gmra.mxu0 %vm546_vm2, %v12983_v23 }
 0x12f   : > { %v8135_v19 = vpop.f32.mrf.mxu1  ;;  %8434 = vmatmul.mubr.msk.f32.gmra.mxu1 %vm546_vm2, %v12984_v16  ;;  %8486 = vmatprep.mubr.msk.f32.mxu0 %vm546_vm2, %v2892_v43 }
 0x130   : > { %v1119_v54 = vadd.f32 %v8135_v19, %v12985_v55  ;;  %v10344_v24 = vpop.f32.mrf.mxu0  ;;  %8436 = vmatprep.mubr.msk.f32.mxu1 %vm546_vm2, %v2621_v14 }
 0x131   : > { %12986 = vst [vmem:[#allocation4_spill] sm:$0xff] %v10344_v24  ;;  %v10348_v41 = vpop.f32.mrf.mxu1 }
 0x132   : > { %12987 = vst [vmem:[#allocation6_spill] sm:$0xff] %v10348_v41  ;;  %v10350_v39 = vadd.f32 %v8185_v32, %v1119_v54  ;;  %v8188_v60 = vpop.f32.mrf.mxu0  ;;  %8487 = vmatmul.mubr.msk.f32.gmra.mxu0 %vm546_vm2, %v2894_v37 }
 0x133   : > { %v8138_v22 = vpop.f32.mrf.mxu1  ;;  %8437 = vmatmul.mubr.msk.f32.gmra.mxu1 %vm546_vm2, %v2623_v58 }
 0x134   : > { %v1129_v53 = vadd.f32 %v8138_v22, %v12988_v57  ;;  %v10355_v0 = vpop.f32.mrf.mxu0 }
 0x135   : > { %12989 = vst [vmem:[#allocation8_spill] sm:$0xff] %v10355_v0  ;;  %v10357_v34 = vpop.f32.mrf.mxu1 }
 0x136   : > { %12990 = vst [vmem:[#allocation10_spill] sm:$0xff] %v10357_v34  ;;  %v10359_v61 = vadd.f32 %v8188_v60, %v1129_v53  ;;  %v8243_v26 = vpop.f32.mrf.mxu0 }
 0x137   : > { %v8193_v20 = vpop.f32.mrf.mxu1 }
 0x138   : > { %v1776_v11 = vadd.f32 %v8193_v20, %v10132_v59  ;;  %v10362_v38 = vpop.f32.mrf.mxu0 }
 0x139   : > { %v10364_v35 = vpop.f32.mrf.mxu1 }
 0x13a   : > { %v10366_v46 = vadd.f32 %v8243_v26, %v1776_v11  ;;  %v8246_v28 = vpop.f32.mrf.mxu0 }
 0x13b   : > { %v8196_v50 = vpop.f32.mrf.mxu1 }
 0x13c   : > { %v1778_v17 = vadd.f32 %v8196_v50, %v10146_v36  ;;  %v10369_v4 = vpop.f32.mrf.mxu0 }
 0x13d   : > { %v10371_v43 = vpop.f32.mrf.mxu1 }
 0x13e   : > { %v10373_v14 = vadd.f32 %v8246_v28, %v1778_v17  ;;  %v8249_v32 = vpop.f32.mrf.mxu0 }
 0x13f   : > { %v8199_v23 = vpop.f32.mrf.mxu1 }
 0x140   : > { %v1780_v59 = vadd.f32 %v8199_v23, %v10160_v33  ;;  %v10376_v19 = vpop.f32.mrf.mxu0 }
 0x141   : > { %v10378_v16 = vpop.f32.mrf.mxu1 }
 0x142   : > { %v10380_v37 = vadd.f32 %v8249_v32, %v1780_v59  ;;  %v8252_v55 = vpop.f32.mrf.mxu0 }
 0x143   : > { %v8202_v54 = vpop.f32.mrf.mxu1 }
 0x144   : > { %v1782_v36 = vadd.f32 %v8202_v54, %v10174_v18  ;;  %v10383_v58 = vpop.f32.mrf.mxu0 }
 0x145   : > { %v10385_v60 = vpop.f32.mrf.mxu1 }
 0x146   : > { %v10387_v22 = vadd.f32 %v8252_v55, %v1782_v36  ;;  %v8255_v57 = vpop.f32.mrf.mxu0 }
 0x147   : > { %v8205_v53 = vpop.f32.mrf.mxu1 }
 0x148   : > { %v1784_v33 = vadd.f32 %v8205_v53, %v10193_v62  ;;  %v10390_v26 = vpop.f32.mrf.mxu0 }
 0x149   : > { %v10392_v20 = vpop.f32.mrf.mxu1 }
 0x14a   : > { %v10394_v11 = vadd.f32 %v8255_v57, %v1784_v33  ;;  %v8258_v28 = vpop.f32.mrf.mxu0 }
 0x14b   : > { %v8208_v50 = vpop.f32.mrf.mxu1 }
 0x14c   : > { %v1786_v18 = vadd.f32 %v8208_v50, %v10207_v15  ;;  %v10397_v17 = vpop.f32.mrf.mxu0 }
 0x14d   : > { %12991 = vst [vmem:[#allocation12_spill] sm:$0xff] %v10397_v17  ;;  %v10399_v32 = vpop.f32.mrf.mxu1 }
 0x14e   : > { %v10401_v23 = vadd.f32 %v8258_v28, %v1786_v18  ;;  %v8261_v59 = vpop.f32.mrf.mxu0 }
 0x14f   : > { %v8211_v55 = vpop.f32.mrf.mxu1 }
 0x150   : > { %v1788_v62 = vadd.f32 %v8211_v55, %v10221_v5  ;;  %v10404_v54 = vpop.f32.mrf.mxu0 }
 0x151   : > { %12992 = vst [vmem:[#allocation14_spill] sm:$0xff] %v10404_v54  ;;  %v10406_v36 = vpop.f32.mrf.mxu1 }
 0x152   : > { %12993 = vst [vmem:[#allocation16_spill] sm:$0xff] %v10406_v36  ;;  %v10408_v57 = vadd.f32 %v8261_v59, %v1788_v62  ;;  %v8264_v53 = vpop.f32.mrf.mxu0 }
 0x153   : > { %v8214_v33 = vpop.f32.mrf.mxu1 }
 0x154   : > { %v1790_v15 = vadd.f32 %v8214_v33, %v10235_v9  ;;  %v10411_v50 = vpop.f32.mrf.mxu0 }
 0x155   : > { %12994 = vst [vmem:[#allocation18_spill] sm:$0xff] %v10411_v50  ;;  %v10413_v0 = vpop.f32.mrf.mxu1 }
 0x156   : > { %12995 = vst [vmem:[#allocation21_spill] sm:$0xff] %v10413_v0  ;;  %v10415_v28 = vadd.f32 %v8264_v53, %v1790_v15  ;;  %v8267_v18 = vpop.f32.mrf.mxu0 }
 0x157   : > { %v8217_v24 = vpop.f32.mrf.mxu1 }
 0x158   : > { %v1792_v5 = vadd.f32 %v8217_v24, %v10253_v29  ;;  %v10418_v55 = vpop.f32.mrf.mxu0 }
 0x159   : > { %12996 = vst [vmem:[#allocation23_spill] sm:$0xff] %v10418_v55  ;;  %v10420_v34 = vpop.f32.mrf.mxu1 }
 0x15a   : > { %12997 = vst [vmem:[#allocation26_spill] sm:$0xff] %v10420_v34  ;;  %v10422_v59 = vadd.f32 %v8267_v18, %v1792_v5  ;;  %v8270_v62 = vpop.f32.mrf.mxu0 }
 0x15b   : > { %v8220_v41 = vpop.f32.mrf.mxu1 }
 0x15c   : > { %v1794_v9 = vadd.f32 %v8220_v41, %v10268_v12  ;;  %v10425_v33 = vpop.f32.mrf.mxu0 }
 0x15d   : > { %12998 = vst [vmem:[#allocation28_spill] sm:$0xff] %v10425_v33  ;;  %v10427_v42 = vpop.f32.mrf.mxu1 }
 0x15e   : > { %12999 = vst [vmem:[#allocation30_spill] sm:$0xff] %v10427_v42  ;;  %v10429_v53 = vadd.f32 %v8270_v62, %v1794_v9  ;;  %v8273_v15 = vpop.f32.mrf.mxu0 }
 0x15f   : > { %v8223_v6 = vpop.f32.mrf.mxu1 }
 0x160   : > { %v1796_v29 = vadd.f32 %v8223_v6, %v10283_v30  ;;  %v10432_v24 = vpop.f32.mrf.mxu0 }
 0x161   : > { %13000 = vst [vmem:[#allocation33_spill] sm:$0xff] %v10432_v24  ;;  %v10434_v8 = vpop.f32.mrf.mxu1 }
 0x162   : > { %13001 = vst [vmem:[#allocation15_spill] sm:$0xff] %v10434_v8  ;;  %v10436_v18 = vadd.f32 %v8273_v15, %v1796_v29  ;;  %v8276_v5 = vpop.f32.mrf.mxu0 }
 0x163   : > { %v8226_v44 = vpop.f32.mrf.mxu1 }
 0x164   : > { %v1798_v12 = vadd.f32 %v8226_v44, %v10298_v56  ;;  %v10439_v41 = vpop.f32.mrf.mxu0 }
 0x165   : > { %13002 = vst [vmem:[#allocation19_spill] sm:$0xff] %v10439_v41  ;;  %v10441_v33 = vpop.f32.mrf.mxu1 }
 0x166   : > { %13003 = vst [vmem:[#allocation35_spill] sm:$0xff] %v10441_v33  ;;  %v10443_v62 = vadd.f32 %v8276_v5, %v1798_v12  ;;  %v8279_v9 = vpop.f32.mrf.mxu0 }
 0x167   : > { %v8229_v51 = vpop.f32.mrf.mxu1 }
 0x168   : > { %v1800_v30 = vadd.f32 %v8229_v51, %v10318_v25  ;;  %v10446_v6 = vpop.f32.mrf.mxu0 }
 0x169   : > { %13004 = vst [vmem:[#allocation24_spill] sm:$0xff] %v10446_v6  ;;  %v10448_v24 = vpop.f32.mrf.mxu1 }
 0x16a   : > { %13005 = vst [vmem:[#allocation34_spill] sm:$0xff] %v10448_v24  ;;  %v10450_v15 = vadd.f32 %v8279_v9, %v1800_v30  ;;  %v8282_v29 = vpop.f32.mrf.mxu0 }
 0x16b   : > { %v8232_v8 = vpop.f32.mrf.mxu1 }
 0x16c   : > { %v1802_v56 = vadd.f32 %v8232_v8, %v10335_v7  ;;  %v10453_v44 = vpop.f32.mrf.mxu0 }
 0x16d   : > { %13006 = vst [vmem:[#allocation37_spill] sm:$0xff] %v10453_v44  ;;  %v10455_v41 = vpop.f32.mrf.mxu1 }
 0x16e   : > { %13007 = vst [vmem:[#allocation44_spill] sm:$0xff] %v10455_v41  ;;  %v10457_v5 = vadd.f32 %v8282_v29, %v1802_v56  ;;  %v8285_v12 = vpop.f32.mrf.mxu0 }
 0x16f   : > { %v8235_v33 = vpop.f32.mrf.mxu1 }
 0x170   : > { %v1804_v51 = vadd.f32 %v8235_v33, %v10350_v39  ;;  %v10460_v25 = vpop.f32.mrf.mxu0 }
 0x171   : > { %13008 = vst [vmem:[#allocation45_spill] sm:$0xff] %v10460_v25  ;;  %v10462_v6 = vpop.f32.mrf.mxu1 }
 0x172   : > { %13009 = vst [vmem:[#allocation46_spill] sm:$0xff] %v10462_v6  ;;  %v10464_v9 = vadd.f32 %v8285_v12, %v1804_v51  ;;  %v8288_v30 = vpop.f32.mrf.mxu0  ;;  %v7111_v6 = vld [vmem:[%s12694_s7 + $0x8] sm:$0xff] }
 0x173   : > { %v8238_v24 = vpop.f32.mrf.mxu1  ;;  %8539 = vmatprep.subr.mxu0 %v7111_v6 }
 0x174   : > { %v1806_v8 = vadd.f32 %v8238_v24, %v10359_v61  ;;  %v10467_v7 = vpop.f32.mrf.mxu0  ;;  %8540 = vmatpush3.msra.mxu0 %v7111_v6 }
 0x175   : > { %13010 = vst [vmem:[#allocation47_spill] sm:$0xff] %v10467_v7  ;;  %v10469_v44 = vpop.f32.mrf.mxu1 }
 0x176   : > { %13011 = vst [vmem:[#allocation48_spill] sm:$0xff] %v10469_v44  ;;  %v10471_v29 = vadd.f32 %v8288_v30, %v1806_v8  ;;  %v10473_v56 = vpop.f32.mrf.mxu0 }
 0x177   : > { %v10475_v41 = vpop.f32.mrf.mxu1 }
 0x178   : > { %v10477_v39 = vpop.f32.mrf.mxu0 }
 0x179   : > { %v10479_v33 = vpop.f32.mrf.mxu1 }
 0x17a   : > { %v10481_v12 = vpop.f32.mrf.mxu0 }
 0x17b   : > { %v10483_v51 = vpop.f32.mrf.mxu1 }
 0x17c   : > { %v10485_v25 = vpop.f32.mrf.mxu0 }
 0x17d   : > { %v10487_v61 = vpop.f32.mrf.mxu1 }
 0x17e   : > { %v10489_v24 = vpop.f32.mrf.mxu0 }
 0x17f   : > { %v10491_v30 = vpop.f32.mrf.mxu1 }
 0x180   : > { %v10493_v8 = vpop.f32.mrf.mxu0 }
 0x181   : > { %v10495_v7 = vpop.f32.mrf.mxu1 }
 0x182   : > { %v10497_v44 = vpop.f32.mrf.mxu0 }
 0x183   : > { %v10502_v42 = vpop.f32.mrf.mxu1 }
 0x184   : > { %v10504_v55 = vpop.f32.mrf.mxu0 }
 0x185   : > { %v10506_v21 = vpop.f32.mrf.mxu1 }
 0x186   : > { %v8355_v48 = vpop.f32.mrf.mxu0 }
 0x187   : > { %v8305_v27 = vpop.f32.mrf.mxu1 }
 0x188   : > { %v2327_v34 = vadd.f32 %v8305_v27, %v10394_v11  ;;  %v10509_v50 = vpop.f32.mrf.mxu0 }
 0x189   : > { %13012 = vst [vmem:[#allocation49_spill] sm:$0xff] %v10509_v50  ;;  %v10511_v63 = vpop.f32.mrf.mxu1 }
 0x18a   : > { %v10513_v54 = vadd.f32 %v8355_v48, %v2327_v34  ;;  %v8358_v0 = vpop.f32.mrf.mxu0 }
 0x18b   : > { %v8308_v45 = vpop.f32.mrf.mxu1 }
 0x18c   : > { %13013 = vst [vmem:[#allocation50_spill] sm:$0xff] %v10513_v54  ;;  %v2329_v49 = vadd.f32 %v8308_v45, %v10401_v23  ;;  %v10516_v31 = vpop.f32.mrf.mxu0 }
 0x18d   : > { %13014 = vst [vmem:[#allocation51_spill] sm:$0xff] %v10516_v31  ;;  %v10518_v36 = vpop.f32.mrf.mxu1 }
 0x18e   : > { %v10520_v6 = vadd.f32 %v8358_v0, %v2329_v49  ;;  %v8361_v1 = vpop.f32.mrf.mxu0 }
 0x18f   : > { %v8311_v17 = vpop.f32.mrf.mxu1 }
 0x190   : > { %13015 = vst [vmem:[#allocation52_spill] sm:$0xff] %v10520_v6  ;;  %v2331_v27 = vadd.f32 %v8311_v17, %v10408_v57  ;;  %v10523_v11 = vpop.f32.mrf.mxu0 }
 0x191   : > { %13016 = vst [vmem:[#allocation53_spill] sm:$0xff] %v10523_v11  ;;  %v10525_v50 = vpop.f32.mrf.mxu1 }
 0x192   : > { %v10527_v48 = vadd.f32 %v8361_v1, %v2331_v27  ;;  %v8364_v34 = vpop.f32.mrf.mxu0 }
 0x193   : > { %v8314_v54 = vpop.f32.mrf.mxu1 }
 0x194   : > { %13017 = vst [vmem:[#allocation54_spill] sm:$0xff] %v10527_v48  ;;  %v2333_v45 = vadd.f32 %v8314_v54, %v10415_v28  ;;  %v10530_v23 = vpop.f32.mrf.mxu0 }
 0x195   : > { %13018 = vst [vmem:[#allocation55_spill] sm:$0xff] %v10530_v23  ;;  %v10532_v31 = vpop.f32.mrf.mxu1 }
 0x196   : > { %v10534_v49 = vadd.f32 %v8364_v34, %v2333_v45  ;;  %v8367_v0 = vpop.f32.mrf.mxu0 }
 0x197   : > { %v8317_v6 = vpop.f32.mrf.mxu1 }
 0x198   : > { %13019 = vst [vmem:[#allocation56_spill] sm:$0xff] %v10534_v49  ;;  %v2335_v17 = vadd.f32 %v8317_v6, %v10422_v59  ;;  %v10537_v57 = vpop.f32.mrf.mxu0 }
 0x199   : > { %13020 = vst [vmem:[#allocation57_spill] sm:$0xff] %v10537_v57  ;;  %v10539_v11 = vpop.f32.mrf.mxu1 }
 0x19a   : > { %v10541_v1 = vadd.f32 %v8367_v0, %v2335_v17  ;;  %v8370_v27 = vpop.f32.mrf.mxu0 }
 0x19b   : > { %v8320_v48 = vpop.f32.mrf.mxu1 }
 0x19c   : > { %13021 = vst [vmem:[#allocation58_spill] sm:$0xff] %v10541_v1  ;;  %v2337_v54 = vadd.f32 %v8320_v48, %v10429_v53  ;;  %v10544_v28 = vpop.f32.mrf.mxu0 }
 0x19d   : > { %13022 = vst [vmem:[#allocation59_spill] sm:$0xff] %v10544_v28  ;;  %v10546_v23 = vpop.f32.mrf.mxu1 }
 0x19e   : > { %v10548_v34 = vadd.f32 %v8370_v27, %v2337_v54  ;;  %v8373_v45 = vpop.f32.mrf.mxu0 }
 0x19f   : > { %v8323_v49 = vpop.f32.mrf.mxu1 }
 0x1a0   : > { %13023 = vst [vmem:[#allocation60_spill] sm:$0xff] %v10548_v34  ;;  %v2339_v59 = vadd.f32 %v8323_v49, %v10436_v18  ;;  %v10551_v6 = vpop.f32.mrf.mxu0 }
 0x1a1   : > { %13024 = vst [vmem:[#allocation61_spill] sm:$0xff] %v10551_v6  ;;  %v10553_v57 = vpop.f32.mrf.mxu1 }
 0x1a2   : > { %v10555_v0 = vadd.f32 %v8373_v45, %v2339_v59  ;;  %v8376_v17 = vpop.f32.mrf.mxu0 }
 0x1a3   : > { %v8326_v1 = vpop.f32.mrf.mxu1 }
 0x1a4   : > { %13025 = vst [vmem:[#allocation62_spill] sm:$0xff] %v10555_v0  ;;  %v2341_v53 = vadd.f32 %v8326_v1, %v10443_v62  ;;  %v10558_v48 = vpop.f32.mrf.mxu0 }
 0x1a5   : > { %13026 = vst [vmem:[#allocation63_spill] sm:$0xff] %v10558_v48  ;;  %v10560_v28 = vpop.f32.mrf.mxu1 }
 0x1a6   : > { %v10562_v27 = vadd.f32 %v8376_v17, %v2341_v53  ;;  %v8379_v54 = vpop.f32.mrf.mxu0  ;;  %v1775_v17 = vadd.f32 %v10364_v35, %v10141_v10 }
 0x1a7   : > { %v8329_v34 = vpop.f32.mrf.mxu1 }
 0x1a8   : > { %13027 = vst [vmem:[#allocation64_spill] sm:$0xff] %v10562_v27  ;;  %v2343_v18 = vadd.f32 %v8329_v34, %v10450_v15  ;;  %v10565_v49 = vpop.f32.mrf.mxu0 }
 0x1a9   : > { %13028 = vst [vmem:[#allocation65_spill] sm:$0xff] %v10565_v49  ;;  %v10567_v6 = vpop.f32.mrf.mxu1 }
 0x1aa   : > { %v10569_v45 = vadd.f32 %v8379_v54, %v2343_v18  ;;  %v8382_v59 = vpop.f32.mrf.mxu0  ;;  %v2047_v18 = vadd.f32 %v10362_v38, %v1775_v17 }
 0x1ab   : > { %v8332_v0 = vpop.f32.mrf.mxu1 }
 0x1ac   : > { %v2345_v62 = vadd.f32 %v8332_v0, %v10457_v5  ;;  %v10572_v1 = vpop.f32.mrf.mxu0  ;;  %v1777_v5 = vadd.f32 %v10371_v43, %v10155_v52  ;;  %v2319_v0 = vadd.f32 %v10475_v41, %v10366_v46  ;;  %v2321_v46 = vadd.f32 %v10483_v51, %v10373_v14 }
 0x1ad   : > { %13029 = vst [vmem:[#allocation66_spill] sm:$0xff] %v10572_v1  ;;  %v10574_v48 = vpop.f32.mrf.mxu1 }
 0x1ae   : > { %v10578_v53 = vadd.f32 %v8382_v59, %v2345_v62  ;;  %v8385_v15 = vpop.f32.mrf.mxu0  ;;  %v2318_v59 = vadd.f32 %v10479_v33, %v2047_v18  ;;  %v2049_v52 = vadd.f32 %v10369_v4, %v1777_v5  ;;  %v2587_v43 = vadd.f32 %v10473_v56, %v2319_v0 }
 0x1af   : > { %v8335_v34 = vpop.f32.mrf.mxu1  ;;  %v1781_v4 = vadd.f32 %v10385_v60, %v10186_v47  ;;  %v2589_v56 = vadd.f32 %v10481_v12, %v2321_v46  ;;  %v10625_v60 = vld [vmem:[%s12690_s3] ss:$0 sm:$0xff] }
 0x1b0   : > { %v2347_v49 = vadd.f32 %v8335_v34, %v10464_v9  ;;  %v10581_v27 = vpop.f32.mrf.mxu0  ;;  %v1779_v34 = vadd.f32 %v10378_v16, %v10169_v13  ;;  %v2320_v17 = vadd.f32 %v10487_v61, %v2049_v52  ;;  %v10614_v16 = vld [vmem:[%s12689_s2] ss:$0 sm:$0xff]  ;;  %v2323_v61 = vadd.f32 %v10491_v30, %v10380_v37 }
 0x1b1   : > { %v10583_v54 = vpop.f32.mrf.mxu1  ;;  %v2325_v37 = vadd.f32 %v10502_v42, %v10387_v22 }
 0x1b2   : > { %v10590_v1 = vadd.f32 %v8385_v15, %v2347_v49  ;;  %v8388_v10 = vpop.f32.mrf.mxu0  ;;  %v2051_v13 = vadd.f32 %v10376_v19, %v1779_v34  ;;  %v2591_v46 = vadd.f32 %v10489_v24, %v2323_v61 }
 0x1b3   : > { %v8338_v35 = vpop.f32.mrf.mxu1 }
 0x1b4   : > { %v2349_v9 = vadd.f32 %v8338_v35, %v10471_v29  ;;  %v10594_v62 = vpop.f32.mrf.mxu0  ;;  %v2586_v29 = vadd.f32 %v10477_v39, %v2318_v59  ;;  %v2322_v0 = vadd.f32 %v10495_v7, %v2051_v13 }
 0x1b5   : > { %v10598_v38 = vpop.f32.mrf.mxu1 }
 0x1b6   : > { %v10604_v41 = vadd.f32 %v8388_v10, %v2349_v9  ;;  %v8443_v49 = vpop.f32.mrf.mxu0  ;;  %v2588_v10 = vadd.f32 %v10485_v25, %v2320_v17  ;;  %v2053_v9 = vadd.f32 %v10383_v58, %v1781_v4 }
 0x1b7   : > { %v8393_v33 = vpop.f32.mrf.mxu1 }
 0x1b8   : > { %v2859_v15 = vadd.f32 %v8393_v33, %v2587_v43  ;;  %v2970_v18 = vpop.f32.mrf.mxu0  ;;  %v1783_v43 = vadd.f32 %v10392_v20, %v10202_v3  ;;  %v2324_v58 = vadd.f32 %v10506_v21, %v2053_v9  ;;  %v1785_v3 = vadd.f32 %v10399_v32, %v10216_v40 }
 0x1b9   : > { %v2699_v14 = vpop.f32.mrf.mxu1 }
 0x1ba   : > { %v3130_v51 = vadd.f32 %v8443_v49, %v2859_v15  ;;  %v2858_v5 = vadd.f32 %v2699_v14, %v2586_v29  ;;  %v8446_v39 = vpop.f32.mrf.mxu0  ;;  %v2590_v49 = vadd.f32 %v10493_v8, %v2322_v0  ;;  %v2593_v8 = vadd.f32 %v10497_v44, %v2325_v37 }
 0x1bb   : > { %v8396_v19 = vpop.f32.mrf.mxu1 }
 0x1bc   : > { %v3169_v47 = vmul.f32 %v10614_v16, %v3130_v51  ;;  %v3129_v35 = vadd.f32 %v2970_v18, %v2858_v5  ;;  %v2861_v12 = vadd.f32 %v8396_v19, %v2589_v56  ;;  %v2980_v59 = vpop.f32.mrf.mxu0  ;;  %v13030_v18 = vld [vmem:[#allocation5_spill] sm:$0xff]  ;;  %v2055_v51 = vadd.f32 %v10390_v26, %v1783_v43 }
 0x1bd   : > { %v2709_v34 = vpop.f32.mrf.mxu1  ;;  %v1054_v13 = vadd.f32 %v10251_v2, %v13030_v18  ;;  %v2592_v2 = vadd.f32 %v10504_v55, %v2324_v58  ;;  %v13034_v58 = vld [vmem:[#allocation50_spill] sm:$0xff]  ;;  %v13036_v18 = vld [vmem:[#allocation7_spill] sm:$0xff] }
 0x1be   : > { %v3168_v7 = vmul.f32 %v10614_v16, %v3129_v35  ;;  %v3132_v30 = vadd.f32 %v8446_v39, %v2861_v12  ;;  %v2860_v25 = vadd.f32 %v2709_v34, %v2588_v10  ;;  %v8449_v52 = vpop.f32.mrf.mxu0  ;;  %v3208_v33 = vadd.f32 %v10625_v60, %v3169_v47  ;;  %v13031_v10 = vld [vmem:[#allocation12_spill] sm:$0xff]  ;;  %v13032_v35 = vld [vmem:[#allocation39_spill] sm:$0xff] }
 0x1bf   : > { %v8399_v29 = vpop.f32.mrf.mxu1  ;;  %v2057_v47 = vadd.f32 %v13031_v10, %v1785_v3  ;;  %v13033_v12 = vld [vmem:[#allocation16_spill] sm:$0xff]  ;;  %v2326_v26 = vadd.f32 %v10511_v63, %v2055_v51  ;;  %v13037_v3 = vld [vmem:[#allocation43_spill] sm:$0xff] }
 0x1c0   : > { %v3207_v17 = vadd.f32 %v10625_v60, %v3168_v7  ;;  %v3171_v42 = vmul.f32 %v10614_v16, %v3132_v30  ;;  %v3131_v22 = vadd.f32 %v2980_v59, %v2860_v25  ;;  %v2990_v15 = vpop.f32.mrf.mxu0  ;;  %v2863_v20 = vadd.f32 %v8399_v29, %v2591_v46 }
 0x1c1   : > { %v2719_v24 = vpop.f32.mrf.mxu1  ;;  %v3240_v5 = vmax.f32 %v3208_v33, 0.0  ;;  %v1787_v59 = vadd.f32 %v13033_v12, %v13032_v35  ;;  %v13043_v12 = vld [vmem:[#allocation52_spill] sm:$0xff] }
 0x1c2   : > { %v3239_v4 = vmax.f32 %v3207_v17, 0.0  ;;  %v3170_v14 = vmul.f32 %v10614_v16, %v3131_v22  ;;  %v2862_v21 = vadd.f32 %v2719_v24, %v2590_v49  ;;  %v8452_v56 = vpop.f32.mrf.mxu0  ;;  %v3210_v39 = vadd.f32 %v10625_v60, %v3171_v42  ;;  %v13035_v22 = vld [vmem:[#allocation41_spill] sm:$0xff] }
 0x1c3   : > { %v3134_v61 = vadd.f32 %v8449_v52, %v2863_v20  ;;  %v8402_v0 = vpop.f32.mrf.mxu1  ;;  %v2328_v52 = vadd.f32 %v10518_v36, %v2057_v47  ;;  %v1064_v20 = vadd.f32 %v13037_v3, %v13036_v18  ;;  %v13038_v36 = vld [vmem:[#allocation40_spill] sm:$0xff]  ;;  %v13039_v24 = vld [vmem:[#allocation21_spill] sm:$0xff] }
 0x1c4   : > { %v3209_v40 = vadd.f32 %v10625_v60, %v3170_v14  ;;  %v3133_v32 = vadd.f32 %v2990_v15, %v2862_v21  ;;  %v2865_v19 = vadd.f32 %v8402_v0, %v2593_v8  ;;  %8491 = vmatprep.mubr.msk.f32.mxu1 %vm546_vm2, %v3239_v4  ;;  %v3000_v44 = vpop.f32.mrf.mxu0  ;;  %v3242_v43 = vmax.f32 %v3210_v39, 0.0  ;;  %v13040_v4 = vld [vmem:[#allocation49_spill] sm:$0xff] }
 0x1c5   : > { %v3173_v9 = vmul.f32 %v10614_v16, %v3134_v61  ;;  %v2729_v34 = vpop.f32.mrf.mxu1  ;;  %8492 = vmatmul.mubr.msk.f32.vlgmr.msra.gmra.mxu1 %vm546_vm2, %v3240_v5  ;;  %v1523_v15 = vadd.f32 %v13035_v22, %v1054_v13  ;;  %v1789_v8 = vadd.f32 %v13039_v24, %v13038_v36  ;;  %v2594_v14 = vadd.f32 %v13040_v4, %v2326_v26  ;;  %v13049_v36 = vld [vmem:[#allocation53_spill] sm:$0xff] }
 0x1c6   : > { %v3241_v55 = vmax.f32 %v3209_v40, 0.0  ;;  %v3172_v37 = vmul.f32 %v10614_v16, %v3133_v32  ;;  %v3136_v7 = vadd.f32 %v8452_v56, %v2865_v19  ;;  %v2864_v30 = vadd.f32 %v2729_v34, %v2592_v2  ;;  %v8455_v25 = vpop.f32.mrf.mxu0  ;;  %v13041_v56 = vld [vmem:[#allocation14_spill] sm:$0xff]  ;;  %v13042_v2 = vld [vmem:[#allocation51_spill] sm:$0xff] }
 0x1c7   : > { %v3212_v46 = vadd.f32 %v10625_v60, %v3173_v9  ;;  %v8405_v49 = vpop.f32.mrf.mxu1  ;;  %v2059_v51 = vadd.f32 %v13041_v56, %v1787_v59  ;;  %v2596_v13 = vadd.f32 %v13042_v2, %v2328_v52  ;;  %v13044_v9 = vld [vmem:[#allocation9_spill] sm:$0xff]  ;;  %v13045_v34 = vld [vmem:[#allocation22_spill] sm:$0xff]  ;;  %v13052_v56 = vld [vmem:[#allocation11_spill] sm:$0xff] }
 0x1c8   : > { %v3211_v33 = vadd.f32 %v10625_v60, %v3172_v37  ;;  %v3175_v63 = vmul.f32 %v10614_v16, %v3136_v7  ;;  %v3135_v29 = vadd.f32 %v3000_v44, %v2864_v30  ;;  %v2867_v17 = vadd.f32 %v8405_v49, %v13034_v58  ;;  %8494 = vmatprep.mubr.msk.f32.mxu1 %vm546_vm2, %v3241_v55  ;;  %v3010_v42 = vpop.f32.mrf.mxu0  ;;  %v13046_v37 = vld [vmem:[#allocation18_spill] sm:$0xff] }
 0x1c9   : > { %v2739_v21 = vpop.f32.mrf.mxu1  ;;  %8495 = vmatmul.mubr.msk.f32.gmra.mxu1 %vm546_vm2, %v3242_v43  ;;  %v3244_v40 = vmax.f32 %v3212_v46, 0.0  ;;  %v2330_v10 = vadd.f32 %v10525_v50, %v2059_v51  ;;  %v1074_v55 = vadd.f32 %v13045_v34, %v13044_v9  ;;  %v2061_v7 = vadd.f32 %v13046_v37, %v1789_v8  ;;  %v13047_v30 = vld [vmem:[#allocation26_spill] sm:$0xff] }
 0x1ca   : > { %v3243_v5 = vmax.f32 %v3211_v33, 0.0  ;;  %v3174_v39 = vmul.f32 %v10614_v16, %v3135_v29  ;;  %v3138_v61 = vadd.f32 %v8455_v25, %v2867_v17  ;;  %v8458_v0 = vpop.f32.mrf.mxu0  ;;  %v3214_v32 = vadd.f32 %v10625_v60, %v3175_v63  ;;  %v13048_v50 = vld [vmem:[#allocation42_spill] sm:$0xff] }
 0x1cb   : > { %v2866_v19 = vadd.f32 %v2739_v21, %v2594_v14  ;;  %v8408_v44 = vpop.f32.mrf.mxu1  ;;  %v1791_v25 = vadd.f32 %v13047_v30, %v1523_v15  ;;  %v1525_v46 = vadd.f32 %v13048_v50, %v1064_v20  ;;  %v2332_v58 = vadd.f32 %v10532_v31, %v2061_v7  ;;  %v13050_v8 = vld [vmem:[#allocation54_spill] sm:$0xff]  ;;  %v13051_v14 = vld [vmem:[#allocation17_spill] sm:$0xff]  ;;  %v13053_v31 = vld [vmem:[#allocation27_spill] sm:$0xff] }
 0x1cc   : > { %v3213_v47 = vadd.f32 %v10625_v60, %v3174_v39  ;;  %v3177_v35 = vmul.f32 %v10614_v16, %v3138_v61  ;;  %v2869_v59 = vadd.f32 %v8408_v44, %v13043_v12  ;;  %8497 = vmatprep.mubr.msk.f32.mxu1 %vm546_vm2, %v3243_v5  ;;  %v3020_v26 = vpop.f32.mrf.mxu0  ;;  %v3246_v17 = vmax.f32 %v3214_v32, 0.0  ;;  %v13054_v5 = vld [vmem:[#allocation23_spill] sm:$0xff]  ;;  %v13055_v2 = vld [vmem:[#allocation30_spill] sm:$0xff]  ;;  %v13057_v30 = vld [vmem:[#allocation25_spill] sm:$0xff] }
 0x1cd   : > { %v3137_v52 = vadd.f32 %v3010_v42, %v2866_v19  ;;  %v2749_v43 = vpop.f32.mrf.mxu1  ;;  %8498 = vmatmul.mubr.msk.f32.gmra.mxu1 %vm546_vm2, %v3244_v40  ;;  %v2598_v15 = vadd.f32 %v13049_v36, %v2330_v10  ;;  %v1527_v21 = vadd.f32 %v13051_v14, %v1074_v55  ;;  %v1084_v51 = vadd.f32 %v13053_v31, %v13052_v56  ;;  %v13056_v10 = vld [vmem:[#allocation55_spill] sm:$0xff] }
 0x1ce   : > { %v3245_v49 = vmax.f32 %v3213_v47, 0.0  ;;  %v3140_v33 = vadd.f32 %v8458_v0, %v2869_v59  ;;  %v2868_v63 = vadd.f32 %v2749_v43, %v2596_v13  ;;  %v8461_v29 = vpop.f32.mrf.mxu0  ;;  %v3216_v22 = vadd.f32 %v10625_v60, %v3177_v35  ;;  %v13059_v43 = vld [vmem:[#allocation31_spill] sm:$0xff] }
 0x1cf   : > { %v3176_v18 = vmul.f32 %v10614_v16, %v3137_v52  ;;  %v8411_v3 = vpop.f32.mrf.mxu1  ;;  %v2063_v39 = vadd.f32 %v13054_v5, %v1791_v25  ;;  %v1793_v13 = vadd.f32 %v13055_v2, %v1525_v46  ;;  %v2600_v47 = vadd.f32 %v13056_v10, %v2332_v58  ;;  %v13058_v52 = vld [vmem:[#allocation13_spill] sm:$0xff]  ;;  %v13060_v46 = vld [vmem:[#allocation15_spill] sm:$0xff] }
 0x1d0   : > { %v3179_v42 = vmul.f32 %v10614_v16, %v3140_v33  ;;  %v3139_v24 = vadd.f32 %v3020_v26, %v2868_v63  ;;  %v2871_v4 = vadd.f32 %v8411_v3, %v13050_v8  ;;  %8500 = vmatprep.mubr.msk.f32.mxu1 %vm546_vm2, %v3245_v49  ;;  %v3030_v20 = vpop.f32.mrf.mxu0  ;;  %v3248_v12 = vmax.f32 %v3216_v22, 0.0  ;;  %v13061_v33 = vld [vmem:[#allocation56_spill] sm:$0xff]  ;;  %v13063_v58 = vld [vmem:[#allocation3_spill] sm:$0xff] }
 0x1d1   : > { %v3215_v61 = vadd.f32 %v10625_v60, %v3176_v18  ;;  %v2759_v0 = vpop.f32.mrf.mxu1  ;;  %8501 = vmatmul.mubr.msk.f32.gmra.mxu1 %vm546_vm2, %v3246_v17  ;;  %v2334_v35 = vadd.f32 %v10539_v11, %v2063_v39  ;;  %v1529_v25 = vadd.f32 %v13057_v30, %v1084_v51  ;;  %v1094_v50 = vadd.f32 %v13059_v43, %v13058_v52  ;;  %v13066_v51 = vld [vmem:[#allocation58_spill] sm:$0xff]  ;;  %v13068_v2 = vld [vmem:[#allocation35_spill] sm:$0xff] }
 0x1d2   : > { %v3178_v40 = vmul.f32 %v10614_v16, %v3139_v24  ;;  %v3142_v32 = vadd.f32 %v8461_v29, %v2871_v4  ;;  %v2870_v19 = vadd.f32 %v2759_v0, %v2598_v15  ;;  %v8464_v44 = vpop.f32.mrf.mxu0  ;;  %v3218_v9 = vadd.f32 %v10625_v60, %v3179_v42  ;;  %v13062_v29 = vld [vmem:[#allocation20_spill] sm:$0xff]  ;;  %v13065_v24 = vld [vmem:[#allocation57_spill] sm:$0xff] }
 0x1d3   : > { %v3247_v59 = vmax.f32 %v3215_v61, 0.0  ;;  %v8414_v26 = vpop.f32.mrf.mxu1  ;;  %v1795_v49 = vadd.f32 %v13060_v46, %v1527_v21  ;;  %v1104_v17 = vadd.f32 %v13063_v58, %v13062_v29  ;;  %v13064_v15 = vld [vmem:[#allocation28_spill] sm:$0xff]  ;;  %v2602_v8 = vadd.f32 %v13065_v24, %v2334_v35  ;;  %v13067_v61 = vld [vmem:[#allocation33_spill] sm:$0xff] }
 0x1d4   : > { %v3217_v34 = vadd.f32 %v10625_v60, %v3178_v40  ;;  %v3181_v55 = vmul.f32 %v10614_v16, %v3142_v32  ;;  %v3141_v37 = vadd.f32 %v3030_v20, %v2870_v19  ;;  %v3040_v7 = vpop.f32.mrf.mxu0  ;;  %v2873_v11 = vadd.f32 %v8414_v26, %v13061_v33  ;;  %v13071_v46 = vld [vmem:[#allocation32_spill] sm:$0xff]  ;;  %v13072_v33 = vld [vmem:[#allocation19_spill] sm:$0xff] }
 0x1d5   : > { %8503 = vmatprep.mubr.msk.f32.mxu1 %vm546_vm2, %v3247_v59  ;;  %v2769_v63 = vpop.f32.mrf.mxu1  ;;  %v2065_v42 = vadd.f32 %v13064_v15, %v1793_v13  ;;  %v3250_v21 = vmax.f32 %v3218_v9, 0.0  ;;  %v2067_v0 = vadd.f32 %v13067_v61, %v1795_v49  ;;  %v1797_v40 = vadd.f32 %v13068_v2, %v1529_v25  ;;  %v13069_v59 = vld [vmem:[#allocation29_spill] sm:$0xff]  ;;  %v13070_v25 = vld [vmem:[#allocation60_spill] sm:$0xff]  ;;  %v13080_v2 = vld [vmem:[#allocation10_spill] sm:$0xff] }
 0x1d6   : > { %v3249_v22 = vmax.f32 %v3217_v34, 0.0  ;;  %v3180_v18 = vmul.f32 %v10614_v16, %v3141_v37  ;;  %v2872_v3 = vadd.f32 %v2769_v63, %v2600_v47  ;;  %8504 = vmatmul.mubr.msk.f32.gmra.mxu1 %vm546_vm2, %v3248_v12  ;;  %v8467_v36 = vpop.f32.mrf.mxu0  ;;  %v3220_v4 = vadd.f32 %v10625_v60, %v3181_v55  ;;  %v13074_v63 = vld [vmem:[#allocation59_spill] sm:$0xff] }
 0x1d7   : > { %v3144_v20 = vadd.f32 %v8464_v44, %v2873_v11  ;;  %v8417_v14 = vpop.f32.mrf.mxu1  ;;  %v2336_v13 = vadd.f32 %v10546_v23, %v2065_v42  ;;  %v1531_v26 = vadd.f32 %v13069_v59, %v1094_v50  ;;  %v2338_v9 = vadd.f32 %v10553_v57, %v2067_v0  ;;  %v13073_v11 = vld [vmem:[#allocation34_spill] sm:$0xff] }
 0x1d8   : > { %v3219_v56 = vadd.f32 %v10625_v60, %v3180_v18  ;;  %v3143_v31 = vadd.f32 %v3040_v7, %v2872_v3  ;;  %v2875_v5 = vadd.f32 %v8417_v14, %v13066_v51  ;;  %8506 = vmatprep.mubr.msk.f32.mxu1 %vm546_vm2, %v3249_v22  ;;  %v3050_v39 = vpop.f32.mrf.mxu0  ;;  %v3252_v34 = vmax.f32 %v3220_v4, 0.0  ;;  %v13075_v22 = vld [vmem:[#allocation36_spill] sm:$0xff]  ;;  %v13076_v18 = vld [vmem:[#allocation6_spill] sm:$0xff] }
 0x1d9   : > { %v3183_v32 = vmul.f32 %v10614_v16, %v3144_v20  ;;  %v2779_v19 = vpop.f32.mrf.mxu1  ;;  %v1533_v49 = vadd.f32 %v13071_v46, %v1104_v17  ;;  %v2069_v50 = vadd.f32 %v13072_v33, %v1797_v40  ;;  %v1799_v57 = vadd.f32 %v13073_v11, %v1531_v26  ;;  %v13079_v0 = vld [vmem:[#allocation38_spill] sm:$0xff]  ;;  %v13085_v46 = vld [vmem:[#allocation64_spill] sm:$0xff] }
 0x1da   : > { %v3251_v44 = vmax.f32 %v3219_v56, 0.0  ;;  %v3182_v10 = vmul.f32 %v10614_v16, %v3143_v31  ;;  %v3146_v47 = vadd.f32 %v8467_v36, %v2875_v5  ;;  %v2874_v35 = vadd.f32 %v2779_v19, %v2602_v8  ;;  %8507 = vmatmul.mubr.msk.f32.gmra.mxu1 %vm546_vm2, %v3250_v21  ;;  %v8470_v12 = vpop.f32.mrf.mxu0  ;;  %v13077_v8 = vld [vmem:[#allocation61_spill] sm:$0xff]  ;;  %v13078_v5 = vld [vmem:[#allocation62_spill] sm:$0xff] }
 0x1db   : > { %v3222_v55 = vadd.f32 %v10625_v60, %v3183_v32  ;;  %v8420_v37 = vpop.f32.mrf.mxu1  ;;  %v2604_v29 = vadd.f32 %v13074_v63, %v2336_v13  ;;  %v1114_v3 = vadd.f32 %v13076_v18, %v13075_v22  ;;  %v2606_v4 = vadd.f32 %v13077_v8, %v2338_v9  ;;  %v13081_v13 = vld [vmem:[#allocation24_spill] sm:$0xff] }
 0x1dc   : > { %v3221_v23 = vadd.f32 %v10625_v60, %v3182_v10  ;;  %v3185_v7 = vmul.f32 %v10614_v16, %v3146_v47  ;;  %v3145_v30 = vadd.f32 %v3050_v39, %v2874_v35  ;;  %v2877_v52 = vadd.f32 %v8420_v37, %v13070_v25  ;;  %8509 = vmatprep.mubr.msk.f32.mxu1 %vm546_vm2, %v3251_v44  ;;  %v3060_v43 = vpop.f32.mrf.mxu0  ;;  %v13083_v47 = vld [vmem:[#allocation4_spill] sm:$0xff] }
 0x1dd   : > { %v2789_v58 = vpop.f32.mrf.mxu1  ;;  %v2340_v17 = vadd.f32 %v10560_v28, %v2069_v50  ;;  %v3254_v20 = vmax.f32 %v3222_v55, 0.0  ;;  %v1124_v40 = vadd.f32 %v13080_v2, %v13079_v0  ;;  %v2071_v32 = vadd.f32 %v13081_v13, %v1799_v57  ;;  %v13082_v28 = vld [vmem:[#allocation44_spill] sm:$0xff]  ;;  %v13087_v57 = vld [vmem:[#allocation37_spill] sm:$0xff] }
 0x1de   : > { %v3253_v36 = vmax.f32 %v3221_v23, 0.0  ;;  %v3184_v15 = vmul.f32 %v10614_v16, %v3145_v30  ;;  %v3148_v42 = vadd.f32 %v8470_v12, %v2877_v52  ;;  %8510 = vmatmul.mubr.msk.f32.gmra.mxu1 %vm546_vm2, %v3252_v34  ;;  %v8473_v24 = vpop.f32.mrf.mxu0  ;;  %v2876_v14 = vadd.f32 %v2789_v58, %v2604_v29  ;;  %v13084_v34 = vld [vmem:[#allocation63_spill] sm:$0xff]  ;;  %v13086_v50 = vld [vmem:[#allocation8_spill] sm:$0xff]  ;;  %v13088_v58 = vld [vmem:[#allocation46_spill] sm:$0xff] }
 0x1df   : > { %v8423_v21 = vpop.f32.mrf.mxu1  ;;  %v3224_v56 = vadd.f32 %v10625_v60, %v3185_v7  ;;  %v1801_v19 = vadd.f32 %v13082_v28, %v1533_v49  ;;  %v1535_v35 = vadd.f32 %v13083_v47, %v1114_v3  ;;  %v2608_v55 = vadd.f32 %v13084_v34, %v2340_v17  ;;  %v13093_v34 = vld [vmem:[#allocation47_spill] sm:$0xff] }
 0x1e0   : > { %v3223_v31 = vadd.f32 %v10625_v60, %v3184_v15  ;;  %v3187_v51 = vmul.f32 %v10614_v16, %v3148_v42  ;;  %v2879_v39 = vadd.f32 %v8423_v21, %v13078_v5  ;;  %8512 = vmatprep.mubr.msk.f32.mxu1 %vm546_vm2, %v3253_v36  ;;  %v3070_v61 = vpop.f32.mrf.mxu0  ;;  %v3147_v44 = vadd.f32 %v3060_v43, %v2876_v14  ;;  %v13089_v42 = vld [vmem:[#allocation65_spill] sm:$0xff]  ;;  %v13090_v5 = vld [vmem:[#allocation48_spill] sm:$0xff] }
 0x1e1   : > { %v2799_v10 = vpop.f32.mrf.mxu1  ;;  %v2342_v37 = vadd.f32 %v10567_v6, %v2071_v32  ;;  %v3256_v25 = vmax.f32 %v3224_v56, 0.0  ;;  %v1537_v11 = vadd.f32 %v13086_v50, %v1124_v40  ;;  %v2073_v63 = vadd.f32 %v13087_v57, %v1801_v19  ;;  %v13091_v32 = vld [vmem:[#allocation45_spill] sm:$0xff]  ;;  %v13092_v19 = vld [vmem:[#allocation66_spill] sm:$0xff] }
 0x1e2   : > { %v3255_v12 = vmax.f32 %v3223_v31, 0.0  ;;  %v3150_v59 = vadd.f32 %v8473_v24, %v2879_v39  ;;  %v2878_v26 = vadd.f32 %v2799_v10, %v2606_v4  ;;  %8513 = vmatmul.mubr.msk.f32.gmra.mxu1 %vm546_vm2, %v3254_v20  ;;  %v8476_v9 = vpop.f32.mrf.mxu0  ;;  %v3226_v23 = vadd.f32 %v10625_v60, %v3187_v51 }
 0x1e3   : > { %v3186_v7 = vmul.f32 %v10614_v16, %v3147_v44  ;;  %v8426_v30 = vpop.f32.mrf.mxu1  ;;  %v1803_v22 = vadd.f32 %v13088_v58, %v1535_v35  ;;  %v2610_v24 = vadd.f32 %v13089_v42, %v2342_v37  ;;  %v2344_v8 = vadd.f32 %v10574_v48, %v2073_v63 }
 0x1e4   : > { %v3189_v52 = vmul.f32 %v10614_v16, %v3150_v59  ;;  %v3149_v43 = vadd.f32 %v3070_v61, %v2878_v26  ;;  %v2881_v49 = vadd.f32 %v8426_v30, %v13085_v46  ;;  %8515 = vmatprep.mubr.msk.f32.mxu1 %vm546_vm2, %v3255_v12  ;;  %v3080_v33 = vpop.f32.mrf.mxu0  ;;  %v3258_v4 = vmax.f32 %v3226_v23, 0.0 }
 0x1e5   : > { %v3225_v6 = vadd.f32 %v10625_v60, %v3186_v7  ;;  %v2809_v29 = vpop.f32.mrf.mxu1  ;;  %v1805_v39 = vadd.f32 %v13090_v5, %v1537_v11  ;;  %v2075_v28 = vadd.f32 %v13091_v32, %v1803_v22  ;;  %v2612_v44 = vadd.f32 %v13092_v19, %v2344_v8 }
 0x1e6   : > { %v3188_v18 = vmul.f32 %v10614_v16, %v3149_v43  ;;  %v3152_v3 = vadd.f32 %v8476_v9, %v2881_v49  ;;  %v2880_v36 = vadd.f32 %v2809_v29, %v2608_v55  ;;  %8516 = vmatmul.mubr.msk.f32.gmra.mxu1 %vm546_vm2, %v3256_v25  ;;  %v8479_v15 = vpop.f32.mrf.mxu0  ;;  %v3228_v14 = vadd.f32 %v10625_v60, %v3189_v52 }
 0x1e7   : > { %v3257_v17 = vmax.f32 %v3225_v6, 0.0  ;;  %v8429_v20 = vpop.f32.mrf.mxu1  ;;  %v2077_v55 = vadd.f32 %v13093_v34, %v1805_v39  ;;  %v2346_v37 = vadd.f32 %v10583_v54, %v2075_v28  ;;  %v10901_v34 = vld [vmem:[%s12694_s7 + $0x20] sm:$0xff] }
 0x1e8   : > { %v3227_v21 = vadd.f32 %v10625_v60, %v3188_v18  ;;  %v3191_v56 = vmul.f32 %v10614_v16, %v3152_v3  ;;  %v3151_v31 = vadd.f32 %v3080_v33, %v2880_v36  ;;  %v3090_v51 = vpop.f32.mrf.mxu0  ;;  %v2883_v61 = vadd.f32 %v8429_v20, %v10569_v45 }
 0x1e9   : > { %8518 = vmatprep.mubr.msk.f32.mxu1 %vm546_vm2, %v3257_v17  ;;  %v2819_v0 = vpop.f32.mrf.mxu1  ;;  %v3260_v12 = vmax.f32 %v3228_v14, 0.0  ;;  %v2614_v29 = vadd.f32 %v10581_v27, %v2346_v37 }
 0x1ea   : > { %v3259_v2 = vmax.f32 %v3227_v21, 0.0  ;;  %v3190_v48 = vmul.f32 %v10614_v16, %v3151_v31  ;;  %v2882_v40 = vadd.f32 %v2819_v0, %v2610_v24  ;;  %8519 = vmatmul.mubr.msk.f32.gmra.mxu1 %vm546_vm2, %v3258_v4  ;;  %v8482_v13 = vpop.f32.mrf.mxu0  ;;  %v3230_v10 = vadd.f32 %v10625_v60, %v3191_v56 }
 0x1eb   : > { %v3154_v47 = vadd.f32 %v8479_v15, %v2883_v61  ;;  %v8432_v35 = vpop.f32.mrf.mxu1 }
 0x1ec   : > { %v3229_v45 = vadd.f32 %v10625_v60, %v3190_v48  ;;  %v3153_v59 = vadd.f32 %v3090_v51, %v2882_v40  ;;  %v2885_v26 = vadd.f32 %v8432_v35, %v10578_v53  ;;  %8521 = vmatprep.mubr.msk.f32.mxu1 %vm546_vm2, %v3259_v2  ;;  %v3100_v9 = vpop.f32.mrf.mxu0  ;;  %v2348_v53 = vadd.f32 %v10598_v38, %v2077_v55  ;;  %v10907_v55 = vld [vmem:[%s12692_s5] ss:$0 sm:$0xff] }
 0x1ed   : > { %v3193_v23 = vmul.f32 %v10614_v16, %v3154_v47  ;;  %v2829_v7 = vpop.f32.mrf.mxu1  ;;  %v3262_v49 = vmax.f32 %v3230_v10, 0.0 }
 0x1ee   : > { %v3261_v30 = vmax.f32 %v3229_v45, 0.0  ;;  %v3192_v25 = vmul.f32 %v10614_v16, %v3153_v59  ;;  %v3156_v52 = vadd.f32 %v8482_v13, %v2885_v26  ;;  %v2884_v43 = vadd.f32 %v2829_v7, %v2612_v44  ;;  %8522 = vmatmul.mubr.msk.f32.gmra.mxu1 %vm546_vm2, %v3260_v12  ;;  %v8485_v46 = vpop.f32.mrf.mxu0  ;;  %v3848_v44 = vld [vmem:[%s12694_s7] sm:$0xff]  ;;  %v7176_v26 = vld [vmem:[%s12694_s7 + $0x10] sm:$0xff] }
 0x1ef   : > { %v3232_v33 = vadd.f32 %v10625_v60, %v3193_v23  ;;  %v8435_v50 = vpop.f32.mrf.mxu1  ;;  %v2616_v36 = vadd.f32 %v10594_v62, %v2348_v53  ;;  %8589 = vmatprep.subr.mxu1 %v3848_v44  ;;  %8639 = vmatprep.subr.mxu0 %v7176_v26  ;;  %v10912_v23 = vld [vmem:[%s12693_s6] ss:$0 sm:$0xff] }
 0x1f0   : > { %v3231_v11 = vadd.f32 %v10625_v60, %v3192_v25  ;;  %v3195_v54 = vmul.f32 %v10614_v16, %v3156_v52  ;;  %v3155_v57 = vadd.f32 %v3100_v9, %v2884_v43  ;;  %v2887_v63 = vadd.f32 %v8435_v50, %v10590_v1  ;;  %8524 = vmatprep.mubr.msk.f32.mxu1 %vm546_vm2, %v3261_v30  ;;  %v3110_v6 = vpop.f32.mrf.mxu0  ;;  %v7209_v9 = vld [vmem:[%s12694_s7 + $0x18] sm:$0xff] }
 0x1f1   : > { %v2839_v58 = vpop.f32.mrf.mxu1  ;;  %v3264_v15 = vmax.f32 %v3232_v33, 0.0  ;;  %8590 = vmatpush3.msra.mxu1 %v3848_v44 }
 0x1f2   : > { %v3263_v22 = vmax.f32 %v3231_v11, 0.0  ;;  %v3194_v38 = vmul.f32 %v10614_v16, %v3155_v57  ;;  %v3158_v18 = vadd.f32 %v8485_v46, %v2887_v63  ;;  %8525 = vmatmul.mubr.msk.f32.gmra.mxu1 %vm546_vm2, %v3262_v49  ;;  %v8488_v3 = vpop.f32.mrf.mxu0  ;;  %v2886_v42 = vadd.f32 %v2839_v58, %v2614_v29  ;;  %8689 = vmatprep.subr.mxu1 %v7209_v9 }
 0x1f3   : > { %v8438_v24 = vpop.f32.mrf.mxu1  ;;  %v3234_v1 = vadd.f32 %v10625_v60, %v3195_v54 }
 0x1f4   : > { %v3233_v8 = vadd.f32 %v10625_v60, %v3194_v38  ;;  %v3197_v4 = vmul.f32 %v10614_v16, %v3158_v18  ;;  %v2889_v27 = vadd.f32 %v8438_v24, %v10604_v41  ;;  %8527 = vmatprep.mubr.msk.f32.mxu1 %vm546_vm2, %v3263_v22  ;;  %v3157_v17 = vadd.f32 %v3110_v6, %v2886_v42  ;;  %v3120_v14 = vpop.f32.mrf.mxu0 }
 0x1f5   : > { %v2849_v20 = vpop.f32.mrf.mxu1  ;;  %v3266_v51 = vmax.f32 %v3234_v1, 0.0 }
 0x1f6   : > { %v3265_v21 = vmax.f32 %v3233_v8, 0.0  ;;  %v2888_v56 = vadd.f32 %v2849_v20, %v2616_v36  ;;  %v3160_v31 = vadd.f32 %v8488_v3, %v2889_v27  ;;  %8528 = vmatmul.mubr.msk.f32.gmra.mxu1 %vm546_vm2, %v3264_v15  ;;  %v3196_v62 = vmul.f32 %v10614_v16, %v3157_v17  ;;  %v10931_v36 = vld [vmem:[%s12694_s7 + $0x28] sm:$0xff] }
 0x1f7   : > { %v3236_v5 = vadd.f32 %v10625_v60, %v3197_v4 }
 0x1f8   : > { %v3199_v39 = vmul.f32 %v10614_v16, %v3160_v31  ;;  %v3159_v61 = vadd.f32 %v3120_v14, %v2888_v56  ;;  %8530 = vmatprep.mubr.msk.f32.mxu1 %vm546_vm2, %v3265_v21  ;;  %v3235_v41 = vadd.f32 %v10625_v60, %v3196_v62 }
 0x1f9   : > { %v3268_v48 = vmax.f32 %v3236_v5, 0.0 }
 0x1fa   : > { %v3198_v0 = vmul.f32 %v10614_v16, %v3159_v61  ;;  %8531 = vmatmul.mubr.msk.f32.gmra.mxu1 %vm546_vm2, %v3266_v51  ;;  %v3267_v2 = vmax.f32 %v3235_v41, 0.0  ;;  %v3238_v40 = vadd.f32 %v10625_v60, %v3199_v39  ;;  %v9011_v16 = vmov 0.0  }
 0x1fb   : > { %3711 = vst.msk [vmem:[#allocation2 + $0x20] sm:$0xff] %vm3706_vm4, %v9011_v16  ;;  %3712 = vst.msk [vmem:[#allocation2 + $0x28] sm:$0xff] %vm3706_vm4, %v9011_v16 }
 0x1fc   : > { %v3237_v13 = vadd.f32 %v10625_v60, %v3198_v0  ;;  %8533 = vmatprep.mubr.msk.f32.mxu1 %vm546_vm2, %v3267_v2  ;;  %v3270_v28 = vmax.f32 %v3238_v40, 0.0  ;;  %3707 = vst.msk [vmem:[#allocation2] sm:$0xff] %vm3706_vm4, %v9011_v16  ;;  %3708 = vst.msk [vmem:[#allocation2 + $0x8] sm:$0xff] %vm3706_vm4, %v9011_v16 }
 0x1fd   : > { %3709 = vst.msk [vmem:[#allocation2 + $0x10] sm:$0xff] %vm3706_vm4, %v9011_v16  ;;  %3710 = vst.msk [vmem:[#allocation2 + $0x18] sm:$0xff] %vm3706_vm4, %v9011_v16 }
 0x1fe   : > { %v3269_v32 = vmax.f32 %v3237_v13, 0.0  ;;  %8534 = vmatmul.mubr.msk.f32.gmra.mxu1 %vm546_vm2, %v3268_v48  ;;  %3713 = vst.msk [vmem:[#allocation2 + $0x30] sm:$0xff] %vm3706_vm4, %v9011_v16  ;;  %3714 = vst.msk [vmem:[#allocation2 + $0x38] sm:$0xff] %vm3706_vm4, %v9011_v16 }
 0x1ff   : > { %3715 = vst.msk [vmem:[#allocation2 + $0x40] sm:$0xff] %vm3706_vm4, %v9011_v16  ;;  %3716 = vst.msk [vmem:[#allocation2 + $0x48] sm:$0xff] %vm3706_vm4, %v9011_v16 }
 0x200   : > { %8536 = vmatprep.mubr.msk.f32.mxu1 %vm546_vm2, %v3269_v32  ;;  %3717 = vst.msk [vmem:[#allocation2 + $0x50] sm:$0xff] %vm3706_vm4, %v9011_v16  ;;  %3718 = vst.msk [vmem:[#allocation2 + $0x58] sm:$0xff] %vm3706_vm4, %v9011_v16 }
 0x201   : > { %3719 = vst.msk [vmem:[#allocation2 + $0x60] sm:$0xff] %vm3706_vm4, %v9011_v16  ;;  %3720 = vst.msk [vmem:[#allocation2 + $0x68] sm:$0xff] %vm3706_vm4, %v9011_v16 }
 0x202   : > { %8537 = vmatmul.mubr.msk.f32.gmra.mxu1 %vm546_vm2, %v3270_v28  ;;  %3721 = vst.msk [vmem:[#allocation2 + $0x70] sm:$0xff] %vm3706_vm4, %v9011_v16  ;;  %3722 = vst.msk [vmem:[#allocation2 + $0x78] sm:$0xff] %vm3706_vm4, %v9011_v16 }
 0x203   : > { %3723 = vst.msk [vmem:[#allocation2 + $0x80] sm:$0xff] %vm3706_vm4, %v9011_v16  ;;  %3724 = vst.msk [vmem:[#allocation2 + $0x88] sm:$0xff] %vm3706_vm4, %v9011_v16  ;;  %v10872_v60 = vld [vmem:[#allocation2] sm:$0xff]  ;;  %v10874_v19 = vld [vmem:[#allocation2 + $0x8] sm:$0xff] }
 0x204   : > { %3725 = vst.msk [vmem:[#allocation2 + $0x90] sm:$0xff] %vm3706_vm4, %v9011_v16  ;;  %3726 = vst.msk [vmem:[#allocation2 + $0x98] sm:$0xff] %vm3706_vm4, %v9011_v16  ;;  %v3897_v10 = vrot.slane %v10872_v60, 1  ;;  %8591 = vmatprep.mubr.msk.f32.mxu1 %vm3706_vm4, %v10872_v60  ;;  %v3898_v47 = vrot.slane %v10874_v19, 1  ;;  %v10883_v35 = vld [vmem:[#allocation2 + $0x10] sm:$0xff] }
 0x205   : > { %3727 = vst.msk [vmem:[#allocation2 + $0xa0] sm:$0xff] %vm3706_vm4, %v9011_v16  ;;  %3728 = vst.msk [vmem:[#allocation2 + $0xa8] sm:$0xff] %vm3706_vm4, %v9011_v16  ;;  %v3900_v12 = vrot.slane %v10883_v35, 1 }
 0x206   : > { %3729 = vst.msk [vmem:[#allocation2 + $0xb0] sm:$0xff] %vm3706_vm4, %v9011_v16  ;;  %3730 = vst.msk [vmem:[#allocation2 + $0xb8] sm:$0xff] %vm3706_vm4, %v9011_v16  ;;  %v3899_v45 = vsel %vm463_vm1, %v3897_v10, %v3898_v47  ;;  %8592 = vmatmul.mubr.msk.f32.vlgmr.msra.gmra.mxu1 %vm3706_vm4, %v10874_v19 }
 0x207   : > { %3731 = vst.msk [vmem:[#allocation2 + $0xc0] sm:$0xff] %vm3706_vm4, %v9011_v16  ;;  %3732 = vst.msk [vmem:[#allocation2 + $0xc8] sm:$0xff] %vm3706_vm4, %v9011_v16  ;;  %8541 = vmatprep.mubr.msk.f32.mxu0 %vm3706_vm4, %v3899_v45  ;;  %v3901_v59 = vsel %vm463_vm1, %v3898_v47, %v3900_v12  ;;  %8690 = vmatpush3.msra.mxu1 %v7209_v9 }
 0x208   : > { %3733 = vst.msk [vmem:[#allocation2 + $0xd0] sm:$0xff] %vm3706_vm4, %v9011_v16  ;;  %3734 = vst.msk [vmem:[#allocation2 + $0xd8] sm:$0xff] %vm3706_vm4, %v9011_v16  ;;  %8542 = vmatmul.mubr.msk.f32.vlgmr.msra.gmra.mxu0 %vm3706_vm4, %v3901_v59  ;;  %8789 = vmatprep.subr.mxu1 %v10931_v36 }
 0x209   : > { %3735 = vst.msk [vmem:[#allocation2 + $0xe0] sm:$0xff] %vm3706_vm4, %v9011_v16  ;;  %3736 = vst.msk [vmem:[#allocation2 + $0xe8] sm:$0xff] %vm3706_vm4, %v9011_v16  ;;  %8640 = vmatpush3.msra.mxu0 %v7176_v26 }
 0x20a   : > { %3737 = vst.msk [vmem:[#allocation2 + $0xf0] sm:$0xff] %vm3706_vm4, %v9011_v16  ;;  %3738 = vst.msk [vmem:[#allocation2 + $0xf8] sm:$0xff] %vm3706_vm4, %v9011_v16  ;;  %8739 = vmatprep.subr.mxu0 %v10901_v34 }
 0x20b   : > { %3739 = vst.msk [vmem:[#allocation2 + $0x100] sm:$0xff] %vm3706_vm4, %v9011_v16  ;;  %3740 = vst.msk [vmem:[#allocation2 + $0x108] sm:$0xff] %vm3706_vm4, %v9011_v16 }
 0x20c   : > { %3741 = vst.msk [vmem:[#allocation2 + $0x110] sm:$0xff] %vm3706_vm4, %v9011_v16  ;;  %3742 = vst.msk [vmem:[#allocation2 + $0x118] sm:$0xff] %vm3706_vm4, %v9011_v16 }
 0x20d   : > { %3743 = vst.msk [vmem:[#allocation2 + $0x120] sm:$0xff] %vm3706_vm4, %v9011_v16  ;;  %3744 = vst.msk [vmem:[#allocation2 + $0x128] sm:$0xff] %vm3706_vm4, %v9011_v16 }
 0x20e   : > { %3745 = vst.msk [vmem:[#allocation2 + $0x130] sm:$0xff] %vm3706_vm4, %v9011_v16  ;;  %3746 = vst.msk [vmem:[#allocation2 + $0x138] sm:$0xff] %vm3706_vm4, %v9011_v16 }
 0x20f   : > { %3747 = vst.msk [vmem:[#allocation2 + $0x140] sm:$0xff] %vm3706_vm4, %v9011_v16  ;;  %3748 = vst.msk [vmem:[#allocation2 + $0x148] sm:$0xff] %vm3706_vm4, %v9011_v16 }
 0x210   : > { %3749 = vst.msk [vmem:[#allocation2 + $0x150] sm:$0xff] %vm3706_vm4, %v9011_v16  ;;  %3750 = vst.msk [vmem:[#allocation2 + $0x158] sm:$0xff] %vm3706_vm4, %v9011_v16 }
 0x211   : > { %3751 = vst.msk [vmem:[#allocation2 + $0x160] sm:$0xff] %vm3706_vm4, %v9011_v16  ;;  %3752 = vst.msk [vmem:[#allocation2 + $0x168] sm:$0xff] %vm3706_vm4, %v9011_v16 }
 0x212   : > { %3753 = vst.msk [vmem:[#allocation2 + $0x170] sm:$0xff] %vm3706_vm4, %v9011_v16  ;;  %3754 = vst.msk [vmem:[#allocation2 + $0x178] sm:$0xff] %vm3706_vm4, %v9011_v16 }
 0x213   : > { %3755 = vst.msk [vmem:[#allocation2 + $0x180] sm:$0xff] %vm3706_vm4, %v9011_v16  ;;  %3756 = vst.msk [vmem:[#allocation2 + $0x188] sm:$0xff] %vm3706_vm4, %v9011_v16 }
 0x214   : > { %3757 = vst.msk [vmem:[#allocation2 + $0x190] sm:$0xff] %vm3706_vm4, %v9011_v16  ;;  %3758 = vst.msk [vmem:[#allocation2 + $0x198] sm:$0xff] %vm3706_vm4, %v9011_v16 }
 0x215   : > { %3759 = vst.msk [vmem:[#allocation2 + $0x1a0] sm:$0xff] %vm3706_vm4, %v9011_v16  ;;  %3760 = vst.msk [vmem:[#allocation2 + $0x1a8] sm:$0xff] %vm3706_vm4, %v9011_v16 }
 0x285   : > { %v8493_v37 = vpop.f32.mrf.mxu1 }
 0x286   : > { %v3604_v7 = vmul.f32 %v8493_v37, %v10907_v55 }
 0x287   : > { %v3437_v30 = vpop.f32.mrf.mxu1 }
 0x288   : > { %v3643_v25 = vadd.f32 %v10912_v23, %v3604_v7  ;;  %v3603_v52 = vmul.f32 %v10907_v55, %v3437_v30 }
 0x289   : > { %v8496_v43 = vpop.f32.mrf.mxu1 }
 0x28a   : > { %v3675_v46 = vmax.f32 %v3643_v25, 0.0  ;;  %v3642_v53 = vadd.f32 %v10912_v23, %v3603_v52  ;;  %v3606_v49 = vmul.f32 %v8496_v43, %v10907_v55 }
 0x28b   : > { %v3447_v33 = vpop.f32.mrf.mxu1 }
 0x28c   : > { %3763 = vst.msk [vmem:[#allocation2 + $0x21] sm:$0xff] %vm3706_vm4, %v3675_v46  ;;  %v3674_v50 = vmax.f32 %v3642_v53, 0.0  ;;  %v3645_v11 = vadd.f32 %v10912_v23, %v3606_v49  ;;  %v3605_v54 = vmul.f32 %v10907_v55, %v3447_v33 }
 0x28d   : > { %v8499_v57 = vpop.f32.mrf.mxu1 }
 0x28e   : > { %3762 = vst.msk [vmem:[#allocation2 + $0x19] sm:$0xff] %vm3706_vm4, %v3674_v50  ;;  %v3677_v63 = vmax.f32 %v3645_v11, 0.0  ;;  %v3644_v6 = vadd.f32 %v10912_v23, %v3605_v54  ;;  %v3608_v29 = vmul.f32 %v8499_v57, %v10907_v55 }
 0x28f   : > { %v3457_v58 = vpop.f32.mrf.mxu1 }
 0x290   : > { %3765 = vst.msk [vmem:[#allocation2 + $0x39] sm:$0xff] %vm3706_vm4, %v3677_v63  ;;  %v3676_v22 = vmax.f32 %v3644_v6, 0.0  ;;  %v3647_v38 = vadd.f32 %v10912_v23, %v3608_v29  ;;  %v3607_v18 = vmul.f32 %v10907_v55, %v3457_v58 }
 0x291   : > { %v8502_v3 = vpop.f32.mrf.mxu1 }
 0x292   : > { %3764 = vst.msk [vmem:[#allocation2 + $0x31] sm:$0xff] %vm3706_vm4, %v3676_v22  ;;  %v3679_v15 = vmax.f32 %v3647_v38, 0.0  ;;  %v3646_v42 = vadd.f32 %v10912_v23, %v3607_v18  ;;  %v3610_v24 = vmul.f32 %v8502_v3, %v10907_v55 }
 0x293   : > { %v3467_v1 = vpop.f32.mrf.mxu1  ;;  %v10940_v17 = vld [vmem:[#allocation2 + $0x28] sm:$0xff] }
 0x294   : > { %3767 = vst.msk [vmem:[#allocation2 + $0x51] sm:$0xff] %vm3706_vm4, %v3679_v15  ;;  %v3678_v8 = vmax.f32 %v3646_v42, 0.0  ;;  %v3649_v4 = vadd.f32 %v10912_v23, %v3610_v24  ;;  %v3609_v27 = vmul.f32 %v10907_v55, %v3467_v1  ;;  %v3905_v39 = vrot.slane %v10940_v17, 1 }
 0x295   : > { %v10942_v20 = vld [vmem:[#allocation2 + $0x18] sm:$0xff]  ;;  %v10944_v14 = vld [vmem:[#allocation2 + $0x20] sm:$0xff] }
 0x296   : > { %3766 = vst.msk [vmem:[#allocation2 + $0x49] sm:$0xff] %vm3706_vm4, %v3678_v8  ;;  %v3681_v21 = vmax.f32 %v3649_v4, 0.0  ;;  %v3648_v56 = vadd.f32 %v10912_v23, %v3609_v27  ;;  %v8505_v31 = vpop.f32.mrf.mxu1  ;;  %v3902_v62 = vrot.slane %v10942_v20, 1  ;;  %8594 = vmatprep.mubr.msk.f32.mxu1 %vm3706_vm4, %v10942_v20  ;;  %v3903_v5 = vrot.slane %v10944_v14, 1 }
 0x297   : > { %v3612_v51 = vmul.f32 %v8505_v31, %v10907_v55  ;;  %8595 = vmatmul.mubr.msk.f32.gmra.mxu1 %vm3706_vm4, %v10944_v14  ;;  %v10956_v61 = vld [vmem:[#allocation2 + $0x40] sm:$0xff] }
 0x298   : > { %3769 = vst.msk [vmem:[#allocation2 + $0x69] sm:$0xff] %vm3706_vm4, %v3681_v21  ;;  %v3680_v41 = vmax.f32 %v3648_v56, 0.0  ;;  %v3477_v0 = vpop.f32.mrf.mxu1  ;;  %v10962_v40 = vsel %vm463_vm1, %v3902_v62, %v3903_v5  ;;  %v10965_v13 = vsel %vm463_vm1, %v3903_v5, %v3905_v39  ;;  %v3910_v47 = vrot.slane %v10956_v61, 1 }
 0x299   : > { %v3651_v2 = vadd.f32 %v10912_v23, %v3612_v51  ;;  %v3611_v48 = vmul.f32 %v10907_v55, %v3477_v0  ;;  %v10967_v32 = vld [vmem:[#allocation2 + $0x30] sm:$0xff]  ;;  %v10969_v28 = vld [vmem:[#allocation2 + $0x38] sm:$0xff]  ;;  %8544 = vmatprep.mubr.msk.f32.mxu0 %vm3706_vm4, %v10962_v40 }
 0x29a   : > { %3768 = vst.msk [vmem:[#allocation2 + $0x61] sm:$0xff] %vm3706_vm4, %v3680_v41  ;;  %v8508_v16 = vpop.f32.mrf.mxu1  ;;  %8597 = vmatprep.mubr.msk.f32.mxu1 %vm3706_vm4, %v10967_v32  ;;  %v3907_v44 = vrot.slane %v10967_v32, 1  ;;  %v3908_v10 = vrot.slane %v10969_v28, 1  ;;  %8545 = vmatmul.mubr.msk.f32.gmra.mxu0 %vm3706_vm4, %v10965_v13 }
 0x29b   : > { %v3683_v12 = vmax.f32 %v3651_v2, 0.0  ;;  %v3650_v45 = vadd.f32 %v10912_v23, %v3611_v48  ;;  %v3614_v59 = vmul.f32 %v8508_v16, %v10907_v55  ;;  %8598 = vmatmul.mubr.msk.f32.gmra.mxu1 %vm3706_vm4, %v10969_v28  ;;  %v10985_v26 = vld [vmem:[#allocation2 + $0x58] sm:$0xff] }
 0x29c   : > { %v3487_v9 = vpop.f32.mrf.mxu1  ;;  %v10988_v37 = vsel %vm463_vm1, %v3907_v44, %v3908_v10  ;;  %v10991_v7 = vsel %vm463_vm1, %v3908_v10, %v3910_v47  ;;  %v3915_v50 = vrot.slane %v10985_v26, 1 }
 0x29d   : > { %3771 = vst.msk [vmem:[#allocation2 + $0x81] sm:$0xff] %vm3706_vm4, %v3683_v12  ;;  %v3682_v30 = vmax.f32 %v3650_v45, 0.0  ;;  %v3653_v25 = vadd.f32 %v10912_v23, %v3614_v59  ;;  %v3613_v52 = vmul.f32 %v10907_v55, %v3487_v9  ;;  %8547 = vmatprep.mubr.msk.f32.mxu0 %vm3706_vm4, %v10988_v37  ;;  %v10998_v43 = vld [vmem:[#allocation2 + $0x48] sm:$0xff]  ;;  %v11000_v46 = vld [vmem:[#allocation2 + $0x50] sm:$0xff] }
 0x29e   : > { %v8511_v53 = vpop.f32.mrf.mxu1  ;;  %8600 = vmatprep.mubr.msk.f32.mxu1 %vm3706_vm4, %v10998_v43  ;;  %v3912_v49 = vrot.slane %v10998_v43, 1  ;;  %v3913_v33 = vrot.slane %v11000_v46, 1  ;;  %8548 = vmatmul.mubr.msk.f32.gmra.mxu0 %vm3706_vm4, %v10991_v7 }
 0x29f   : > { %3770 = vst.msk [vmem:[#allocation2 + $0x79] sm:$0xff] %vm3706_vm4, %v3682_v30  ;;  %v3685_v11 = vmax.f32 %v3653_v25, 0.0  ;;  %v3652_v54 = vadd.f32 %v10912_v23, %v3613_v52  ;;  %v3616_v57 = vmul.f32 %v8511_v53, %v10907_v55  ;;  %8601 = vmatmul.mubr.msk.f32.gmra.mxu1 %vm3706_vm4, %v11000_v46  ;;  %v11014_v63 = vld [vmem:[#allocation2 + $0x70] sm:$0xff] }
 0x2a0   : > { %v3497_v6 = vpop.f32.mrf.mxu1  ;;  %v11017_v29 = vsel %vm463_vm1, %v3912_v49, %v3913_v33  ;;  %v11020_v58 = vsel %vm463_vm1, %v3913_v33, %v3915_v50  ;;  %v3920_v8 = vrot.slane %v11014_v63, 1 }
 0x2a1   : > { %13094 = vst [vmem:[#allocation5_spill] sm:$0xff] %v11020_v58  ;;  %3773 = vst.msk [vmem:[#allocation2 + $0x99] sm:$0xff] %vm3706_vm4, %v3685_v11  ;;  %v3684_v22 = vmax.f32 %v3652_v54, 0.0  ;;  %v3655_v38 = vadd.f32 %v10912_v23, %v3616_v57  ;;  %v3615_v18 = vmul.f32 %v10907_v55, %v3497_v6  ;;  %8550 = vmatprep.mubr.msk.f32.mxu0 %vm3706_vm4, %v11017_v29  ;;  %v11027_v3 = vld [vmem:[#allocation2 + $0x60] sm:$0xff]  ;;  %v11029_v15 = vld [vmem:[#allocation2 + $0x68] sm:$0xff] }
 0x2a2   : > { %v8514_v42 = vpop.f32.mrf.mxu1  ;;  %8603 = vmatprep.mubr.msk.f32.mxu1 %vm3706_vm4, %v11027_v3  ;;  %v3917_v24 = vrot.slane %v11027_v3, 1  ;;  %v3918_v1 = vrot.slane %v11029_v15, 1  ;;  %8551 = vmatmul.mubr.msk.f32.gmra.mxu0 %vm3706_vm4, %v11020_v58 }
 0x2a3   : > { %3772 = vst.msk [vmem:[#allocation2 + $0x91] sm:$0xff] %vm3706_vm4, %v3684_v22  ;;  %v3687_v4 = vmax.f32 %v3655_v38, 0.0  ;;  %v3654_v27 = vadd.f32 %v10912_v23, %v3615_v18  ;;  %v3618_v21 = vmul.f32 %v8514_v42, %v10907_v55  ;;  %8604 = vmatmul.mubr.msk.f32.gmra.mxu1 %vm3706_vm4, %v11029_v15 }
 0x2a4   : > { %v3507_v56 = vpop.f32.mrf.mxu1  ;;  %v11044_v31 = vsel %vm463_vm1, %v3917_v24, %v3918_v1  ;;  %v11047_v62 = vsel %vm463_vm1, %v3918_v1, %v3920_v8  ;;  %v11054_v41 = vld [vmem:[#allocation2 + $0x88] sm:$0xff] }
 0x2a5   : > { %13095 = vst [vmem:[#allocation12_spill] sm:$0xff] %v11044_v31  ;;  %13096 = vst [vmem:[#allocation39_spill] sm:$0xff] %v11047_v62  ;;  %v3686_v51 = vmax.f32 %v3654_v27, 0.0  ;;  %v3657_v5 = vadd.f32 %v10912_v23, %v3618_v21  ;;  %v3617_v39 = vmul.f32 %v10907_v55, %v3507_v56  ;;  %8553 = vmatprep.mubr.msk.f32.mxu0 %vm3706_vm4, %v11044_v31  ;;  %v3925_v59 = vrot.slane %v11054_v41, 1 }
 0x2a6   : > { %3775 = vst.msk [vmem:[#allocation2 + $0xb1] sm:$0xff] %vm3706_vm4, %v3687_v4  ;;  %v8517_v0 = vpop.f32.mrf.mxu1  ;;  %v11056_v2 = vld [vmem:[#allocation2 + $0x78] sm:$0xff]  ;;  %v11058_v48 = vld [vmem:[#allocation2 + $0x80] sm:$0xff]  ;;  %8554 = vmatmul.mubr.msk.f32.gmra.mxu0 %vm3706_vm4, %v11047_v62 }
 0x2a7   : > { %3774 = vst.msk [vmem:[#allocation2 + $0xa9] sm:$0xff] %vm3706_vm4, %v3686_v51  ;;  %v3689_v16 = vmax.f32 %v3657_v5, 0.0  ;;  %v3656_v44 = vadd.f32 %v10912_v23, %v3617_v39  ;;  %v3620_v10 = vmul.f32 %v8517_v0, %v10907_v55  ;;  %8606 = vmatprep.mubr.msk.f32.mxu1 %vm3706_vm4, %v11056_v2  ;;  %v3922_v47 = vrot.slane %v11056_v2, 1 }
 0x2a8   : > { %v3517_v12 = vpop.f32.mrf.mxu1  ;;  %8607 = vmatmul.mubr.msk.f32.gmra.mxu1 %vm3706_vm4, %v11058_v48  ;;  %v3923_v45 = vrot.slane %v11058_v48, 1  ;;  %v11075_v52 = vld [vmem:[#allocation2 + $0xa0] sm:$0xff] }
 0x2a9   : > { %3777 = vst.msk [vmem:[#allocation2 + $0xc9] sm:$0xff] %vm3706_vm4, %v3689_v16  ;;  %v3688_v9 = vmax.f32 %v3656_v44, 0.0  ;;  %v3659_v30 = vadd.f32 %v10912_v23, %v3620_v10  ;;  %v3619_v25 = vmul.f32 %v10907_v55, %v3517_v12  ;;  %v3930_v42 = vrot.slane %v11075_v52, 1 }
 0x2aa   : > { %v8520_v53 = vpop.f32.mrf.mxu1  ;;  %v11078_v49 = vsel %vm463_vm1, %v3922_v47, %v3923_v45  ;;  %v11081_v33 = vsel %vm463_vm1, %v3923_v45, %v3925_v59  ;;  %v11083_v50 = vld [vmem:[#allocation2 + $0x90] sm:$0xff]  ;;  %v11085_v11 = vld [vmem:[#allocation2 + $0x98] sm:$0xff] }
 0x2ab   : > { %13097 = vst [vmem:[#allocation16_spill] sm:$0xff] %v11078_v49  ;;  %13098 = vst [vmem:[#allocation50_spill] sm:$0xff] %v11081_v33  ;;  %v3691_v54 = vmax.f32 %v3659_v30, 0.0  ;;  %v3658_v57 = vadd.f32 %v10912_v23, %v3619_v25  ;;  %v3622_v6 = vmul.f32 %v8520_v53, %v10907_v55  ;;  %8556 = vmatprep.mubr.msk.f32.mxu0 %vm3706_vm4, %v11078_v49  ;;  %8609 = vmatprep.mubr.msk.f32.mxu1 %vm3706_vm4, %v11083_v50 }
 0x2ac   : > { %3776 = vst.msk [vmem:[#allocation2 + $0xc1] sm:$0xff] %vm3706_vm4, %v3688_v9  ;;  %v3927_v22 = vrot.slane %v11083_v50, 1  ;;  %8557 = vmatmul.mubr.msk.f32.gmra.mxu0 %vm3706_vm4, %v11081_v33  ;;  %v3527_v38 = vpop.f32.mrf.mxu1  ;;  %8610 = vmatmul.mubr.msk.f32.gmra.mxu1 %vm3706_vm4, %v11085_v11  ;;  %v3928_v18 = vrot.slane %v11085_v11, 1 }
 0x2ad   : > { %3779 = vst.msk [vmem:[#allocation2 + $0xe1] sm:$0xff] %vm3706_vm4, %v3691_v54  ;;  %v3690_v24 = vmax.f32 %v3658_v57, 0.0  ;;  %v3661_v1 = vadd.f32 %v10912_v23, %v3622_v6  ;;  %v3621_v8 = vmul.f32 %v10907_v55, %v3527_v38  ;;  %v11104_v4 = vld [vmem:[#allocation2 + $0xb8] sm:$0xff] }
 0x2ae   : > { %v8523_v27 = vpop.f32.mrf.mxu1  ;;  %v11107_v21 = vsel %vm463_vm1, %v3927_v22, %v3928_v18  ;;  %v11110_v56 = vsel %vm463_vm1, %v3928_v18, %v3930_v42  ;;  %v11112_v51 = vld [vmem:[#allocation2 + $0xa8] sm:$0xff]  ;;  %v11114_v5 = vld [vmem:[#allocation2 + $0xb0] sm:$0xff]  ;;  %v3935_v12 = vrot.slane %v11104_v4, 1 }
 0x2af   : > { %13099 = vst [vmem:[#allocation41_spill] sm:$0xff] %v11107_v21  ;;  %13100 = vst [vmem:[#allocation7_spill] sm:$0xff] %v11110_v56  ;;  %v3693_v39 = vmax.f32 %v3661_v1, 0.0  ;;  %v3660_v0 = vadd.f32 %v10912_v23, %v3621_v8  ;;  %v3624_v16 = vmul.f32 %v8523_v27, %v10907_v55  ;;  %8559 = vmatprep.mubr.msk.f32.mxu0 %vm3706_vm4, %v11107_v21  ;;  %8612 = vmatprep.mubr.msk.f32.mxu1 %vm3706_vm4, %v11112_v51 }
 0x2b0   : > { %3778 = vst.msk [vmem:[#allocation2 + $0xd9] sm:$0xff] %vm3706_vm4, %v3690_v24  ;;  %v3932_v44 = vrot.slane %v11112_v51, 1  ;;  %8560 = vmatmul.mubr.msk.f32.gmra.mxu0 %vm3706_vm4, %v11110_v56  ;;  %v3537_v10 = vpop.f32.mrf.mxu1  ;;  %8613 = vmatmul.mubr.msk.f32.gmra.mxu1 %vm3706_vm4, %v11114_v5  ;;  %v3933_v47 = vrot.slane %v11114_v5, 1  ;;  %v11133_v30 = vld [vmem:[#allocation2 + $0xd0] sm:$0xff] }
 0x2b1   : > { %3781 = vst.msk [vmem:[#allocation2 + $0xf9] sm:$0xff] %vm3706_vm4, %v3693_v39  ;;  %v3692_v45 = vmax.f32 %v3660_v0, 0.0  ;;  %v3663_v59 = vadd.f32 %v10912_v23, %v3624_v16  ;;  %v3623_v9 = vmul.f32 %v10907_v55, %v3537_v10  ;;  %v3940_v8 = vrot.slane %v11133_v30, 1 }
 0x2b2   : > { %v8526_v25 = vpop.f32.mrf.mxu1  ;;  %v11136_v53 = vsel %vm463_vm1, %v3932_v44, %v3933_v47  ;;  %v11139_v54 = vsel %vm463_vm1, %v3933_v47, %v3935_v12 }
 0x2b3   : > { %13101 = vst [vmem:[#allocation43_spill] sm:$0xff] %v11136_v53  ;;  %13102 = vst [vmem:[#allocation40_spill] sm:$0xff] %v11139_v54  ;;  %v11141_v57 = vld [vmem:[#allocation2 + $0xc0] sm:$0xff]  ;;  %v11143_v6 = vld [vmem:[#allocation2 + $0xc8] sm:$0xff]  ;;  %v3695_v22 = vmax.f32 %v3663_v59, 0.0  ;;  %v3662_v38 = vadd.f32 %v10912_v23, %v3623_v9  ;;  %v3626_v18 = vmul.f32 %v8526_v25, %v10907_v55  ;;  %8562 = vmatprep.mubr.msk.f32.mxu0 %vm3706_vm4, %v11136_v53 }
 0x2b4   : > { %13103 = vst [vmem:[#allocation21_spill] sm:$0xff] %v11143_v6  ;;  %3780 = vst.msk [vmem:[#allocation2 + $0xf1] sm:$0xff] %vm3706_vm4, %v3692_v45  ;;  %8615 = vmatprep.mubr.msk.f32.mxu1 %vm3706_vm4, %v11141_v57  ;;  %v3937_v42 = vrot.slane %v11141_v57, 1  ;;  %8563 = vmatmul.mubr.msk.f32.gmra.mxu0 %vm3706_vm4, %v11139_v54  ;;  %v3547_v24 = vpop.f32.mrf.mxu1  ;;  %v3938_v1 = vrot.slane %v11143_v6, 1  ;;  %v11162_v16 = vld [vmem:[#allocation2 + $0xe8] sm:$0xff] }
 0x2b5   : > { %8616 = vmatmul.mubr.msk.f32.gmra.mxu1 %vm3706_vm4, %v11143_v6  ;;  %3783 = vst.msk [vmem:[#allocation2 + $0x111] sm:$0xff] %vm3706_vm4, %v3695_v22  ;;  %v3694_v27 = vmax.f32 %v3662_v38, 0.0  ;;  %v3665_v39 = vadd.f32 %v10912_v23, %v3626_v18  ;;  %v3625_v0 = vmul.f32 %v10907_v55, %v3547_v24 }
 0x2b6   : > { %v8529_v44 = vpop.f32.mrf.mxu1  ;;  %v11165_v10 = vsel %vm463_vm1, %v3937_v42, %v3938_v1  ;;  %v11168_v47 = vsel %vm463_vm1, %v3938_v1, %v3940_v8  ;;  %v3945_v42 = vrot.slane %v11162_v16, 1 }
 0x2b7   : > { %13104 = vst [vmem:[#allocation49_spill] sm:$0xff] %v11165_v10  ;;  %13105 = vst [vmem:[#allocation14_spill] sm:$0xff] %v11168_v47  ;;  %v11170_v12 = vld [vmem:[#allocation2 + $0xd8] sm:$0xff]  ;;  %v11172_v45 = vld [vmem:[#allocation2 + $0xe0] sm:$0xff]  ;;  %v3697_v59 = vmax.f32 %v3665_v39, 0.0  ;;  %v3664_v9 = vadd.f32 %v10912_v23, %v3625_v0  ;;  %v3628_v25 = vmul.f32 %v8529_v44, %v10907_v55  ;;  %8565 = vmatprep.mubr.msk.f32.mxu0 %vm3706_vm4, %v11165_v10 }
 0x2b8   : > { %13106 = vst [vmem:[#allocation51_spill] sm:$0xff] %v11172_v45  ;;  %3782 = vst.msk [vmem:[#allocation2 + $0x109] sm:$0xff] %vm3706_vm4, %v3694_v27  ;;  %8618 = vmatprep.mubr.msk.f32.mxu1 %vm3706_vm4, %v11170_v12  ;;  %v3942_v22 = vrot.slane %v11170_v12, 1  ;;  %8566 = vmatmul.mubr.msk.f32.gmra.mxu0 %vm3706_vm4, %v11168_v47  ;;  %v3557_v38 = vpop.f32.mrf.mxu1  ;;  %v3943_v18 = vrot.slane %v11172_v45, 1  ;;  %v11191_v27 = vld [vmem:[#allocation2 + $0x100] sm:$0xff] }
 0x2b9   : > { %8619 = vmatmul.mubr.msk.f32.gmra.mxu1 %vm3706_vm4, %v11172_v45  ;;  %3785 = vst.msk [vmem:[#allocation2 + $0x129] sm:$0xff] %vm3706_vm4, %v3697_v59  ;;  %v3696_v24 = vmax.f32 %v3664_v9, 0.0  ;;  %v3667_v1 = vadd.f32 %v10912_v23, %v3628_v25  ;;  %v3627_v8 = vmul.f32 %v10907_v55, %v3557_v38 }
 0x2ba   : > { %v8532_v39 = vpop.f32.mrf.mxu1  ;;  %v11194_v0 = vsel %vm463_vm1, %v3942_v22, %v3943_v18  ;;  %v11197_v44 = vsel %vm463_vm1, %v3943_v18, %v3945_v42  ;;  %v3950_v42 = vrot.slane %v11191_v27, 1 }
 0x2bb   : > { %13107 = vst [vmem:[#allocation52_spill] sm:$0xff] %v11194_v0  ;;  %13108 = vst [vmem:[#allocation9_spill] sm:$0xff] %v11197_v44  ;;  %v11199_v47 = vld [vmem:[#allocation2 + $0xf0] sm:$0xff]  ;;  %v11201_v10 = vld [vmem:[#allocation2 + $0xf8] sm:$0xff]  ;;  %v3699_v59 = vmax.f32 %v3667_v1, 0.0  ;;  %v3666_v9 = vadd.f32 %v10912_v23, %v3627_v8  ;;  %v3630_v25 = vmul.f32 %v8532_v39, %v10907_v55  ;;  %8568 = vmatprep.mubr.msk.f32.mxu0 %vm3706_vm4, %v11194_v0 }
 0x2bc   : > { %13109 = vst [vmem:[#allocation22_spill] sm:$0xff] %v11201_v10  ;;  %3784 = vst.msk [vmem:[#allocation2 + $0x121] sm:$0xff] %vm3706_vm4, %v3696_v24  ;;  %8621 = vmatprep.mubr.msk.f32.mxu1 %vm3706_vm4, %v11199_v47  ;;  %v3947_v22 = vrot.slane %v11199_v47, 1  ;;  %8569 = vmatmul.mubr.msk.f32.gmra.mxu0 %vm3706_vm4, %v11197_v44  ;;  %v3567_v38 = vpop.f32.mrf.mxu1  ;;  %v3948_v18 = vrot.slane %v11201_v10, 1  ;;  %v11220_v39 = vld [vmem:[#allocation2 + $0x118] sm:$0xff] }
 0x2bd   : > { %8622 = vmatmul.mubr.msk.f32.gmra.mxu1 %vm3706_vm4, %v11201_v10  ;;  %3787 = vst.msk [vmem:[#allocation2 + $0x141] sm:$0xff] %vm3706_vm4, %v3699_v59  ;;  %v3698_v24 = vmax.f32 %v3666_v9, 0.0  ;;  %v3669_v1 = vadd.f32 %v10912_v23, %v3630_v25  ;;  %v3629_v8 = vmul.f32 %v10907_v55, %v3567_v38 }
 0x2be   : > { %v8535_v0 = vpop.f32.mrf.mxu1  ;;  %v11223_v44 = vsel %vm463_vm1, %v3947_v22, %v3948_v18  ;;  %v11226_v54 = vsel %vm463_vm1, %v3948_v18, %v3950_v42  ;;  %v3955_v42 = vrot.slane %v11220_v39, 1 }
 0x2bf   : > { %13110 = vst [vmem:[#allocation18_spill] sm:$0xff] %v11223_v44  ;;  %13111 = vst [vmem:[#allocation26_spill] sm:$0xff] %v11226_v54  ;;  %v11228_v53 = vld [vmem:[#allocation2 + $0x108] sm:$0xff]  ;;  %v11230_v56 = vld [vmem:[#allocation2 + $0x110] sm:$0xff]  ;;  %v3701_v59 = vmax.f32 %v3669_v1, 0.0  ;;  %v3668_v9 = vadd.f32 %v10912_v23, %v3629_v8  ;;  %v3632_v25 = vmul.f32 %v8535_v0, %v10907_v55  ;;  %8571 = vmatprep.mubr.msk.f32.mxu0 %vm3706_vm4, %v11223_v44 }
 0x2c0   : > { %13112 = vst [vmem:[#allocation42_spill] sm:$0xff] %v11230_v56  ;;  %3786 = vst.msk [vmem:[#allocation2 + $0x139] sm:$0xff] %vm3706_vm4, %v3698_v24  ;;  %8624 = vmatprep.mubr.msk.f32.mxu1 %vm3706_vm4, %v11228_v53  ;;  %v3952_v22 = vrot.slane %v11228_v53, 1  ;;  %8572 = vmatmul.mubr.msk.f32.gmra.mxu0 %vm3706_vm4, %v11226_v54  ;;  %v3577_v38 = vpop.f32.mrf.mxu1  ;;  %v3953_v18 = vrot.slane %v11230_v56, 1  ;;  %v11249_v8 = vld [vmem:[#allocation2 + $0x130] sm:$0xff] }
 0x2c1   : > { %8625 = vmatmul.mubr.msk.f32.gmra.mxu1 %vm3706_vm4, %v11230_v56  ;;  %3789 = vst.msk [vmem:[#allocation2 + $0x159] sm:$0xff] %vm3706_vm4, %v3701_v59  ;;  %v3700_v0 = vmax.f32 %v3668_v9, 0.0  ;;  %v3671_v24 = vadd.f32 %v10912_v23, %v3632_v25  ;;  %v3631_v1 = vmul.f32 %v10907_v55, %v3577_v38 }
 0x2c2   : > { %v8538_v44 = vpop.f32.mrf.mxu1  ;;  %v11252_v54 = vsel %vm463_vm1, %v3952_v22, %v3953_v18  ;;  %v11255_v21 = vsel %vm463_vm1, %v3953_v18, %v3955_v42  ;;  %v3960_v42 = vrot.slane %v11249_v8, 1 }
 0x2c3   : > { %13113 = vst [vmem:[#allocation53_spill] sm:$0xff] %v11252_v54  ;;  %13114 = vst [vmem:[#allocation54_spill] sm:$0xff] %v11255_v21  ;;  %v11257_v33 = vld [vmem:[#allocation2 + $0x120] sm:$0xff]  ;;  %v11259_v49 = vld [vmem:[#allocation2 + $0x128] sm:$0xff]  ;;  %v3703_v59 = vmax.f32 %v3671_v24, 0.0  ;;  %v3670_v9 = vadd.f32 %v10912_v23, %v3631_v1  ;;  %v3634_v25 = vmul.f32 %v8538_v44, %v10907_v55  ;;  %8574 = vmatprep.mubr.msk.f32.mxu0 %vm3706_vm4, %v11252_v54 }
 0x2c4   : > { %13115 = vst [vmem:[#allocation17_spill] sm:$0xff] %v11259_v49  ;;  %3788 = vst.msk [vmem:[#allocation2 + $0x151] sm:$0xff] %vm3706_vm4, %v3700_v0  ;;  %8627 = vmatprep.mubr.msk.f32.mxu1 %vm3706_vm4, %v11257_v33  ;;  %v3957_v22 = vrot.slane %v11257_v33, 1  ;;  %8575 = vmatmul.mubr.msk.f32.gmra.mxu0 %vm3706_vm4, %v11255_v21  ;;  %v3587_v38 = vpop.f32.mrf.mxu1  ;;  %v3958_v18 = vrot.slane %v11259_v49, 1  ;;  %v11275_v44 = vld [vmem:[#allocation2 + $0x148] sm:$0xff] }
 0x2c5   : > { %8628 = vmatmul.mubr.msk.f32.gmra.mxu1 %vm3706_vm4, %v11259_v49  ;;  %3791 = vst.msk [vmem:[#allocation2 + $0x171] sm:$0xff] %vm3706_vm4, %v3703_v59  ;;  %v3702_v0 = vmax.f32 %v3670_v9, 0.0  ;;  %v3673_v24 = vadd.f32 %v10912_v23, %v3634_v25  ;;  %v3633_v1 = vmul.f32 %v10907_v55, %v3587_v38  ;;  %v3965_v58 = vrot.slane %v11275_v44, 1 }
 0x2c6   : > { %v11281_v54 = vsel %vm463_vm1, %v3957_v22, %v3958_v18  ;;  %v11284_v21 = vsel %vm463_vm1, %v3958_v18, %v3960_v42 }
 0x2c7   : > { %13116 = vst [vmem:[#allocation11_spill] sm:$0xff] %v11284_v21  ;;  %v11286_v62 = vld [vmem:[#allocation2 + $0x138] sm:$0xff]  ;;  %v11288_v31 = vld [vmem:[#allocation2 + $0x140] sm:$0xff]  ;;  %3790 = vst.msk [vmem:[#allocation2 + $0x169] sm:$0xff] %vm3706_vm4, %v3702_v0  ;;  %v3705_v59 = vmax.f32 %v3673_v24, 0.0  ;;  %v3672_v9 = vadd.f32 %v10912_v23, %v3633_v1  ;;  %8577 = vmatprep.mubr.msk.f32.mxu0 %vm3706_vm4, %v11281_v54 }
 0x2c8   : > { %13117 = vst [vmem:[#allocation27_spill] sm:$0xff] %v11288_v31  ;;  %8630 = vmatprep.mubr.msk.f32.mxu1 %vm3706_vm4, %v11286_v62  ;;  %v3962_v55 = vrot.slane %v11286_v62, 1  ;;  %v3963_v25 = vrot.slane %v11288_v31, 1  ;;  %8578 = vmatmul.mubr.msk.f32.gmra.mxu0 %vm3706_vm4, %v11284_v21  ;;  %v11303_v22 = vld [vmem:[#allocation2 + $0x160] sm:$0xff] }
 0x2c9   : > { %8631 = vmatmul.mubr.msk.f32.gmra.mxu1 %vm3706_vm4, %v11288_v31  ;;  %3793 = vst.msk [vmem:[#allocation2 + $0x189] sm:$0xff] %vm3706_vm4, %v3705_v59  ;;  %v3704_v23 = vmax.f32 %v3672_v9, 0.0  ;;  %v3970_v59 = vrot.slane %v11303_v22, 1 }
 0x2ca   : > { %v11307_v38 = vsel %vm463_vm1, %v3962_v55, %v3963_v25  ;;  %v11310_v18 = vsel %vm463_vm1, %v3963_v25, %v3965_v58  ;;  %v4557_v25 = vrot.slane %v10872_v60, 2 }
 0x2cb   : > { %13118 = vst [vmem:[#allocation23_spill] sm:$0xff] %v11307_v38  ;;  %13119 = vst [vmem:[#allocation30_spill] sm:$0xff] %v11310_v18  ;;  %8580 = vmatprep.mubr.msk.f32.mxu0 %vm3706_vm4, %v11307_v38  ;;  %v11314_v42 = vld [vmem:[#allocation2 + $0x150] sm:$0xff]  ;;  %v11316_v0 = vld [vmem:[#allocation2 + $0x158] sm:$0xff] }
 0x2cc   : > { %13120 = vst [vmem:[#allocation55_spill] sm:$0xff] %v11314_v42  ;;  %13121 = vst [vmem:[#allocation25_spill] sm:$0xff] %v11316_v0  ;;  %8633 = vmatprep.mubr.msk.f32.mxu1 %vm3706_vm4, %v11314_v42  ;;  %v3967_v24 = vrot.slane %v11314_v42, 1  ;;  %v3968_v1 = vrot.slane %v11316_v0, 1  ;;  %8581 = vmatmul.mubr.msk.f32.gmra.mxu0 %vm3706_vm4, %v11310_v18  ;;  %v11328_v58 = vld [vmem:[#allocation2 + $0x178] sm:$0xff]  ;;  %v4558_v18 = vrot.slane %v10874_v19, 2 }
 0x2cd   : > { %3792 = vst.msk [vmem:[#allocation2 + $0x181] sm:$0xff] %vm3706_vm4, %v3704_v23  ;;  %8634 = vmatmul.mubr.msk.f32.gmra.mxu1 %vm3706_vm4, %v11316_v0 }
 0x2ce   : > { %v11331_v9 = vsel %vm463_vm1, %v3967_v24, %v3968_v1  ;;  %v11334_v55 = vsel %vm463_vm1, %v3968_v1, %v3970_v59  ;;  %v11339_v23 = vld [vmem:[#allocation2 + $0x168] sm:$0xff]  ;;  %v11341_v38 = vld [vmem:[#allocation2 + $0x170] sm:$0xff]  ;;  %v3975_v1 = vrot.slane %v11328_v58, 1  ;;  %v4560_v59 = vrot.slane %v10883_v35, 2 }
 0x2cf   : > { %13122 = vst [vmem:[#allocation13_spill] sm:$0xff] %v11331_v9  ;;  %13123 = vst [vmem:[#allocation31_spill] sm:$0xff] %v11334_v55  ;;  %8583 = vmatprep.mubr.msk.f32.mxu0 %vm3706_vm4, %v11331_v9  ;;  %8636 = vmatprep.mubr.msk.f32.mxu1 %vm3706_vm4, %v11339_v23  ;;  %v3972_v24 = vrot.slane %v11339_v23, 1  ;;  %v3973_v21 = vrot.slane %v11341_v38, 1  ;;  %v4559_v9 = vsel %vm1132_vm3, %v4557_v25, %v4558_v18  ;;  %v8543_v25 = vpop.f32.mrf.mxu0 }
 0x2d0   : > { %8584 = vmatmul.mubr.msk.f32.gmra.mxu0 %vm3706_vm4, %v11334_v55  ;;  %v4562_v55 = vrot.slane %v10942_v20, 2  ;;  %v4561_v35 = vsel %vm1132_vm3, %v4558_v18, %v4560_v59  ;;  %v4567_v18 = vrot.slane %v10967_v32, 2 }
 0x2d1   : > { %8637 = vmatmul.mubr.msk.f32.gmra.mxu1 %vm3706_vm4, %v11341_v38  ;;  %v11356_v60 = vsel %vm463_vm1, %v3972_v24, %v3973_v21  ;;  %v11359_v19 = vsel %vm463_vm1, %v3973_v21, %v3975_v1  ;;  %v4563_v24 = vrot.slane %v10944_v14, 2  ;;  %v11374_v21 = vld [vmem:[%s12694_s7 + $0x38] sm:$0xff] }
 0x2d2   : > { %8691 = vmatprep.mubr.msk.f32.mxu1 %vm3706_vm4, %v10942_v20  ;;  %13124 = vst [vmem:[#allocation15_spill] sm:$0xff] %v11359_v19  ;;  %8586 = vmatprep.mubr.msk.f32.mxu0 %vm3706_vm4, %v11356_v60  ;;  %v8593_v20 = vpop.f32.mrf.mxu1 }
 0x2d3   : > { %v11381_v1 = vadd.f32 %v8593_v20, %v8543_v25  ;;  %v4578_v20 = vrot.slane %v11029_v15, 2 }
 0x2d4   : > { %8587 = vmatmul.mubr.msk.f32.gmra.mxu0 %vm3706_vm4, %v11359_v19  ;;  %v11391_v19 = vsel %vm1132_vm3, %v4562_v55, %v4563_v24 }
 0x2d5   : > { %8692 = vmatmul.mubr.msk.f32.vlgmr.msra.gmra.mxu1 %vm3706_vm4, %v10944_v14  ;;  %8641 = vmatprep.mubr.msk.f32.mxu0 %vm3706_vm4, %v4559_v9  ;;  %13125 = vst [vmem:[#allocation56_spill] sm:$0xff] %v11381_v1  ;;  %v11386_v14 = vld [vmem:[%s12694_s7 + $0x30] sm:$0xff]  ;;  %v4565_v9 = vrot.slane %v10940_v17, 2  ;;  %v4573_v17 = vrot.slane %v11000_v46, 2  ;;  %v4598_v1 = vrot.slane %v11143_v6, 2 }
 0x2d6   : > { %8694 = vmatprep.mubr.msk.f32.mxu1 %vm3706_vm4, %v10967_v32  ;;  %8790 = vmatpush3.msra.mxu1 %v10931_v36  ;;  %v4568_v36 = vrot.slane %v10969_v28, 2 }
 0x2d7   : > { %8889 = vmatprep.subr.mxu1 %v11374_v21  ;;  %v11405_v55 = vsel %vm1132_vm3, %v4563_v24, %v4565_v9  ;;  %v4583_v9 = vrot.slane %v11058_v48, 2 }
 0x2d8   : > { %8642 = vmatmul.mubr.msk.f32.vlgmr.msra.gmra.mxu0 %vm3706_vm4, %v4561_v35  ;;  %v11410_v32 = vsel %vm1132_vm3, %v4567_v18, %v4568_v36  ;;  %v4577_v35 = vrot.slane %v11027_v3, 2 }
 0x2d9   : > { %8695 = vmatmul.mubr.msk.f32.gmra.mxu1 %vm3706_vm4, %v10969_v28  ;;  %8740 = vmatpush3.msra.mxu0 %v10901_v34  ;;  %v4572_v34 = vrot.slane %v10998_v43, 2  ;;  %v4570_v28 = vrot.slane %v10956_v61, 2  ;;  %v4575_v61 = vrot.slane %v10985_v26, 2  ;;  %v4580_v26 = vrot.slane %v11014_v63, 2 }
 0x2da   : > { %8644 = vmatprep.mubr.msk.f32.mxu0 %vm3706_vm4, %v11391_v19  ;;  %8697 = vmatprep.mubr.msk.f32.mxu1 %vm3706_vm4, %v10998_v43  ;;  %v11444_v18 = vsel %vm1132_vm3, %v4577_v35, %v4578_v20  ;;  %v4588_v35 = vrot.slane %v11085_v11, 2  ;;  %v4585_v63 = vrot.slane %v11054_v41, 2  ;;  %v4590_v41 = vrot.slane %v11075_v52, 2 }
 0x2db   : > { %8839 = vmatprep.subr.mxu0 %v11386_v14  ;;  %v11422_v59 = vsel %vm1132_vm3, %v4568_v36, %v4570_v28  ;;  %v11427_v24 = vsel %vm1132_vm3, %v4572_v34, %v4573_v17  ;;  %v11439_v25 = vsel %vm1132_vm3, %v4573_v17, %v4575_v61  ;;  %v4582_v36 = vrot.slane %v11056_v2, 2 }
 0x2dc   : > { %8645 = vmatmul.mubr.msk.f32.gmra.mxu0 %vm3706_vm4, %v11405_v55  ;;  %v11456_v34 = vsel %vm1132_vm3, %v4578_v20, %v4580_v26  ;;  %v4587_v28 = vrot.slane %v11083_v50, 2  ;;  %v11473_v20 = vsel %vm1132_vm3, %v4583_v9, %v4585_v63  ;;  %v4593_v26 = vrot.slane %v11114_v5, 2 }
 0x2dd   : > { %8698 = vmatmul.mubr.msk.f32.gmra.mxu1 %vm3706_vm4, %v11000_v46  ;;  %8647 = vmatprep.mubr.msk.f32.mxu0 %vm3706_vm4, %v11410_v32  ;;  %v11461_v17 = vsel %vm1132_vm3, %v4582_v36, %v4583_v9  ;;  %13127 = vst [vmem:[#allocation3_spill] sm:$0xff] %v11473_v20  ;;  %v4592_v36 = vrot.slane %v11112_v51, 2  ;;  %v11490_v9 = vsel %vm1132_vm3, %v4588_v35, %v4590_v41  ;;  %v4597_v63 = vrot.slane %v11141_v57, 2 }
 0x2de   : > { %8700 = vmatprep.mubr.msk.f32.mxu1 %vm3706_vm4, %v11027_v3  ;;  %13126 = vst [vmem:[#allocation20_spill] sm:$0xff] %v11461_v17  ;;  %v11478_v61 = vsel %vm1132_vm3, %v4587_v28, %v4588_v35  ;;  %13129 = vst [vmem:[#allocation57_spill] sm:$0xff] %v11490_v9  ;;  %v4595_v52 = vrot.slane %v11104_v4, 2  ;;  %v4602_v41 = vrot.slane %v11170_v12, 2  ;;  %v4600_v4 = vrot.slane %v11133_v30, 2 }
 0x2df   : > { %13128 = vst [vmem:[#allocation28_spill] sm:$0xff] %v11478_v61  ;;  %v11495_v28 = vsel %vm1132_vm3, %v4592_v36, %v4593_v26  ;;  %v11512_v36 = vsel %vm1132_vm3, %v4597_v63, %v4598_v1  ;;  %v4605_v30 = vrot.slane %v11162_v16, 2 }
 0x2e0   : > { %8648 = vmatmul.mubr.msk.f32.gmra.mxu0 %vm3706_vm4, %v11422_v59  ;;  %13130 = vst [vmem:[#allocation58_spill] sm:$0xff] %v11495_v28  ;;  %v11507_v35 = vsel %vm1132_vm3, %v4593_v26, %v4595_v52  ;;  %13132 = vst [vmem:[#allocation35_spill] sm:$0xff] %v11512_v36  ;;  %v11524_v26 = vsel %vm1132_vm3, %v4598_v1, %v4600_v4  ;;  %v4607_v52 = vrot.slane %v11199_v47, 2  ;;  %v4612_v4 = vrot.slane %v11228_v53, 2 }
 0x2e1   : > { %8701 = vmatmul.mubr.msk.f32.gmra.mxu1 %vm3706_vm4, %v11029_v15  ;;  %8650 = vmatprep.mubr.msk.f32.mxu0 %vm3706_vm4, %v11427_v24  ;;  %13131 = vst [vmem:[#allocation33_spill] sm:$0xff] %v11507_v35  ;;  %13133 = vst [vmem:[#allocation29_spill] sm:$0xff] %v11524_v26 }
 0x2e2   : > { %8703 = vmatprep.mubr.msk.f32.mxu1 %vm3706_vm4, %v11056_v2 }
 0x2e4   : > { %8651 = vmatmul.mubr.msk.f32.gmra.mxu0 %vm3706_vm4, %v11439_v25 }
 0x2e5   : > { %8704 = vmatmul.mubr.msk.f32.gmra.mxu1 %vm3706_vm4, %v11058_v48  ;;  %8653 = vmatprep.mubr.msk.f32.mxu0 %vm3706_vm4, %v11444_v18 }
 0x2e6   : > { %8706 = vmatprep.mubr.msk.f32.mxu1 %vm3706_vm4, %v11083_v50 }
 0x2e8   : > { %8654 = vmatmul.mubr.msk.f32.gmra.mxu0 %vm3706_vm4, %v11456_v34 }
 0x2e9   : > { %8707 = vmatmul.mubr.msk.f32.gmra.mxu1 %vm3706_vm4, %v11085_v11  ;;  %8656 = vmatprep.mubr.msk.f32.mxu0 %vm3706_vm4, %v11461_v17 }
 0x2ea   : > { %8709 = vmatprep.mubr.msk.f32.mxu1 %vm3706_vm4, %v11112_v51 }
 0x2ec   : > { %8657 = vmatmul.mubr.msk.f32.gmra.mxu0 %vm3706_vm4, %v11473_v20 }
 0x2ed   : > { %8710 = vmatmul.mubr.msk.f32.gmra.mxu1 %vm3706_vm4, %v11114_v5  ;;  %8659 = vmatprep.mubr.msk.f32.mxu0 %vm3706_vm4, %v11478_v61 }
 0x2ee   : > { %8712 = vmatprep.mubr.msk.f32.mxu1 %vm3706_vm4, %v11141_v57 }
 0x2f0   : > { %8660 = vmatmul.mubr.msk.f32.gmra.mxu0 %vm3706_vm4, %v11490_v9 }
 0x2f1   : > { %8713 = vmatmul.mubr.msk.f32.gmra.mxu1 %vm3706_vm4, %v11143_v6  ;;  %8662 = vmatprep.mubr.msk.f32.mxu0 %vm3706_vm4, %v11495_v28  ;;  %v4603_v6 = vrot.slane %v11172_v45, 2 }
 0x2f2   : > { %8715 = vmatprep.mubr.msk.f32.mxu1 %vm3706_vm4, %v11170_v12 }
 0x2f3   : > { %v11529_v63 = vsel %vm1132_vm3, %v4602_v41, %v4603_v6  ;;  %v11541_v1 = vsel %vm1132_vm3, %v4603_v6, %v4605_v30  ;;  %v4610_v6 = vrot.slane %v11191_v27, 2  ;;  %v4617_v30 = vrot.slane %v11257_v33, 2 }
 0x2f4   : > { %8663 = vmatmul.mubr.msk.f32.gmra.mxu0 %vm3706_vm4, %v11507_v35  ;;  %13134 = vst [vmem:[#allocation60_spill] sm:$0xff] %v11529_v63  ;;  %13135 = vst [vmem:[#allocation32_spill] sm:$0xff] %v11541_v1 }
 0x2f5   : > { %8716 = vmatmul.mubr.msk.f32.gmra.mxu1 %vm3706_vm4, %v11172_v45  ;;  %8665 = vmatprep.mubr.msk.f32.mxu0 %vm3706_vm4, %v11512_v36  ;;  %v4608_v45 = vrot.slane %v11201_v10, 2 }
 0x2f6   : > { %8718 = vmatprep.mubr.msk.f32.mxu1 %vm3706_vm4, %v11199_v47 }
 0x2f7   : > { %v11546_v41 = vsel %vm1132_vm3, %v4607_v52, %v4608_v45  ;;  %v11558_v16 = vsel %vm1132_vm3, %v4608_v45, %v4610_v6  ;;  %v4615_v45 = vrot.slane %v11220_v39, 2  ;;  %v4622_v6 = vrot.slane %v11286_v62, 2 }
 0x2f8   : > { %8666 = vmatmul.mubr.msk.f32.gmra.mxu0 %vm3706_vm4, %v11524_v26  ;;  %13136 = vst [vmem:[#allocation19_spill] sm:$0xff] %v11546_v41  ;;  %13137 = vst [vmem:[#allocation34_spill] sm:$0xff] %v11558_v16 }
 0x2f9   : > { %8719 = vmatmul.mubr.msk.f32.gmra.mxu1 %vm3706_vm4, %v11201_v10  ;;  %8668 = vmatprep.mubr.msk.f32.mxu0 %vm3706_vm4, %v11529_v63  ;;  %v4613_v10 = vrot.slane %v11230_v56, 2 }
 0x2fa   : > { %8721 = vmatprep.mubr.msk.f32.mxu1 %vm3706_vm4, %v11228_v53 }
 0x2fb   : > { %v11563_v52 = vsel %vm1132_vm3, %v4612_v4, %v4613_v10  ;;  %v11575_v27 = vsel %vm1132_vm3, %v4613_v10, %v4615_v45  ;;  %v4620_v10 = vrot.slane %v11249_v8, 2  ;;  %v4627_v45 = vrot.slane %v11314_v42, 2 }
 0x2fc   : > { %8669 = vmatmul.mubr.msk.f32.gmra.mxu0 %vm3706_vm4, %v11541_v1  ;;  %13138 = vst [vmem:[#allocation59_spill] sm:$0xff] %v11563_v52  ;;  %13139 = vst [vmem:[#allocation36_spill] sm:$0xff] %v11575_v27 }
 0x2fd   : > { %8722 = vmatmul.mubr.msk.f32.gmra.mxu1 %vm3706_vm4, %v11230_v56  ;;  %8671 = vmatprep.mubr.msk.f32.mxu0 %vm3706_vm4, %v11546_v41  ;;  %v4618_v56 = vrot.slane %v11259_v49, 2 }
 0x2fe   : > { %8724 = vmatprep.mubr.msk.f32.mxu1 %vm3706_vm4, %v11257_v33 }
 0x2ff   : > { %v11580_v4 = vsel %vm1132_vm3, %v4617_v30, %v4618_v56  ;;  %v11592_v39 = vsel %vm1132_vm3, %v4618_v56, %v4620_v10  ;;  %v4625_v56 = vrot.slane %v11275_v44, 2  ;;  %v11618_v10 = vld [vmem:[#allocation2 + $0x180] sm:$0xff] }
 0x300   : > { %8672 = vmatmul.mubr.msk.f32.gmra.mxu0 %vm3706_vm4, %v11558_v16  ;;  %13140 = vst [vmem:[#allocation6_spill] sm:$0xff] %v11580_v4  ;;  %13141 = vst [vmem:[#allocation61_spill] sm:$0xff] %v11592_v39 }
 0x301   : > { %8725 = vmatmul.mubr.msk.f32.gmra.mxu1 %vm3706_vm4, %v11259_v49  ;;  %8674 = vmatprep.mubr.msk.f32.mxu0 %vm3706_vm4, %v11563_v52  ;;  %v4623_v49 = vrot.slane %v11288_v31, 2 }
 0x302   : > { %8727 = vmatprep.mubr.msk.f32.mxu1 %vm3706_vm4, %v11286_v62 }
 0x303   : > { %v11597_v30 = vsel %vm1132_vm3, %v4622_v6, %v4623_v49  ;;  %v11609_v8 = vsel %vm1132_vm3, %v4623_v49, %v4625_v56  ;;  %v4630_v49 = vrot.slane %v11303_v22, 2 }
 0x304   : > { %8675 = vmatmul.mubr.msk.f32.gmra.mxu0 %vm3706_vm4, %v11575_v27  ;;  %13142 = vst [vmem:[#allocation62_spill] sm:$0xff] %v11597_v30  ;;  %13143 = vst [vmem:[#allocation38_spill] sm:$0xff] %v11609_v8 }
 0x305   : > { %8728 = vmatmul.mubr.msk.f32.gmra.mxu1 %vm3706_vm4, %v11288_v31  ;;  %8677 = vmatprep.mubr.msk.f32.mxu0 %vm3706_vm4, %v11580_v4  ;;  %v4628_v31 = vrot.slane %v11316_v0, 2 }
 0x306   : > { %8730 = vmatprep.mubr.msk.f32.mxu1 %vm3706_vm4, %v11314_v42  ;;  %v4633_v42 = vrot.slane %v11341_v38, 2 }
 0x307   : > { %v11614_v6 = vsel %vm1132_vm3, %v4627_v45, %v4628_v31  ;;  %v11628_v44 = vsel %vm1132_vm3, %v4628_v31, %v4630_v49  ;;  %v11630_v45 = vld [vmem:[#allocation2 + $0x188] sm:$0xff]  ;;  %v4635_v31 = vrot.slane %v11328_v58, 2  ;;  %v13151_v58 = vld [vmem:[#allocation16_spill] sm:$0xff] }
 0x308   : > { %8678 = vmatmul.mubr.msk.f32.gmra.mxu0 %vm3706_vm4, %v11592_v39  ;;  %13144 = vst [vmem:[#allocation10_spill] sm:$0xff] %v11614_v6  ;;  %13145 = vst [vmem:[#allocation24_spill] sm:$0xff] %v11628_v44  ;;  %v13156_v49 = vld [vmem:[#allocation40_spill] sm:$0xff] }
 0x309   : > { %8731 = vmatmul.mubr.msk.f32.gmra.mxu1 %vm3706_vm4, %v11316_v0  ;;  %8680 = vmatprep.mubr.msk.f32.mxu0 %vm3706_vm4, %v11597_v30  ;;  %v4632_v0 = vrot.slane %v11339_v23, 2  ;;  %v11645_v22 = vsel %vm1132_vm3, %v4633_v42, %v4635_v31  ;;  %v13157_v31 = vld [vmem:[#allocation49_spill] sm:$0xff] }
 0x30a   : > { %8733 = vmatprep.mubr.msk.f32.mxu1 %vm3706_vm4, %v11339_v23  ;;  %13147 = vst [vmem:[#allocation4_spill] sm:$0xff] %v11645_v22 }
 0x30b   : > { %v11635_v56 = vsel %vm1132_vm3, %v4632_v0, %v4633_v42  ;;  %v11659_v0 = vld [vmem:[%s12694_s7 + $0x40] sm:$0xff]  ;;  %v13150_v42 = vld [vmem:[#allocation39_spill] sm:$0xff] }
 0x30c   : > { %8681 = vmatmul.mubr.msk.f32.gmra.mxu0 %vm3706_vm4, %v11609_v8  ;;  %13146 = vst [vmem:[#allocation44_spill] sm:$0xff] %v11635_v56 }
 0x30d   : > { %8734 = vmatmul.mubr.msk.f32.gmra.mxu1 %vm3706_vm4, %v11341_v38  ;;  %8683 = vmatprep.mubr.msk.f32.mxu0 %vm3706_vm4, %v11614_v6 }
 0x30e   : > { %8736 = vmatprep.mubr.msk.f32.mxu1 %vm3706_vm4, %v11618_v10 }
 0x310   : > { %8684 = vmatmul.mubr.msk.f32.gmra.mxu0 %vm3706_vm4, %v11628_v44 }
 0x311   : > { %8737 = vmatmul.mubr.msk.f32.gmra.mxu1 %vm3706_vm4, %v11630_v45  ;;  %8686 = vmatprep.mubr.msk.f32.mxu0 %vm3706_vm4, %v11635_v56 }
 0x312   : > { %8791 = vmatprep.mubr.msk.f32.mxu1 %vm3706_vm4, %v11391_v19  ;;  %v13152_v19 = vld [vmem:[#allocation50_spill] sm:$0xff] }
 0x314   : > { %8687 = vmatmul.mubr.msk.f32.gmra.mxu0 %vm3706_vm4, %v11645_v22 }
 0x315   : > { %8792 = vmatmul.mubr.msk.f32.vlgmr.msra.gmra.mxu1 %vm3706_vm4, %v11405_v55  ;;  %8741 = vmatprep.mubr.msk.f32.mxu0 %vm3706_vm4, %v10962_v40  ;;  %v13148_v40 = vld [vmem:[#allocation5_spill] sm:$0xff]  ;;  %v13155_v55 = vld [vmem:[#allocation43_spill] sm:$0xff] }
 0x316   : > { %8794 = vmatprep.mubr.msk.f32.mxu1 %vm3706_vm4, %v11410_v32  ;;  %8890 = vmatpush3.msra.mxu1 %v11374_v21  ;;  %v13153_v21 = vld [vmem:[#allocation41_spill] sm:$0xff] }
 0x318   : > { %8742 = vmatmul.mubr.msk.f32.vlgmr.msra.gmra.mxu0 %vm3706_vm4, %v10965_v13  ;;  %v13149_v13 = vld [vmem:[#allocation12_spill] sm:$0xff] }
 0x319   : > { %8795 = vmatmul.mubr.msk.f32.gmra.mxu1 %vm3706_vm4, %v11422_v59  ;;  %8840 = vmatpush3.msra.mxu0 %v11386_v14  ;;  %v13154_v14 = vld [vmem:[#allocation7_spill] sm:$0xff] }
 0x31a   : > { %8744 = vmatprep.mubr.msk.f32.mxu0 %vm3706_vm4, %v10988_v37  ;;  %8797 = vmatprep.mubr.msk.f32.mxu1 %vm3706_vm4, %v11427_v24 }
 0x31b   : > { %8939 = vmatprep.subr.mxu0 %v11659_v0 }
 0x31c   : > { %8745 = vmatmul.mubr.msk.f32.gmra.mxu0 %vm3706_vm4, %v10991_v7 }
 0x31d   : > { %8798 = vmatmul.mubr.msk.f32.gmra.mxu1 %vm3706_vm4, %v11439_v25  ;;  %8747 = vmatprep.mubr.msk.f32.mxu0 %vm3706_vm4, %v11017_v29 }
 0x31e   : > { %8800 = vmatprep.mubr.msk.f32.mxu1 %vm3706_vm4, %v11444_v18 }
 0x320   : > { %8748 = vmatmul.mubr.msk.f32.gmra.mxu0 %vm3706_vm4, %v13148_v40 }
 0x321   : > { %8801 = vmatmul.mubr.msk.f32.gmra.mxu1 %vm3706_vm4, %v11456_v34  ;;  %8750 = vmatprep.mubr.msk.f32.mxu0 %vm3706_vm4, %v13149_v13 }
 0x322   : > { %8803 = vmatprep.mubr.msk.f32.mxu1 %vm3706_vm4, %v11461_v17  ;;  %v13171_v17 = vld [vmem:[#allocation15_spill] sm:$0xff] }
 0x324   : > { %8751 = vmatmul.mubr.msk.f32.gmra.mxu0 %vm3706_vm4, %v13150_v42 }
 0x325   : > { %8804 = vmatmul.mubr.msk.f32.gmra.mxu1 %vm3706_vm4, %v11473_v20  ;;  %8753 = vmatprep.mubr.msk.f32.mxu0 %vm3706_vm4, %v13151_v58 }
 0x326   : > { %8806 = vmatprep.mubr.msk.f32.mxu1 %vm3706_vm4, %v11478_v61 }
 0x328   : > { %8754 = vmatmul.mubr.msk.f32.gmra.mxu0 %vm3706_vm4, %v13152_v19 }
 0x329   : > { %8807 = vmatmul.mubr.msk.f32.gmra.mxu1 %vm3706_vm4, %v11490_v9  ;;  %8756 = vmatprep.mubr.msk.f32.mxu0 %vm3706_vm4, %v13153_v21  ;;  %v5226_v9 = vrot.slane %v11618_v10, 1 }
 0x32a   : > { %8809 = vmatprep.mubr.msk.f32.mxu1 %vm3706_vm4, %v11495_v28  ;;  %v13158_v28 = vld [vmem:[#allocation14_spill] sm:$0xff] }
 0x32c   : > { %8757 = vmatmul.mubr.msk.f32.gmra.mxu0 %vm3706_vm4, %v13154_v14 }
 0x32d   : > { %8810 = vmatmul.mubr.msk.f32.gmra.mxu1 %vm3706_vm4, %v11507_v35  ;;  %8759 = vmatprep.mubr.msk.f32.mxu0 %vm3706_vm4, %v13155_v55  ;;  %v13159_v35 = vld [vmem:[#allocation52_spill] sm:$0xff] }
 0x32e   : > { %8812 = vmatprep.mubr.msk.f32.mxu1 %vm3706_vm4, %v11512_v36  ;;  %v13160_v36 = vld [vmem:[#allocation9_spill] sm:$0xff] }
 0x330   : > { %8760 = vmatmul.mubr.msk.f32.gmra.mxu0 %vm3706_vm4, %v13156_v49 }
 0x331   : > { %8813 = vmatmul.mubr.msk.f32.gmra.mxu1 %vm3706_vm4, %v11524_v26  ;;  %8762 = vmatprep.mubr.msk.f32.mxu0 %vm3706_vm4, %v13157_v31  ;;  %v13161_v26 = vld [vmem:[#allocation18_spill] sm:$0xff] }
 0x332   : > { %8815 = vmatprep.mubr.msk.f32.mxu1 %vm3706_vm4, %v11529_v63  ;;  %v13162_v63 = vld [vmem:[#allocation26_spill] sm:$0xff] }
 0x334   : > { %8763 = vmatmul.mubr.msk.f32.gmra.mxu0 %vm3706_vm4, %v13158_v28 }
 0x335   : > { %8816 = vmatmul.mubr.msk.f32.gmra.mxu1 %vm3706_vm4, %v11541_v1  ;;  %8765 = vmatprep.mubr.msk.f32.mxu0 %vm3706_vm4, %v13159_v35  ;;  %v13163_v1 = vld [vmem:[#allocation53_spill] sm:$0xff] }
 0x336   : > { %8818 = vmatprep.mubr.msk.f32.mxu1 %vm3706_vm4, %v11546_v41  ;;  %v13164_v41 = vld [vmem:[#allocation54_spill] sm:$0xff] }
 0x338   : > { %8766 = vmatmul.mubr.msk.f32.gmra.mxu0 %vm3706_vm4, %v13160_v36 }
 0x339   : > { %8819 = vmatmul.mubr.msk.f32.gmra.mxu1 %vm3706_vm4, %v11558_v16  ;;  %8768 = vmatprep.mubr.msk.f32.mxu0 %vm3706_vm4, %v13161_v26  ;;  %v13168_v16 = vld [vmem:[#allocation13_spill] sm:$0xff] }
 0x33a   : > { %8821 = vmatprep.mubr.msk.f32.mxu1 %vm3706_vm4, %v11563_v52  ;;  %v13165_v52 = vld [vmem:[#allocation11_spill] sm:$0xff] }
 0x33c   : > { %8769 = vmatmul.mubr.msk.f32.gmra.mxu0 %vm3706_vm4, %v13162_v63 }
 0x33d   : > { %8822 = vmatmul.mubr.msk.f32.gmra.mxu1 %vm3706_vm4, %v11575_v27  ;;  %8771 = vmatprep.mubr.msk.f32.mxu0 %vm3706_vm4, %v13163_v1  ;;  %v13166_v27 = vld [vmem:[#allocation23_spill] sm:$0xff] }
 0x33e   : > { %8824 = vmatprep.mubr.msk.f32.mxu1 %vm3706_vm4, %v11580_v4  ;;  %v13167_v4 = vld [vmem:[#allocation30_spill] sm:$0xff] }
 0x340   : > { %8772 = vmatmul.mubr.msk.f32.gmra.mxu0 %vm3706_vm4, %v13164_v41 }
 0x341   : > { %8825 = vmatmul.mubr.msk.f32.gmra.mxu1 %vm3706_vm4, %v11592_v39  ;;  %8774 = vmatprep.mubr.msk.f32.mxu0 %vm3706_vm4, %v11281_v54  ;;  %v5494_v39 = vrot.slane %v11618_v10, 2 }
 0x342   : > { %8827 = vmatprep.mubr.msk.f32.mxu1 %vm3706_vm4, %v11597_v30  ;;  %v5495_v30 = vrot.slane %v11630_v45, 2 }
 0x344   : > { %8775 = vmatmul.mubr.msk.f32.gmra.mxu0 %vm3706_vm4, %v13165_v52  ;;  %v11775_v61 = vsel %vm1132_vm3, %v5494_v39, %v5495_v30 }
 0x345   : > { %8828 = vmatmul.mubr.msk.f32.gmra.mxu1 %vm3706_vm4, %v11609_v8  ;;  %8777 = vmatprep.mubr.msk.f32.mxu0 %vm3706_vm4, %v13166_v27  ;;  %v3844_v8 = vld [vmem:[#allocation2 + $0x190] sm:$0xff]  ;;  %13170 = vst [vmem:[#allocation63_spill] sm:$0xff] %v11775_v61 }
 0x346   : > { %8830 = vmatprep.mubr.msk.f32.mxu1 %vm3706_vm4, %v11614_v6  ;;  %v13169_v6 = vld [vmem:[#allocation31_spill] sm:$0xff]  ;;  %v5229_v39 = vrot.slane %v3844_v8, 1 }
 0x348   : > { %8778 = vmatmul.mubr.msk.f32.gmra.mxu0 %vm3706_vm4, %v13167_v4 }
 0x349   : > { %8831 = vmatmul.mubr.msk.f32.gmra.mxu1 %vm3706_vm4, %v11628_v44  ;;  %8780 = vmatprep.mubr.msk.f32.mxu0 %vm3706_vm4, %v13168_v16  ;;  %v5227_v44 = vrot.slane %v11630_v45, 1 }
 0x34a   : > { %8833 = vmatprep.mubr.msk.f32.mxu1 %vm3706_vm4, %v11635_v56  ;;  %v5497_v56 = vrot.slane %v3844_v8, 2  ;;  %v11811_v8 = vpop.f32.mrf.mxu0 }
 0x34c   : > { %8781 = vmatmul.mubr.msk.f32.gmra.mxu0 %vm3706_vm4, %v13169_v6  ;;  %v11783_v20 = vsel %vm1132_vm3, %v5495_v30, %v5497_v56  ;;  %v11799_v30 = vpop.f32.mrf.mxu1 }
 0x34d   : > { %8834 = vmatmul.mubr.msk.f32.gmra.mxu1 %vm3706_vm4, %v11645_v22  ;;  %8783 = vmatprep.mubr.msk.f32.mxu0 %vm3706_vm4, %v11356_v60  ;;  %v11788_v22 = vsel %vm463_vm1, %v5226_v9, %v5227_v44  ;;  %v9001_v9 = vld [vmem:[#allocation2 + $0x30] sm:$0xff] }
 0x34e   : > { %8836 = vmatprep.mubr.msk.f32.mxu1 %vm3706_vm4, %v11775_v61  ;;  %v11797_v61 = vsel %vm463_vm1, %v5227_v44, %v5229_v39 }
 0x350   : > { %8784 = vmatmul.mubr.msk.f32.gmra.mxu0 %vm3706_vm4, %v13171_v17 }
 0x351   : > { %8837 = vmatmul.mubr.msk.f32.gmra.mxu1 %vm3706_vm4, %v11783_v20  ;;  %8786 = vmatprep.mubr.msk.f32.mxu0 %vm3706_vm4, %v11788_v22 }
 0x352   : > { %8891 = vmatprep.mubr.msk.f32.mxu1 %vm3706_vm4, %v10988_v37  ;;  %v9002_v37 = vld [vmem:[#allocation2 + $0x38] sm:$0xff] }
 0x354   : > { %8787 = vmatmul.mubr.msk.f32.gmra.mxu0 %vm3706_vm4, %v11797_v61 }
 0x355   : > { %8892 = vmatmul.mubr.msk.f32.vlgmr.msra.gmra.mxu1 %vm3706_vm4, %v10991_v7  ;;  %8841 = vmatprep.mubr.msk.f32.mxu0 %vm3706_vm4, %v9001_v9 }
 0x356   : > { %8894 = vmatprep.mubr.msk.f32.mxu1 %vm3706_vm4, %v11017_v29 }
 0x357   : > { %v8596_v56 = vpop.f32.mrf.mxu1 }
 0x358   : > { %8842 = vmatmul.mubr.msk.f32.vlgmr.msra.gmra.mxu0 %vm3706_vm4, %v9002_v37 }
 0x359   : > { %8895 = vmatmul.mubr.msk.f32.gmra.mxu1 %vm3706_vm4, %v13148_v40  ;;  %8940 = vmatpush3.msra.mxu0 %v11659_v0  ;;  %v4408_v7 = vpop.f32.mrf.mxu1 }
 0x35a   : > { %8844 = vmatprep.mubr.msk.f32.mxu0 %vm3706_vm4, %v10998_v43  ;;  %8897 = vmatprep.mubr.msk.f32.mxu1 %vm3706_vm4, %v13149_v13  ;;  %v8546_v44 = vpop.f32.mrf.mxu0 }
 0x35b   : > { %v8599_v29 = vpop.f32.mrf.mxu1  ;;  %v11818_v39 = vadd.f32 %v8596_v56, %v8546_v44 }
 0x35c   : > { %8845 = vmatmul.mubr.msk.f32.gmra.mxu0 %vm3706_vm4, %v11000_v46  ;;  %v4119_v0 = vpop.f32.mrf.mxu0 }
 0x35d   : > { %8898 = vmatmul.mubr.msk.f32.gmra.mxu1 %vm3706_vm4, %v13150_v42  ;;  %8847 = vmatprep.mubr.msk.f32.mxu0 %vm3706_vm4, %v11027_v3  ;;  %v4418_v43 = vpop.f32.mrf.mxu1  ;;  %v11828_v40 = vadd.f32 %v4408_v7, %v4119_v0 }
 0x35e   : > { %8900 = vmatprep.mubr.msk.f32.mxu1 %vm3706_vm4, %v13151_v58  ;;  %v8549_v13 = vpop.f32.mrf.mxu0 }
 0x35f   : > { %v8602_v9 = vpop.f32.mrf.mxu1  ;;  %v11830_v56 = vadd.f32 %v8599_v29, %v8549_v13  ;;  %v13172_v13 = vld [vmem:[#allocation21_spill] sm:$0xff] }
 0x360   : > { %8848 = vmatmul.mubr.msk.f32.gmra.mxu0 %vm3706_vm4, %v11029_v15  ;;  %v4129_v46 = vpop.f32.mrf.mxu0 }
 0x361   : > { %8901 = vmatmul.mubr.msk.f32.gmra.mxu1 %vm3706_vm4, %v13152_v19  ;;  %8850 = vmatprep.mubr.msk.f32.mxu0 %vm3706_vm4, %v11056_v2  ;;  %v4428_v3 = vpop.f32.mrf.mxu1  ;;  %v11840_v42 = vadd.f32 %v4418_v43, %v4129_v46 }
 0x362   : > { %8903 = vmatprep.mubr.msk.f32.mxu1 %vm3706_vm4, %v13153_v21  ;;  %v8552_v58 = vpop.f32.mrf.mxu0 }
 0x363   : > { %v8605_v37 = vpop.f32.mrf.mxu1  ;;  %v11842_v7 = vadd.f32 %v8602_v9, %v8552_v58 }
 0x364   : > { %8851 = vmatmul.mubr.msk.f32.gmra.mxu0 %vm3706_vm4, %v11058_v48  ;;  %v4139_v15 = vpop.f32.mrf.mxu0 }
 0x365   : > { %8904 = vmatmul.mubr.msk.f32.gmra.mxu1 %vm3706_vm4, %v13154_v14  ;;  %8853 = vmatprep.mubr.msk.f32.mxu0 %vm3706_vm4, %v11083_v50  ;;  %v4438_v2 = vpop.f32.mrf.mxu1  ;;  %v11852_v19 = vadd.f32 %v4428_v3, %v4139_v15  ;;  %v13173_v3 = vld [vmem:[#allocation51_spill] sm:$0xff] }
 0x366   : > { %8906 = vmatprep.mubr.msk.f32.mxu1 %vm3706_vm4, %v13155_v55  ;;  %v8555_v21 = vpop.f32.mrf.mxu0 }
 0x367   : > { %v11854_v44 = vadd.f32 %v8605_v37, %v8555_v21 }
 0x368   : > { %8854 = vmatmul.mubr.msk.f32.gmra.mxu0 %vm3706_vm4, %v11085_v11  ;;  %v8608_v48 = vpop.f32.mrf.mxu1  ;;  %v4149_v50 = vpop.f32.mrf.mxu0 }
 0x369   : > { %8907 = vmatmul.mubr.msk.f32.gmra.mxu1 %vm3706_vm4, %v13156_v49  ;;  %8856 = vmatprep.mubr.msk.f32.mxu0 %vm3706_vm4, %v11112_v51  ;;  %v11864_v14 = vadd.f32 %v4438_v2, %v4149_v50  ;;  %v13174_v2 = vld [vmem:[#allocation22_spill] sm:$0xff] }
 0x36a   : > { %8909 = vmatprep.mubr.msk.f32.mxu1 %vm3706_vm4, %v13157_v31  ;;  %v4448_v55 = vpop.f32.mrf.mxu1 }
 0x36c   : > { %v8558_v29 = vpop.f32.mrf.mxu0  ;;  %8857 = vmatmul.mubr.msk.f32.gmra.mxu0 %vm3706_vm4, %v11114_v5  ;;  %v8611_v0 = vpop.f32.mrf.mxu1 }
 0x36d   : > { %8910 = vmatmul.mubr.msk.f32.gmra.mxu1 %vm3706_vm4, %v13158_v28  ;;  %v11870_v11 = vadd.f32 %v8608_v48, %v8558_v29  ;;  %8859 = vmatprep.mubr.msk.f32.mxu0 %vm3706_vm4, %v11141_v57 }
 0x36e   : > { %8912 = vmatprep.mubr.msk.f32.mxu1 %vm3706_vm4, %v13159_v35  ;;  %v4159_v51 = vpop.f32.mrf.mxu0  ;;  %v4458_v49 = vpop.f32.mrf.mxu1 }
 0x36f   : > { %v11876_v31 = vadd.f32 %v4448_v55, %v4159_v51  ;;  %v13175_v55 = vld [vmem:[#allocation42_spill] sm:$0xff] }
 0x370   : > { %v8561_v43 = vpop.f32.mrf.mxu0  ;;  %8860 = vmatmul.mubr.msk.f32.gmra.mxu0 %vm3706_vm4, %v13172_v13  ;;  %v8614_v5 = vpop.f32.mrf.mxu1 }
 0x371   : > { %8913 = vmatmul.mubr.msk.f32.gmra.mxu1 %vm3706_vm4, %v13160_v36  ;;  %v11882_v28 = vadd.f32 %v8611_v0, %v8561_v43  ;;  %8862 = vmatprep.mubr.msk.f32.mxu0 %vm3706_vm4, %v11170_v12 }
 0x372   : > { %8915 = vmatprep.mubr.msk.f32.mxu1 %vm3706_vm4, %v13161_v26  ;;  %v4169_v57 = vpop.f32.mrf.mxu0  ;;  %v4468_v35 = vpop.f32.mrf.mxu1 }
 0x373   : > { %v11888_v9 = vadd.f32 %v4458_v49, %v4169_v57  ;;  %v13176_v49 = vld [vmem:[#allocation17_spill] sm:$0xff] }
 0x374   : > { %v8564_v46 = vpop.f32.mrf.mxu0  ;;  %8863 = vmatmul.mubr.msk.f32.gmra.mxu0 %vm3706_vm4, %v13173_v3  ;;  %v11940_v57 = vld [vmem:[#allocation2 + $0x1a0] sm:$0xff]  ;;  %v13178_v3 = vld [vmem:[#allocation55_spill] sm:$0xff] }
 0x375   : > { %v8617_v58 = vpop.f32.mrf.mxu1  ;;  %8916 = vmatmul.mubr.msk.f32.gmra.mxu1 %vm3706_vm4, %v13162_v63  ;;  %v11894_v36 = vadd.f32 %v8614_v5, %v8564_v46  ;;  %8865 = vmatprep.mubr.msk.f32.mxu0 %vm3706_vm4, %v11199_v47  ;;  %v11938_v5 = vld [vmem:[#allocation2 + $0x198] sm:$0xff]  ;;  %v13177_v46 = vld [vmem:[#allocation27_spill] sm:$0xff] }
 0x376   : > { %8918 = vmatprep.mubr.msk.f32.mxu1 %vm3706_vm4, %v13163_v1  ;;  %v4179_v12 = vpop.f32.mrf.mxu0 }
 0x377   : > { %v4478_v26 = vpop.f32.mrf.mxu1  ;;  %v11900_v37 = vadd.f32 %v4468_v35, %v4179_v12  ;;  %v6028_v12 = vrot.slane %v11938_v5, 1 }
 0x378   : > { %v8567_v15 = vpop.f32.mrf.mxu0  ;;  %8866 = vmatmul.mubr.msk.f32.gmra.mxu0 %vm3706_vm4, %v13174_v2 }
 0x379   : > { %v8620_v21 = vpop.f32.mrf.mxu1  ;;  %8919 = vmatmul.mubr.msk.f32.gmra.mxu1 %vm3706_vm4, %v13164_v41  ;;  %v11906_v63 = vadd.f32 %v8617_v58, %v8567_v15  ;;  %8868 = vmatprep.mubr.msk.f32.mxu0 %vm3706_vm4, %v11228_v53  ;;  %v11954_v15 = vld [vmem:[#allocation2 + $0x1a8] sm:$0xff] }
 0x37a   : > { %8921 = vmatprep.mubr.msk.f32.mxu1 %vm3706_vm4, %v11281_v54  ;;  %v4189_v47 = vpop.f32.mrf.mxu0 }
 0x37b   : > { %v4488_v1 = vpop.f32.mrf.mxu1  ;;  %v11912_v48 = vadd.f32 %v4478_v26, %v4189_v47  ;;  %v6029_v26 = vrot.slane %v11940_v57, 1 }
 0x37c   : > { %v8570_v50 = vpop.f32.mrf.mxu0  ;;  %8869 = vmatmul.mubr.msk.f32.gmra.mxu0 %vm3706_vm4, %v13175_v55 }
 0x37d   : > { %v8623_v29 = vpop.f32.mrf.mxu1  ;;  %8922 = vmatmul.mubr.msk.f32.gmra.mxu1 %vm3706_vm4, %v13165_v52  ;;  %v11918_v41 = vadd.f32 %v8620_v21, %v8570_v50  ;;  %8871 = vmatprep.mubr.msk.f32.mxu0 %vm3706_vm4, %v11257_v33 }
 0x37e   : > { %8924 = vmatprep.mubr.msk.f32.mxu1 %vm3706_vm4, %v13166_v27  ;;  %v4199_v53 = vpop.f32.mrf.mxu0 }
 0x37f   : > { %v4498_v54 = vpop.f32.mrf.mxu1  ;;  %v11924_v0 = vadd.f32 %v4488_v1, %v4199_v53 }
 0x380   : > { %v8573_v51 = vpop.f32.mrf.mxu0  ;;  %8872 = vmatmul.mubr.msk.f32.gmra.mxu0 %vm3706_vm4, %v13176_v49 }
 0x381   : > { %v8626_v43 = vpop.f32.mrf.mxu1  ;;  %8925 = vmatmul.mubr.msk.f32.gmra.mxu1 %vm3706_vm4, %v13167_v4  ;;  %v11930_v52 = vadd.f32 %v8623_v29, %v8573_v51  ;;  %8874 = vmatprep.mubr.msk.f32.mxu0 %vm3706_vm4, %v11286_v62  ;;  %v6030_v29 = vsel %vm463_vm1, %v6028_v12, %v6029_v26 }
 0x382   : > { %8927 = vmatprep.mubr.msk.f32.mxu1 %vm3706_vm4, %v13168_v16  ;;  %v4209_v33 = vpop.f32.mrf.mxu0 }
 0x383   : > { %v4508_v27 = vpop.f32.mrf.mxu1  ;;  %v11936_v13 = vadd.f32 %v4498_v54, %v4209_v33 }
 0x384   : > { %v8576_v35 = vpop.f32.mrf.mxu0  ;;  %8875 = vmatmul.mubr.msk.f32.gmra.mxu0 %vm3706_vm4, %v13177_v46 }
 0x385   : > { %v8629_v4 = vpop.f32.mrf.mxu1  ;;  %8928 = vmatmul.mubr.msk.f32.gmra.mxu1 %vm3706_vm4, %v13169_v6  ;;  %v11946_v62 = vadd.f32 %v8626_v43, %v8576_v35  ;;  %8877 = vmatprep.mubr.msk.f32.mxu0 %vm3706_vm4, %v13178_v3  ;;  %v13179_v6 = vld [vmem:[#allocation25_spill] sm:$0xff] }
 0x386   : > { %8930 = vmatprep.mubr.msk.f32.mxu1 %vm3706_vm4, %v11356_v60  ;;  %v4219_v16 = vpop.f32.mrf.mxu0  ;;  %v6031_v60 = vrot.slane %v11954_v15, 1 }
 0x387   : > { %v4518_v58 = vpop.f32.mrf.mxu1  ;;  %v11956_v2 = vadd.f32 %v4508_v27, %v4219_v16 }
 0x388   : > { %v8579_v21 = vpop.f32.mrf.mxu0  ;;  %8878 = vmatmul.mubr.msk.f32.gmra.mxu0 %vm3706_vm4, %v13179_v6  ;;  %v13180_v6 = vld [vmem:[#allocation56_spill] sm:$0xff] }
 0x389   : > { %v8632_v47 = vpop.f32.mrf.mxu1  ;;  %8931 = vmatmul.mubr.msk.f32.gmra.mxu1 %vm3706_vm4, %v13171_v17  ;;  %v11962_v1 = vadd.f32 %v8629_v4, %v8579_v21  ;;  %8880 = vmatprep.mubr.msk.f32.mxu0 %vm3706_vm4, %v11339_v23  ;;  %v4399_v21 = vadd.f32 %v11799_v30, %v11811_v8 }
 0x38a   : > { %8933 = vmatprep.mubr.msk.f32.mxu1 %vm3706_vm4, %v11788_v22  ;;  %v4229_v50 = vpop.f32.mrf.mxu0  ;;  %v6032_v22 = vsel %vm463_vm1, %v6029_v26, %v6031_v60 }
 0x38b   : > { %v4528_v55 = vpop.f32.mrf.mxu1  ;;  %v11970_v53 = vadd.f32 %v4518_v58, %v4229_v50 }
 0x38c   : > { %v8582_v54 = vpop.f32.mrf.mxu0  ;;  %8881 = vmatmul.mubr.msk.f32.gmra.mxu0 %vm3706_vm4, %v11341_v38 }
 0x38d   : > { %v8635_v17 = vpop.f32.mrf.mxu1  ;;  %8934 = vmatmul.mubr.msk.f32.gmra.mxu1 %vm3706_vm4, %v11797_v61  ;;  %v11976_v23 = vadd.f32 %v8632_v47, %v8582_v54  ;;  %8883 = vmatprep.mubr.msk.f32.mxu0 %vm3706_vm4, %v11618_v10 }
 0x38e   : > { %8936 = vmatprep.mubr.msk.f32.mxu1 %vm3706_vm4, %v6030_v29  ;;  %v4239_v51 = vpop.f32.mrf.mxu0 }
 0x38f   : > { %v4538_v49 = vpop.f32.mrf.mxu1  ;;  %v11982_v43 = vadd.f32 %v4528_v55, %v4239_v51 }
 0x390   : > { %v8585_v33 = vpop.f32.mrf.mxu0  ;;  %8884 = vmatmul.mubr.msk.f32.gmra.mxu0 %vm3706_vm4, %v11630_v45 }
 0x391   : > { %v8638_v38 = vpop.f32.mrf.mxu1  ;;  %8937 = vmatmul.mubr.msk.f32.gmra.mxu1 %vm3706_vm4, %v6032_v22  ;;  %v11987_v61 = vadd.f32 %v8635_v17, %v8585_v33  ;;  %8886 = vmatprep.mubr.msk.f32.mxu0 %vm3706_vm4, %v11938_v5  ;;  %v13181_v33 = vld [vmem:[#allocation20_spill] sm:$0xff] }
 0x392   : > { %v4249_v10 = vpop.f32.mrf.mxu0 }
 0x393   : > { %v4548_v27 = vpop.f32.mrf.mxu1  ;;  %v11991_v35 = vadd.f32 %v4538_v49, %v4249_v10 }
 0x394   : > { %v8588_v46 = vpop.f32.mrf.mxu0  ;;  %8887 = vmatmul.mubr.msk.f32.gmra.mxu0 %vm3706_vm4, %v11940_v57 }
 0x395   : > { %v8693_v4 = vpop.f32.mrf.mxu1  ;;  %v11995_v3 = vadd.f32 %v8638_v38, %v8588_v46  ;;  %8941 = vmatprep.mubr.msk.f32.mxu0 %vm3706_vm4, %v11410_v32  ;;  %v13182_v46 = vld [vmem:[#allocation3_spill] sm:$0xff] }
 0x396   : > { %v4259_v45 = vpop.f32.mrf.mxu0 }
 0x397   : > { %v5034_v16 = vpop.f32.mrf.mxu1  ;;  %v11999_v58 = vadd.f32 %v4548_v27, %v4259_v45  ;;  %v13183_v45 = vld [vmem:[#allocation28_spill] sm:$0xff] }
 0x398   : > { %v8643_v12 = vpop.f32.mrf.mxu0  ;;  %8942 = vmatmul.mubr.msk.f32.vlgmr.msra.gmra.mxu0 %vm3706_vm4, %v11422_v59 }
 0x399   : > { %v8696_v26 = vpop.f32.mrf.mxu1  ;;  %v4929_v47 = vadd.f32 %v8643_v12, %v13180_v6  ;;  %8944 = vmatprep.mubr.msk.f32.mxu0 %vm3706_vm4, %v11427_v24  ;;  %v13184_v6 = vld [vmem:[#allocation57_spill] sm:$0xff] }
 0x39a   : > { %v4769_v60 = vpop.f32.mrf.mxu0 }
 0x39b   : > { %v5044_v50 = vpop.f32.mrf.mxu1  ;;  %v4928_v32 = vadd.f32 %v4769_v60, %v4399_v21  ;;  %v12008_v55 = vadd.f32 %v8693_v4, %v4929_v47 }
 0x39c   : > { %v8646_v29 = vpop.f32.mrf.mxu0  ;;  %8945 = vmatmul.mubr.msk.f32.gmra.mxu0 %vm3706_vm4, %v11439_v25 }
 0x39d   : > { %v8699_v54 = vpop.f32.mrf.mxu1  ;;  %v4931_v59 = vadd.f32 %v8646_v29, %v11818_v39  ;;  %8947 = vmatprep.mubr.msk.f32.mxu0 %vm3706_vm4, %v11444_v18  ;;  %v12015_v30 = vadd.f32 %v5034_v16, %v4928_v32 }
 0x39e   : > { %v4779_v8 = vpop.f32.mrf.mxu0 }
 0x39f   : > { %v5054_v17 = vpop.f32.mrf.mxu1  ;;  %v4930_v24 = vadd.f32 %v4779_v8, %v11828_v40  ;;  %v12018_v22 = vadd.f32 %v8696_v26, %v4931_v59  ;;  %v13186_v8 = vld [vmem:[#allocation33_spill] sm:$0xff] }
 0x3a0   : > { %v8649_v51 = vpop.f32.mrf.mxu0  ;;  %8948 = vmatmul.mubr.msk.f32.gmra.mxu0 %vm3706_vm4, %v11456_v34 }
 0x3a1   : > { %v8702_v49 = vpop.f32.mrf.mxu1  ;;  %v4933_v25 = vadd.f32 %v8649_v51, %v11830_v56  ;;  %8950 = vmatprep.mubr.msk.f32.mxu0 %vm3706_vm4, %v13181_v33  ;;  %v12025_v39 = vadd.f32 %v5044_v50, %v4930_v24  ;;  %v13185_v50 = vld [vmem:[#allocation58_spill] sm:$0xff]  ;;  %v13187_v51 = vld [vmem:[#allocation35_spill] sm:$0xff] }
 0x3a2   : > { %v4789_v18 = vpop.f32.mrf.mxu0 }
 0x3a3   : > { %v5064_v38 = vpop.f32.mrf.mxu1  ;;  %v4932_v10 = vadd.f32 %v4789_v18, %v11840_v42  ;;  %v12028_v27 = vadd.f32 %v8699_v54, %v4933_v25 }
 0x3a4   : > { %v8652_v40 = vpop.f32.mrf.mxu0  ;;  %8951 = vmatmul.mubr.msk.f32.gmra.mxu0 %vm3706_vm4, %v13182_v46  ;;  %v13189_v46 = vld [vmem:[#allocation60_spill] sm:$0xff] }
 0x3a5   : > { %v8705_v4 = vpop.f32.mrf.mxu1  ;;  %v4935_v34 = vadd.f32 %v8652_v40, %v11842_v7  ;;  %8953 = vmatprep.mubr.msk.f32.mxu0 %vm3706_vm4, %v13183_v45  ;;  %v12035_v56 = vadd.f32 %v5054_v17, %v4932_v10 }
 0x3a6   : > { %v4799_v16 = vpop.f32.mrf.mxu0 }
 0x3a7   : > { %v5074_v12 = vpop.f32.mrf.mxu1  ;;  %v4934_v26 = vadd.f32 %v4799_v16, %v11852_v19  ;;  %v12038_v21 = vadd.f32 %v8702_v49, %v4935_v34 }
 0x3a8   : > { %v8655_v42 = vpop.f32.mrf.mxu0  ;;  %8954 = vmatmul.mubr.msk.f32.gmra.mxu0 %vm3706_vm4, %v13184_v6  ;;  %v13191_v6 = vld [vmem:[#allocation19_spill] sm:$0xff] }
 0x3a9   : > { %v8708_v47 = vpop.f32.mrf.mxu1  ;;  %v4937_v60 = vadd.f32 %v8655_v42, %v11854_v44  ;;  %8956 = vmatprep.mubr.msk.f32.mxu0 %vm3706_vm4, %v13185_v50  ;;  %v12045_v7 = vadd.f32 %v5064_v38, %v4934_v26  ;;  %v13188_v38 = vld [vmem:[#allocation29_spill] sm:$0xff] }
 0x3aa   : > { %v4809_v32 = vpop.f32.mrf.mxu0 }
 0x3ab   : > { %v5084_v29 = vpop.f32.mrf.mxu1  ;;  %v4936_v54 = vadd.f32 %v4809_v32, %v11864_v14  ;;  %v12048_v59 = vadd.f32 %v8705_v4, %v4937_v60 }
 0x3ac   : > { %v8658_v19 = vpop.f32.mrf.mxu0  ;;  %8957 = vmatmul.mubr.msk.f32.gmra.mxu0 %vm3706_vm4, %v13186_v8  ;;  %v13193_v8 = vld [vmem:[#allocation59_spill] sm:$0xff] }
 0x3ad   : > { %v8711_v17 = vpop.f32.mrf.mxu1  ;;  %v4939_v24 = vadd.f32 %v8658_v19, %v11870_v11  ;;  %8959 = vmatprep.mubr.msk.f32.mxu0 %vm3706_vm4, %v13187_v51  ;;  %v12055_v44 = vadd.f32 %v5074_v12, %v4936_v54  ;;  %v13190_v12 = vld [vmem:[#allocation32_spill] sm:$0xff] }
 0x3ae   : > { %v4819_v49 = vpop.f32.mrf.mxu0 }
 0x3af   : > { %v5094_v25 = vpop.f32.mrf.mxu1  ;;  %v4938_v33 = vadd.f32 %v4819_v49, %v11876_v31  ;;  %v12058_v18 = vadd.f32 %v8708_v47, %v4939_v24 }
 0x3b0   : > { %v8661_v14 = vpop.f32.mrf.mxu0  ;;  %8960 = vmatmul.mubr.msk.f32.gmra.mxu0 %vm3706_vm4, %v13188_v38  ;;  %v13195_v38 = vld [vmem:[#allocation6_spill] sm:$0xff] }
 0x3b1   : > { %v8714_v10 = vpop.f32.mrf.mxu1  ;;  %v4941_v40 = vadd.f32 %v8661_v14, %v11882_v28  ;;  %8962 = vmatprep.mubr.msk.f32.mxu0 %vm3706_vm4, %v13189_v46  ;;  %v12065_v11 = vadd.f32 %v5084_v29, %v4938_v33  ;;  %v13192_v29 = vld [vmem:[#allocation34_spill] sm:$0xff] }
 0x3b2   : > { %v4829_v4 = vpop.f32.mrf.mxu0 }
 0x3b3   : > { %v5104_v34 = vpop.f32.mrf.mxu1  ;;  %v4940_v45 = vadd.f32 %v4829_v4, %v11888_v9  ;;  %v12068_v16 = vadd.f32 %v8711_v17, %v4941_v40 }
 0x3b4   : > { %v8664_v31 = vpop.f32.mrf.mxu0  ;;  %8963 = vmatmul.mubr.msk.f32.gmra.mxu0 %vm3706_vm4, %v13190_v12  ;;  %v13197_v12 = vld [vmem:[#allocation62_spill] sm:$0xff] }
 0x3b5   : > { %v8717_v26 = vpop.f32.mrf.mxu1  ;;  %v4943_v42 = vadd.f32 %v8664_v31, %v11894_v36  ;;  %8965 = vmatprep.mubr.msk.f32.mxu0 %vm3706_vm4, %v13191_v6  ;;  %v12075_v28 = vadd.f32 %v5094_v25, %v4940_v45  ;;  %v13194_v25 = vld [vmem:[#allocation36_spill] sm:$0xff] }
 0x3b6   : > { %v4839_v47 = vpop.f32.mrf.mxu0 }
 0x3b7   : > { %v5114_v60 = vpop.f32.mrf.mxu1  ;;  %v4942_v50 = vadd.f32 %v4839_v47, %v11900_v37  ;;  %v12078_v32 = vadd.f32 %v8714_v10, %v4943_v42 }
 0x3b8   : > { %v8667_v9 = vpop.f32.mrf.mxu0  ;;  %8966 = vmatmul.mubr.msk.f32.gmra.mxu0 %vm3706_vm4, %v13192_v29  ;;  %v13199_v29 = vld [vmem:[#allocation10_spill] sm:$0xff] }
 0x3b9   : > { %v8720_v54 = vpop.f32.mrf.mxu1  ;;  %v4945_v19 = vadd.f32 %v8667_v9, %v11906_v63  ;;  %8968 = vmatprep.mubr.msk.f32.mxu0 %vm3706_vm4, %v13193_v8  ;;  %v12085_v36 = vadd.f32 %v5104_v34, %v4942_v50  ;;  %v13196_v34 = vld [vmem:[#allocation61_spill] sm:$0xff] }
 0x3ba   : > { %v4849_v17 = vpop.f32.mrf.mxu0 }
 0x3bb   : > { %v5124_v24 = vpop.f32.mrf.mxu1  ;;  %v4944_v51 = vadd.f32 %v4849_v17, %v11912_v48  ;;  %v12088_v49 = vadd.f32 %v8717_v26, %v4945_v19 }
 0x3bc   : > { %v8670_v37 = vpop.f32.mrf.mxu0  ;;  %8969 = vmatmul.mubr.msk.f32.gmra.mxu0 %vm3706_vm4, %v13194_v25  ;;  %v13201_v25 = vld [vmem:[#allocation44_spill] sm:$0xff] }
 0x3bd   : > { %v8723_v33 = vpop.f32.mrf.mxu1  ;;  %v4947_v14 = vadd.f32 %v8670_v37, %v11918_v41  ;;  %8971 = vmatprep.mubr.msk.f32.mxu0 %vm3706_vm4, %v13195_v38  ;;  %v12095_v63 = vadd.f32 %v5114_v60, %v4944_v51  ;;  %v13198_v60 = vld [vmem:[#allocation38_spill] sm:$0xff] }
 0x3be   : > { %v4859_v10 = vpop.f32.mrf.mxu0 }
 0x3bf   : > { %v5134_v40 = vpop.f32.mrf.mxu1  ;;  %v4946_v46 = vadd.f32 %v4859_v10, %v11924_v0  ;;  %v12098_v4 = vadd.f32 %v8720_v54, %v4947_v14 }
 0x3c0   : > { %v8673_v48 = vpop.f32.mrf.mxu0  ;;  %8972 = vmatmul.mubr.msk.f32.gmra.mxu0 %vm3706_vm4, %v13196_v34 }
 0x3c1   : > { %v8726_v45 = vpop.f32.mrf.mxu1  ;;  %v4949_v31 = vadd.f32 %v8673_v48, %v11930_v52  ;;  %8974 = vmatprep.mubr.msk.f32.mxu0 %vm3706_vm4, %v13197_v12  ;;  %v12105_v41 = vadd.f32 %v5124_v24, %v4946_v46  ;;  %v13200_v24 = vld [vmem:[#allocation24_spill] sm:$0xff] }
 0x3c2   : > { %v4869_v26 = vpop.f32.mrf.mxu0  ;;  %v13202_v48 = vld [vmem:[#allocation4_spill] sm:$0xff] }
 0x3c3   : > { %v5144_v42 = vpop.f32.mrf.mxu1  ;;  %v4948_v6 = vadd.f32 %v4869_v26, %v11936_v13  ;;  %v12108_v47 = vadd.f32 %v8723_v33, %v4949_v31  ;;  %v6296_v33 = vrot.slane %v11938_v5, 2  ;;  %v6299_v5 = vrot.slane %v11954_v15, 2 }
 0x3c4   : > { %v8676_v0 = vpop.f32.mrf.mxu0  ;;  %8975 = vmatmul.mubr.msk.f32.gmra.mxu0 %vm3706_vm4, %v13198_v60 }
 0x3c5   : > { %v8729_v50 = vpop.f32.mrf.mxu1  ;;  %v4951_v9 = vadd.f32 %v8676_v0, %v11946_v62  ;;  %8977 = vmatprep.mubr.msk.f32.mxu0 %vm3706_vm4, %v13199_v29  ;;  %v12115_v52 = vadd.f32 %v5134_v40, %v4948_v6 }
 0x3c6   : > { %v4879_v54 = vpop.f32.mrf.mxu0 }
 0x3c7   : > { %v5154_v19 = vpop.f32.mrf.mxu1  ;;  %v4950_v8 = vadd.f32 %v4879_v54, %v11956_v2  ;;  %v12118_v17 = vadd.f32 %v8726_v45, %v4951_v9  ;;  %v6297_v2 = vrot.slane %v11940_v57, 2  ;;  %v13203_v45 = vld [vmem:[#allocation63_spill] sm:$0xff] }
 0x3c8   : > { %v8679_v13 = vpop.f32.mrf.mxu0  ;;  %8978 = vmatmul.mubr.msk.f32.gmra.mxu0 %vm3706_vm4, %v13200_v24 }
 0x3c9   : > { %v8732_v51 = vpop.f32.mrf.mxu1  ;;  %v4953_v37 = vadd.f32 %v8679_v13, %v11962_v1  ;;  %8980 = vmatprep.mubr.msk.f32.mxu0 %vm3706_vm4, %v13201_v25  ;;  %v12125_v62 = vadd.f32 %v5144_v42, %v4950_v8  ;;  %v6300_v15 = vsel %vm1132_vm3, %v6297_v2, %v6299_v5 }
 0x3ca   : > { %v4889_v14 = vpop.f32.mrf.mxu0 }
 0x3cb   : > { %v5164_v38 = vpop.f32.mrf.mxu1  ;;  %v4952_v10 = vadd.f32 %v4889_v14, %v11970_v53  ;;  %v12130_v40 = vadd.f32 %v8729_v50, %v4953_v37  ;;  %v6298_v53 = vsel %vm1132_vm3, %v6296_v33, %v6297_v2 }
 0x3cc   : > { %v8682_v46 = vpop.f32.mrf.mxu0  ;;  %8981 = vmatmul.mubr.msk.f32.gmra.mxu0 %vm3706_vm4, %v13202_v48 }
 0x3cd   : > { %v8735_v1 = vpop.f32.mrf.mxu1  ;;  %v4955_v34 = vadd.f32 %v8682_v46, %v11976_v23  ;;  %8983 = vmatprep.mubr.msk.f32.mxu0 %vm3706_vm4, %v13203_v45  ;;  %v12138_v31 = vadd.f32 %v5154_v19, %v4952_v10 }
 0x3ce   : > { %v4899_v12 = vpop.f32.mrf.mxu0 }
 0x3cf   : > { %v5174_v57 = vpop.f32.mrf.mxu1  ;;  %v4954_v26 = vadd.f32 %v4899_v12, %v11982_v43  ;;  %v12142_v42 = vadd.f32 %v8732_v51, %v4955_v34 }
 0x3d0   : > { %v8685_v6 = vpop.f32.mrf.mxu0  ;;  %8984 = vmatmul.mubr.msk.f32.gmra.mxu0 %vm3706_vm4, %v11783_v20 }
 0x3d1   : > { %v8738_v23 = vpop.f32.mrf.mxu1  ;;  %v4957_v0 = vadd.f32 %v8685_v6, %v11987_v61  ;;  %8986 = vmatprep.mubr.msk.f32.mxu0 %vm3706_vm4, %v6298_v53  ;;  %v12149_v60 = vadd.f32 %v5164_v38, %v4954_v26 }
 0x3d2   : > { %v4909_v50 = vpop.f32.mrf.mxu0 }
 0x3d3   : > { %v5184_v9 = vpop.f32.mrf.mxu1  ;;  %v4956_v29 = vadd.f32 %v4909_v50, %v11991_v35  ;;  %v12152_v43 = vadd.f32 %v8735_v1, %v4957_v0 }
 0x3d4   : > { %v8688_v54 = vpop.f32.mrf.mxu0  ;;  %8987 = vmatmul.mubr.msk.f32.gmra.mxu0 %vm3706_vm4, %v6300_v15 }
 0x3d5   : > { %v12155_v19 = vpop.f32.mrf.mxu1  ;;  %v4959_v20 = vadd.f32 %v8688_v54, %v11995_v3  ;;  %v12158_v61 = vadd.f32 %v5174_v57, %v4956_v29 }
 0x3d6   : > { %v4919_v8 = vpop.f32.mrf.mxu0 }
 0x3d7   : > { %v12160_v13 = vpop.f32.mrf.mxu1  ;;  %v4958_v24 = vadd.f32 %v4919_v8, %v11999_v58  ;;  %v12163_v51 = vadd.f32 %v8738_v23, %v4959_v20 }
 0x3d8   : > { %v8743_v37 = vpop.f32.mrf.mxu0 }
 0x3d9   : > { %v12165_v35 = vpop.f32.mrf.mxu1  ;;  %v12168_v25 = vadd.f32 %v8743_v37, %v12008_v55  ;;  %v12170_v33 = vadd.f32 %v5184_v9, %v4958_v24 }
 0x3da   : > { %v5303_v14 = vpop.f32.mrf.mxu0 }
 0x3db   : > { %v12172_v38 = vpop.f32.mrf.mxu1  ;;  %v12175_v3 = vadd.f32 %v5303_v14, %v12015_v30 }
 0x3dc   : > { %v8746_v2 = vpop.f32.mrf.mxu0 }
 0x3dd   : > { %v12177_v10 = vpop.f32.mrf.mxu1  ;;  %v12180_v58 = vadd.f32 %v8746_v2, %v12018_v22 }
 0x3de   : > { %v5313_v46 = vpop.f32.mrf.mxu0 }
 0x3df   : > { %v12182_v48 = vpop.f32.mrf.mxu1  ;;  %v12185_v55 = vadd.f32 %v5313_v46, %v12025_v39 }
 0x3e0   : > { %v8749_v1 = vpop.f32.mrf.mxu0 }
 0x3e1   : > { %v12187_v34 = vpop.f32.mrf.mxu1  ;;  %v12190_v45 = vadd.f32 %v8749_v1, %v12028_v27 }
 0x3e2   : > { %v5323_v30 = vpop.f32.mrf.mxu0 }
 0x3e3   : > { %v12192_v5 = vpop.f32.mrf.mxu1  ;;  %v12195_v12 = vadd.f32 %v5323_v30, %v12035_v56 }
 0x3e4   : > { %v8752_v22 = vpop.f32.mrf.mxu0 }
 0x3e5   : > { %v12197_v57 = vpop.f32.mrf.mxu1  ;;  %v12200_v53 = vadd.f32 %v8752_v22, %v12038_v21 }
 0x3e6   : > { %v5333_v39 = vpop.f32.mrf.mxu0 }
 0x3e7   : > { %v12202_v26 = vpop.f32.mrf.mxu1  ;;  %v12205_v6 = vadd.f32 %v5333_v39, %v12045_v7 }
 0x3e8   : > { %v8755_v27 = vpop.f32.mrf.mxu0 }
 0x3e9   : > { %v12207_v23 = vpop.f32.mrf.mxu1  ;;  %v12210_v0 = vadd.f32 %v8755_v27, %v12048_v59 }
 0x3ea   : > { %v5343_v56 = vpop.f32.mrf.mxu0 }
 0x3eb   : > { %v12212_v15 = vpop.f32.mrf.mxu1  ;;  %v12215_v50 = vadd.f32 %v5343_v56, %v12055_v44 }
 0x3ec   : > { %v8758_v21 = vpop.f32.mrf.mxu0 }
 0x3ed   : > { %v12217_v9 = vpop.f32.mrf.mxu1  ;;  %v12220_v29 = vadd.f32 %v8758_v21, %v12058_v18 }
 0x3ee   : > { %v5353_v7 = vpop.f32.mrf.mxu0 }
 0x3ef   : > { %v12222_v54 = vpop.f32.mrf.mxu1  ;;  %v12225_v20 = vadd.f32 %v5353_v7, %v12065_v11 }
 0x3f0   : > { %v8761_v59 = vpop.f32.mrf.mxu0 }
 0x3f1   : > { %v12227_v8 = vpop.f32.mrf.mxu1  ;;  %v12230_v24 = vadd.f32 %v8761_v59, %v12068_v16 }
 0x3f2   : > { %13204 = vst [vmem:[#allocation64_spill] sm:$0xff] %v12227_v8  ;;  %v5363_v44 = vpop.f32.mrf.mxu0 }
 0x3f3   : > { %v12232_v37 = vpop.f32.mrf.mxu1  ;;  %v12235_v14 = vadd.f32 %v5363_v44, %v12075_v28 }
 0x3f4   : > { %13205 = vst [vmem:[#allocation8_spill] sm:$0xff] %v12232_v37  ;;  %v8764_v18 = vpop.f32.mrf.mxu0 }
 0x3f5   : > { %v12237_v2 = vpop.f32.mrf.mxu1  ;;  %v12240_v46 = vadd.f32 %v8764_v18, %v12078_v32 }
 0x3f6   : > { %13206 = vst [vmem:[#allocation37_spill] sm:$0xff] %v12237_v2  ;;  %v5373_v11 = vpop.f32.mrf.mxu0 }
 0x3f7   : > { %13207 = vst [vmem:[#allocation46_spill] sm:$0xff] %v12240_v46  ;;  %v12242_v1 = vpop.f32.mrf.mxu1  ;;  %v12245_v30 = vadd.f32 %v5373_v11, %v12085_v36 }
 0x3f8   : > { %13208 = vst [vmem:[#allocation65_spill] sm:$0xff] %v12242_v1  ;;  %v8767_v16 = vpop.f32.mrf.mxu0 }
 0x3f9   : > { %13209 = vst [vmem:[#allocation48_spill] sm:$0xff] %v12245_v30  ;;  %v12247_v22 = vpop.f32.mrf.mxu1  ;;  %v12250_v39 = vadd.f32 %v8767_v16, %v12088_v49 }
 0x3fa   : > { %13210 = vst [vmem:[#allocation45_spill] sm:$0xff] %v12247_v22  ;;  %v5383_v28 = vpop.f32.mrf.mxu0 }
 0x3fb   : > { %13211 = vst [vmem:[#allocation66_spill] sm:$0xff] %v12250_v39  ;;  %v12252_v27 = vpop.f32.mrf.mxu1  ;;  %v12255_v56 = vadd.f32 %v5383_v28, %v12095_v63 }
 0x3fc   : > { %13212 = vst [vmem:[#allocation47_spill] sm:$0xff] %v12252_v27  ;;  %v8770_v32 = vpop.f32.mrf.mxu0 }
 0x3fd   : > { %13213 = vst [vmem:[#allocation5_spill] sm:$0xff] %v12255_v56  ;;  %v12257_v21 = vpop.f32.mrf.mxu1  ;;  %v12260_v7 = vadd.f32 %v8770_v32, %v12098_v4 }
 0x3fe   : > { %13214 = vst [vmem:[#allocation12_spill] sm:$0xff] %v12257_v21  ;;  %v5393_v36 = vpop.f32.mrf.mxu0 }
 0x3ff   : > { %13215 = vst [vmem:[#allocation39_spill] sm:$0xff] %v12260_v7  ;;  %v12262_v59 = vpop.f32.mrf.mxu1  ;;  %v12265_v44 = vadd.f32 %v5393_v36, %v12105_v41 }
 0x400   : > { %13216 = vst [vmem:[#allocation16_spill] sm:$0xff] %v12262_v59  ;;  %v8773_v49 = vpop.f32.mrf.mxu0 }
 0x401   : > { %13217 = vst [vmem:[#allocation50_spill] sm:$0xff] %v12265_v44  ;;  %v12267_v18 = vpop.f32.mrf.mxu1  ;;  %v12270_v11 = vadd.f32 %v8773_v49, %v12108_v47 }
 0x402   : > { %13218 = vst [vmem:[#allocation41_spill] sm:$0xff] %v12267_v18  ;;  %v5403_v63 = vpop.f32.mrf.mxu0 }
 0x403   : > { %13219 = vst [vmem:[#allocation7_spill] sm:$0xff] %v12270_v11  ;;  %v12272_v16 = vpop.f32.mrf.mxu1  ;;  %v12275_v28 = vadd.f32 %v5403_v63, %v12115_v52 }
 0x404   : > { %13220 = vst [vmem:[#allocation43_spill] sm:$0xff] %v12272_v16  ;;  %v8776_v4 = vpop.f32.mrf.mxu0 }
 0x405   : > { %13221 = vst [vmem:[#allocation40_spill] sm:$0xff] %v12275_v28  ;;  %v12277_v32 = vpop.f32.mrf.mxu1  ;;  %v12280_v59 = vadd.f32 %v8776_v4, %v12118_v17 }
 0x406   : > { %13222 = vst [vmem:[#allocation49_spill] sm:$0xff] %v12277_v32  ;;  %v5413_v41 = vpop.f32.mrf.mxu0 }
 0x407   : > { %13223 = vst [vmem:[#allocation14_spill] sm:$0xff] %v12280_v59  ;;  %v12282_v36 = vpop.f32.mrf.mxu1  ;;  %v12285_v18 = vadd.f32 %v5413_v41, %v12125_v62 }
 0x408   : > { %13224 = vst [vmem:[#allocation52_spill] sm:$0xff] %v12282_v36  ;;  %v8779_v47 = vpop.f32.mrf.mxu0 }
 0x409   : > { %13225 = vst [vmem:[#allocation9_spill] sm:$0xff] %v12285_v18  ;;  %v12287_v49 = vpop.f32.mrf.mxu1  ;;  %v12290_v16 = vadd.f32 %v8779_v47, %v12130_v40 }
 0x40a   : > { %13226 = vst [vmem:[#allocation18_spill] sm:$0xff] %v12287_v49  ;;  %v5423_v52 = vpop.f32.mrf.mxu0 }
 0x40b   : > { %13227 = vst [vmem:[#allocation26_spill] sm:$0xff] %v12290_v16  ;;  %v12292_v63 = vpop.f32.mrf.mxu1  ;;  %v12295_v32 = vadd.f32 %v5423_v52, %v12138_v31 }
 0x40c   : > { %13228 = vst [vmem:[#allocation53_spill] sm:$0xff] %v12292_v63  ;;  %v8782_v17 = vpop.f32.mrf.mxu0 }
 0x40d   : > { %13229 = vst [vmem:[#allocation54_spill] sm:$0xff] %v12295_v32  ;;  %v12297_v4 = vpop.f32.mrf.mxu1  ;;  %v12300_v36 = vadd.f32 %v8782_v17, %v12142_v42 }
 0x40e   : > { %13230 = vst [vmem:[#allocation11_spill] sm:$0xff] %v12297_v4  ;;  %v5433_v62 = vpop.f32.mrf.mxu0 }
 0x40f   : > { %13231 = vst [vmem:[#allocation23_spill] sm:$0xff] %v12300_v36  ;;  %v12302_v41 = vpop.f32.mrf.mxu1  ;;  %v12305_v49 = vadd.f32 %v5433_v62, %v12149_v60 }
 0x410   : > { %13232 = vst [vmem:[#allocation30_spill] sm:$0xff] %v12302_v41  ;;  %v8785_v40 = vpop.f32.mrf.mxu0 }
 0x411   : > { %13233 = vst [vmem:[#allocation13_spill] sm:$0xff] %v12305_v49  ;;  %v12307_v47 = vpop.f32.mrf.mxu1  ;;  %v12310_v63 = vadd.f32 %v8785_v40, %v12152_v43 }
 0x412   : > { %13234 = vst [vmem:[#allocation31_spill] sm:$0xff] %v12307_v47  ;;  %v5443_v31 = vpop.f32.mrf.mxu0 }
 0x413   : > { %13235 = vst [vmem:[#allocation15_spill] sm:$0xff] %v12310_v63  ;;  %v12313_v52 = vadd.f32 %v5443_v31, %v12158_v61  ;;  %v12315_v4 = vpop.f32.mrf.mxu1 }
 0x414   : > { %13237 = vst [vmem:[#allocation51_spill] sm:$0xff] %v12315_v4  ;;  %v8788_v42 = vpop.f32.mrf.mxu0 }
 0x415   : > { %13236 = vst [vmem:[#allocation21_spill] sm:$0xff] %v12313_v52  ;;  %v12318_v17 = vadd.f32 %v8788_v42, %v12163_v51  ;;  %v8893_v36 = vpop.f32.mrf.mxu1 }
 0x416   : > { %v5453_v41 = vpop.f32.mrf.mxu0 }
 0x417   : > { %13238 = vst [vmem:[#allocation22_spill] sm:$0xff] %v12318_v17  ;;  %v12321_v60 = vadd.f32 %v5453_v41, %v12170_v33  ;;  %v6105_v49 = vpop.f32.mrf.mxu1 }
 0x418   : > { %v8843_v62 = vpop.f32.mrf.mxu0 }
 0x419   : > { %13239 = vst [vmem:[#allocation42_spill] sm:$0xff] %v12321_v60  ;;  %v12323_v63 = vpop.f32.mrf.mxu1 }
 0x41a   : > { %v5836_v47 = vpop.f32.mrf.mxu0 }
 0x41b   : > { %v12327_v4 = vpop.f32.mrf.mxu1 }
 0x41c   : > { %v8846_v43 = vpop.f32.mrf.mxu0 }
 0x41d   : > { %v12333_v42 = vpop.f32.mrf.mxu1 }
 0x41e   : > { %v5846_v40 = vpop.f32.mrf.mxu0 }
 0x41f   : > { %v12339_v60 = vpop.f32.mrf.mxu1 }
 0x420   : > { %v8849_v61 = vpop.f32.mrf.mxu0 }
 0x421   : > { %v12345_v16 = vpop.f32.mrf.mxu1 }
 0x422   : > { %v12325_v31 = vpop.f32.mrf.mxu0 }
 0x423   : > { %v12351_v28 = vpop.f32.mrf.mxu1 }
 0x424   : > { %v12329_v52 = vpop.f32.mrf.mxu0 }
 0x425   : > { %v12357_v27 = vpop.f32.mrf.mxu1 }
 0x426   : > { %v12331_v51 = vpop.f32.mrf.mxu0 }
 0x427   : > { %v12363_v7 = vpop.f32.mrf.mxu1 }
 0x428   : > { %v12335_v33 = vpop.f32.mrf.mxu0 }
 0x429   : > { %v12369_v2 = vpop.f32.mrf.mxu1 }
 0x42a   : > { %v12337_v41 = vpop.f32.mrf.mxu0 }
 0x42b   : > { %v12375_v30 = vpop.f32.mrf.mxu1 }
 0x42c   : > { %v12341_v17 = vpop.f32.mrf.mxu0 }
 0x42e   : > { %v12343_v32 = vpop.f32.mrf.mxu0 }
 0x430   : > { %v12347_v18 = vpop.f32.mrf.mxu0 }
 0x432   : > { %v12349_v59 = vpop.f32.mrf.mxu0 }
 0x434   : > { %v12353_v21 = vpop.f32.mrf.mxu0 }
 0x435   : > { %13240 = vst [vmem:[#allocation17_spill] sm:$0xff] %v12353_v21 }
 0x436   : > { %v12355_v11 = vpop.f32.mrf.mxu0 }
 0x437   : > { %13241 = vst [vmem:[#allocation27_spill] sm:$0xff] %v12355_v11 }
 0x438   : > { %v12359_v44 = vpop.f32.mrf.mxu0 }
 0x439   : > { %13242 = vst [vmem:[#allocation55_spill] sm:$0xff] %v12359_v44  ;;  %v12381_v44 = vpop.f32.mrf.mxu1 }
 0x43a   : > { %v12361_v22 = vpop.f32.mrf.mxu0  ;;  %13250 = vst [vmem:[#allocation33_spill] sm:$0xff] %v12381_v44 }
 0x43b   : > { %13243 = vst [vmem:[#allocation25_spill] sm:$0xff] %v12361_v22 }
 0x43c   : > { %v12365_v1 = vpop.f32.mrf.mxu0 }
 0x43d   : > { %13244 = vst [vmem:[#allocation56_spill] sm:$0xff] %v12365_v1  ;;  %v12387_v1 = vpop.f32.mrf.mxu1 }
 0x43e   : > { %v12367_v56 = vpop.f32.mrf.mxu0  ;;  %13253 = vst [vmem:[#allocation60_spill] sm:$0xff] %v12387_v1 }
 0x43f   : > { %13245 = vst [vmem:[#allocation20_spill] sm:$0xff] %v12367_v56 }
 0x440   : > { %v12371_v39 = vpop.f32.mrf.mxu0 }
 0x441   : > { %13246 = vst [vmem:[#allocation3_spill] sm:$0xff] %v12371_v39  ;;  %v12393_v39 = vpop.f32.mrf.mxu1 }
 0x442   : > { %v12373_v37 = vpop.f32.mrf.mxu0  ;;  %13256 = vst [vmem:[#allocation34_spill] sm:$0xff] %v12393_v39 }
 0x443   : > { %13247 = vst [vmem:[#allocation28_spill] sm:$0xff] %v12373_v37 }
 0x444   : > { %v12377_v11 = vpop.f32.mrf.mxu0 }
 0x445   : > { %13248 = vst [vmem:[#allocation57_spill] sm:$0xff] %v12377_v11  ;;  %v5731_v11 = vadd.f32 %v12155_v19, %v12168_v25  ;;  %v5732_v19 = vadd.f32 %v12172_v38, %v12185_v55  ;;  %v12427_v38 = vld [vmem:[%s12696_s9] ss:$0 sm:$0xff] }
 0x446   : > { %v12379_v21 = vpop.f32.mrf.mxu0 }
 0x447   : > { %13249 = vst [vmem:[#allocation58_spill] sm:$0xff] %v12379_v21  ;;  %v5996_v44 = vadd.f32 %v8843_v62, %v5731_v11 }
 0x448   : > { %v12383_v22 = vpop.f32.mrf.mxu0 }
 0x449   : > { %13251 = vst [vmem:[#allocation35_spill] sm:$0xff] %v12383_v22  ;;  %v5730_v22 = vadd.f32 %v12160_v13, %v12175_v3  ;;  %v6265_v11 = vadd.f32 %v8893_v36, %v5996_v44  ;;  %v5735_v13 = vadd.f32 %v12177_v10, %v12190_v45 }
 0x44a   : > { %v12385_v8 = vpop.f32.mrf.mxu0 }
 0x44b   : > { %13252 = vst [vmem:[#allocation29_spill] sm:$0xff] %v12385_v8  ;;  %v12403_v8 = vpop.f32.mrf.mxu1  ;;  %v6000_v62 = vadd.f32 %v8849_v61, %v5735_v13 }
 0x44c   : > { %v12389_v56 = vpop.f32.mrf.mxu0 }
 0x44d   : > { %13254 = vst [vmem:[#allocation32_spill] sm:$0xff] %v12389_v56  ;;  %v5995_v56 = vadd.f32 %v5836_v47, %v5730_v22  ;;  %v12413_v25 = vpop.f32.mrf.mxu1  ;;  %v12420_v22 = vld [vmem:[%s12695_s8] ss:$0 sm:$0xff] }
 0x44e   : > { %v12391_v46 = vpop.f32.mrf.mxu0 }
 0x44f   : > { %13255 = vst [vmem:[#allocation19_spill] sm:$0xff] %v12391_v46  ;;  %v5733_v46 = vadd.f32 %v12165_v35, %v12180_v58  ;;  %v5997_v35 = vadd.f32 %v5846_v40, %v5732_v19  ;;  %v6264_v47 = vadd.f32 %v6105_v49, %v5995_v56  ;;  %v12429_v10 = vpop.f32.mrf.mxu1  ;;  %v5737_v49 = vadd.f32 %v12187_v34, %v12200_v53 }
 0x450   : > { %v12395_v37 = vpop.f32.mrf.mxu0  ;;  %v6269_v53 = vadd.f32 %v12333_v42, %v6000_v62 }
 0x451   : > { %13257 = vst [vmem:[#allocation59_spill] sm:$0xff] %v12395_v37  ;;  %v5998_v37 = vadd.f32 %v8846_v43, %v5733_v46  ;;  %v5734_v46 = vadd.f32 %v12182_v48, %v12195_v12  ;;  %v6266_v61 = vadd.f32 %v12327_v4, %v5997_v35  ;;  %v6002_v19 = vadd.f32 %v12329_v52, %v5737_v49 }
 0x452   : > { %v12399_v21 = vpop.f32.mrf.mxu0 }
 0x453   : > { %v6267_v36 = vadd.f32 %v12323_v63, %v5998_v37  ;;  %v5999_v56 = vadd.f32 %v12325_v31, %v5734_v46  ;;  %v12449_v37 = vpop.f32.mrf.mxu1 }
 0x454   : > { %v12405_v1 = vpop.f32.mrf.mxu0 }
 0x456   : > { %v12409_v39 = vpop.f32.mrf.mxu0 }
 0x458   : > { %v8943_v3 = vpop.f32.mrf.mxu0 }
 0x459   : > { %v6533_v58 = vadd.f32 %v8943_v3, %v6265_v11  ;;  %v5736_v11 = vadd.f32 %v12192_v5, %v12205_v6  ;;  %v5739_v6 = vadd.f32 %v12197_v57, %v12210_v0  ;;  %v6268_v3 = vadd.f32 %v12339_v60, %v5999_v56  ;;  %v12465_v0 = vpop.f32.mrf.mxu1 }
 0x45a   : > { %v6373_v55 = vpop.f32.mrf.mxu0  ;;  %v6271_v57 = vadd.f32 %v12345_v16, %v6002_v19 }
 0x45b   : > { %v6572_v45 = vmul.f32 %v12420_v22, %v6533_v58  ;;  %v6532_v44 = vadd.f32 %v6373_v55, %v6264_v47  ;;  %v6001_v5 = vadd.f32 %v12331_v51, %v5736_v11  ;;  %v6004_v62 = vadd.f32 %v12335_v33, %v5739_v6 }
 0x45c   : > { %v8946_v48 = vpop.f32.mrf.mxu0  ;;  %v5738_v51 = vadd.f32 %v12202_v26, %v12215_v50  ;;  %v5741_v33 = vadd.f32 %v12207_v23, %v12220_v29  ;;  %v12483_v29 = vpop.f32.mrf.mxu1 }
 0x45d   : > { %v6611_v12 = vadd.f32 %v12427_v38, %v6572_v45  ;;  %v6571_v43 = vmul.f32 %v12420_v22, %v6532_v44  ;;  %v6535_v40 = vadd.f32 %v8946_v48, %v6267_v36  ;;  %v6270_v50 = vadd.f32 %v12351_v28, %v6001_v5 }
 0x45e   : > { %v6383_v34 = vpop.f32.mrf.mxu0  ;;  %v6003_v36 = vadd.f32 %v12337_v41, %v5738_v51  ;;  %v5740_v41 = vadd.f32 %v12212_v15, %v12225_v20  ;;  %v6273_v23 = vadd.f32 %v12357_v27, %v6004_v62  ;;  %v13260_v62 = vld [vmem:[#allocation17_spill] sm:$0xff] }
 0x45f   : > { %v6643_v63 = vmax.f32 %v6611_v12, 0.0  ;;  %v6610_v31 = vadd.f32 %v12427_v38, %v6571_v43  ;;  %v6574_v4 = vmul.f32 %v12420_v22, %v6535_v40  ;;  %v6534_v52 = vadd.f32 %v6383_v34, %v6266_v61 }
 0x460   : > { %v8949_v13 = vpop.f32.mrf.mxu0  ;;  %v6006_v12 = vadd.f32 %v12341_v17, %v5741_v33  ;;  %v6005_v11 = vadd.f32 %v12343_v32, %v5740_v41  ;;  %v5743_v17 = vadd.f32 %v12217_v9, %v12230_v24  ;;  %v6272_v20 = vadd.f32 %v12363_v7, %v6003_v36  ;;  %v12501_v24 = vpop.f32.mrf.mxu1  ;;  %v13267_v41 = vld [vmem:[#allocation60_spill] sm:$0xff] }
 0x461   : > { %6675 = vst.msk [vmem:[%s12446_s17 + $0x8] sm:$0xff] %vm3706_vm4, %v6643_v63  ;;  %v6642_v42 = vmax.f32 %v6610_v31, 0.0  ;;  %v6613_v35 = vadd.f32 %v12427_v38, %v6574_v4  ;;  %v6573_v58 = vmul.f32 %v12420_v22, %v6534_v52  ;;  %v6537_v47 = vadd.f32 %v8949_v13, %v6269_v53 }
 0x462   : > { %v6393_v46 = vpop.f32.mrf.mxu0  ;;  %v6008_v31 = vadd.f32 %v12347_v18, %v5743_v17  ;;  %v5742_v32 = vadd.f32 %v12222_v54, %v12235_v14  ;;  %v6275_v9 = vadd.f32 %v12369_v2, %v6006_v12  ;;  %v13258_v18 = vld [vmem:[#allocation46_spill] sm:$0xff]  ;;  %v6274_v14 = vadd.f32 %v12375_v30, %v6005_v11  ;;  %v13269_v17 = vld [vmem:[#allocation5_spill] sm:$0xff] }
 0x463   : > { %6674 = vst.msk [vmem:[%s12446_s17] sm:$0xff] %vm3706_vm4, %v6642_v42  ;;  %v6645_v60 = vmax.f32 %v6613_v35, 0.0  ;;  %v6612_v55 = vadd.f32 %v12427_v38, %v6573_v58  ;;  %v6576_v45 = vmul.f32 %v12420_v22, %v6537_v47  ;;  %v6536_v44 = vadd.f32 %v6393_v46, %v6268_v3  ;;  %v13259_v3 = vld [vmem:[#allocation64_spill] sm:$0xff] }
 0x464   : > { %v8952_v26 = vpop.f32.mrf.mxu0  ;;  %v6007_v13 = vadd.f32 %v12349_v59, %v5742_v32  ;;  %v5745_v42 = vadd.f32 %v13259_v3, %v13258_v18  ;;  %v13261_v46 = vld [vmem:[#allocation48_spill] sm:$0xff] }
 0x465   : > { %6677 = vst.msk [vmem:[%s12446_s17 + $0x18] sm:$0xff] %vm3706_vm4, %v6645_v60  ;;  %v6644_v16 = vmax.f32 %v6612_v55, 0.0  ;;  %v6615_v56 = vadd.f32 %v12427_v38, %v6576_v45  ;;  %v6575_v49 = vmul.f32 %v12420_v22, %v6536_v44  ;;  %v6539_v48 = vadd.f32 %v8952_v26, %v6271_v57  ;;  %v13262_v57 = vld [vmem:[#allocation8_spill] sm:$0xff]  ;;  %v13263_v55 = vld [vmem:[#allocation33_spill] sm:$0xff]  ;;  %v12519_v44 = vpop.f32.mrf.mxu1 }
 0x466   : > { %v6403_v43 = vpop.f32.mrf.mxu0  ;;  %v6010_v51 = vadd.f32 %v13260_v62, %v5745_v42  ;;  %v5744_v59 = vadd.f32 %v13262_v57, %v13261_v46  ;;  %v6277_v45 = vadd.f32 %v13263_v55, %v6008_v31  ;;  %v13277_v62 = vld [vmem:[#allocation47_spill] sm:$0xff] }
 0x467   : > { %6676 = vst.msk [vmem:[%s12446_s17 + $0x10] sm:$0xff] %vm3706_vm4, %v6644_v16  ;;  %v6647_v28 = vmax.f32 %v6615_v56, 0.0  ;;  %v6614_v40 = vadd.f32 %v12427_v38, %v6575_v49  ;;  %v6578_v61 = vmul.f32 %v12420_v22, %v6539_v48  ;;  %v6538_v19 = vadd.f32 %v6403_v43, %v6270_v50  ;;  %v13264_v50 = vld [vmem:[#allocation27_spill] sm:$0xff]  ;;  %v13265_v56 = vld [vmem:[#allocation66_spill] sm:$0xff]  ;;  %v13266_v49 = vld [vmem:[#allocation37_spill] sm:$0xff] }
 0x468   : > { %v8955_v15 = vpop.f32.mrf.mxu0  ;;  %v6009_v16 = vadd.f32 %v13264_v50, %v5744_v59  ;;  %v5747_v48 = vadd.f32 %v13266_v49, %v13265_v56  ;;  %v6276_v43 = vadd.f32 %v13267_v41, %v6007_v13  ;;  %v13281_v41 = vld [vmem:[#allocation3_spill] sm:$0xff] }
 0x469   : > { %6679 = vst.msk [vmem:[%s12446_s17 + $0x28] sm:$0xff] %vm3706_vm4, %v6647_v28  ;;  %v6646_v27 = vmax.f32 %v6614_v40, 0.0  ;;  %v6617_v34 = vadd.f32 %v12427_v38, %v6578_v61  ;;  %v6577_v53 = vmul.f32 %v12420_v22, %v6538_v19  ;;  %v6541_v63 = vadd.f32 %v8955_v15, %v6273_v23  ;;  %v13268_v19 = vld [vmem:[#allocation55_spill] sm:$0xff]  ;;  %v13270_v15 = vld [vmem:[#allocation65_spill] sm:$0xff] }
 0x46a   : > { %v6413_v4 = vpop.f32.mrf.mxu0  ;;  %v6012_v11 = vadd.f32 %v13268_v19, %v5747_v48  ;;  %v6278_v3 = vadd.f32 %v12403_v8, %v6009_v16 }
 0x46b   : > { %6678 = vst.msk [vmem:[%s12446_s17 + $0x20] sm:$0xff] %vm3706_vm4, %v6646_v27  ;;  %v6649_v7 = vmax.f32 %v6617_v34, 0.0  ;;  %v6616_v52 = vadd.f32 %v12427_v38, %v6577_v53  ;;  %v6580_v5 = vmul.f32 %v12420_v22, %v6541_v63  ;;  %v6540_v6 = vadd.f32 %v6413_v4, %v6272_v20  ;;  %v13271_v34 = vld [vmem:[#allocation34_spill] sm:$0xff]  ;;  %v12537_v63 = vpop.f32.mrf.mxu1 }
 0x46c   : > { %v8958_v54 = vpop.f32.mrf.mxu0  ;;  %v5746_v20 = vadd.f32 %v13270_v15, %v13269_v17  ;;  %v6279_v53 = vadd.f32 %v13271_v34, %v6010_v51  ;;  %v6281_v57 = vadd.f32 %v12413_v25, %v6012_v11 }
 0x46d   : > { %6681 = vst.msk [vmem:[%s12446_s17 + $0x38] sm:$0xff] %vm3706_vm4, %v6649_v7  ;;  %v6648_v2 = vmax.f32 %v6616_v52, 0.0  ;;  %v6619_v35 = vadd.f32 %v12427_v38, %v6580_v5  ;;  %v6579_v58 = vmul.f32 %v12420_v22, %v6540_v6  ;;  %v6543_v47 = vadd.f32 %v8958_v54, %v6275_v9  ;;  %v13272_v7 = vld [vmem:[#allocation25_spill] sm:$0xff]  ;;  %v13273_v5 = vld [vmem:[#allocation39_spill] sm:$0xff]  ;;  %v12555_v59 = vpop.f32.mrf.mxu1 }
 0x46e   : > { %v6423_v60 = vpop.f32.mrf.mxu0  ;;  %v6011_v52 = vadd.f32 %v13272_v7, %v5746_v20  ;;  %v13274_v6 = vld [vmem:[#allocation45_spill] sm:$0xff] }
 0x46f   : > { %6680 = vst.msk [vmem:[%s12446_s17 + $0x30] sm:$0xff] %vm3706_vm4, %v6648_v2  ;;  %v6651_v30 = vmax.f32 %v6619_v35, 0.0  ;;  %v6618_v36 = vadd.f32 %v12427_v38, %v6579_v58  ;;  %v6582_v33 = vmul.f32 %v12420_v22, %v6543_v47  ;;  %v6542_v26 = vadd.f32 %v6423_v60, %v6274_v14  ;;  %v13275_v35 = vld [vmem:[#allocation56_spill] sm:$0xff]  ;;  %v13276_v47 = vld [vmem:[#allocation50_spill] sm:$0xff]  ;;  %v12573_v11 = vpop.f32.mrf.mxu1 }
 0x470   : > { %v8961_v12 = vpop.f32.mrf.mxu0  ;;  %v5749_v13 = vadd.f32 %v13274_v6, %v13273_v5  ;;  %v5748_v51 = vadd.f32 %v13277_v62, %v13276_v47  ;;  %v6280_v56 = vadd.f32 %v12429_v10, %v6011_v52  ;;  %v13287_v6 = vld [vmem:[#allocation57_spill] sm:$0xff]  ;;  %v13290_v62 = vld [vmem:[#allocation58_spill] sm:$0xff] }
 0x471   : > { %6683 = vst.msk [vmem:[%s12446_s17 + $0x48] sm:$0xff] %vm3706_vm4, %v6651_v30  ;;  %v6650_v23 = vmax.f32 %v6618_v36, 0.0  ;;  %v6621_v28 = vadd.f32 %v12427_v38, %v6582_v33  ;;  %v6581_v40 = vmul.f32 %v12420_v22, %v6542_v26  ;;  %v6545_v61 = vadd.f32 %v8961_v12, %v6277_v45  ;;  %v13278_v30 = vld [vmem:[#allocation20_spill] sm:$0xff]  ;;  %v13279_v33 = vld [vmem:[#allocation7_spill] sm:$0xff] }
 0x472   : > { %v6433_v27 = vpop.f32.mrf.mxu0  ;;  %v6014_v58 = vadd.f32 %v13275_v35, %v5749_v13  ;;  %v6013_v36 = vadd.f32 %v13278_v30, %v5748_v51  ;;  %v13280_v26 = vld [vmem:[#allocation12_spill] sm:$0xff] }
 0x473   : > { %6682 = vst.msk [vmem:[%s12446_s17 + $0x40] sm:$0xff] %vm3706_vm4, %v6650_v23  ;;  %v6653_v31 = vmax.f32 %v6621_v28, 0.0  ;;  %v6620_v32 = vadd.f32 %v12427_v38, %v6581_v40  ;;  %v6584_v4 = vmul.f32 %v12420_v22, %v6545_v61  ;;  %v6544_v9 = vadd.f32 %v6433_v27, %v6276_v43  ;;  %v13282_v23 = vld [vmem:[#allocation40_spill] sm:$0xff] }
 0x474   : > { %v8964_v18 = vpop.f32.mrf.mxu0  ;;  %v5751_v50 = vadd.f32 %v13280_v26, %v13279_v33  ;;  %v13283_v28 = vld [vmem:[#allocation16_spill] sm:$0xff]  ;;  %v6283_v19 = vadd.f32 %v12449_v37, %v6014_v58  ;;  %v13293_v33 = vld [vmem:[#allocation35_spill] sm:$0xff] }
 0x475   : > { %6685 = vst.msk [vmem:[%s12446_s17 + $0x58] sm:$0xff] %vm3706_vm4, %v6653_v31  ;;  %v6652_v42 = vmax.f32 %v6620_v32, 0.0  ;;  %v6623_v54 = vadd.f32 %v12427_v38, %v6584_v4  ;;  %v6583_v14 = vmul.f32 %v12420_v22, %v6544_v9  ;;  %v6547_v2 = vadd.f32 %v8964_v18, %v6279_v53  ;;  %v13284_v27 = vld [vmem:[#allocation28_spill] sm:$0xff]  ;;  %v13285_v53 = vld [vmem:[#allocation14_spill] sm:$0xff]  ;;  %v13286_v31 = vld [vmem:[#allocation41_spill] sm:$0xff] }
 0x476   : > { %v6443_v46 = vpop.f32.mrf.mxu0  ;;  %v6016_v43 = vadd.f32 %v13281_v41, %v5751_v50  ;;  %v5750_v40 = vadd.f32 %v13283_v28, %v13282_v23  ;;  %v5753_v32 = vadd.f32 %v13286_v31, %v13285_v53  ;;  %v6282_v9 = vadd.f32 %v12465_v0, %v6013_v36  ;;  %v13288_v18 = vld [vmem:[#allocation9_spill] sm:$0xff]  ;;  %v13294_v50 = vld [vmem:[#allocation54_spill] sm:$0xff] }
 0x477   : > { %6684 = vst.msk [vmem:[%s12446_s17 + $0x50] sm:$0xff] %vm3706_vm4, %v6652_v42  ;;  %v6655_v8 = vmax.f32 %v6623_v54, 0.0  ;;  %v6622_v60 = vadd.f32 %v12427_v38, %v6583_v14  ;;  %v6586_v55 = vmul.f32 %v12420_v22, %v6547_v2  ;;  %v6546_v45 = vadd.f32 %v6443_v46, %v6278_v3  ;;  %v13289_v3 = vld [vmem:[#allocation43_spill] sm:$0xff]  ;;  %v8932_v2 = vpop.f32.mrf.mxu1  ;;  %v13291_v46 = vld [vmem:[#allocation26_spill] sm:$0xff]  ;;  %v13296_v23 = vld [vmem:[#allocation29_spill] sm:$0xff] }
 0x478   : > { %v8967_v16 = vpop.f32.mrf.mxu0  ;;  %v6015_v34 = vadd.f32 %v13284_v27, %v5750_v40  ;;  %v6018_v13 = vadd.f32 %v13287_v6, %v5753_v32  ;;  %v5752_v42 = vadd.f32 %v13289_v3, %v13288_v18  ;;  %v6285_v14 = vadd.f32 %v12483_v29, %v6016_v43  ;;  %v13297_v40 = vld [vmem:[#allocation23_spill] sm:$0xff]  ;;  %v13300_v31 = vld [vmem:[#allocation13_spill] sm:$0xff] }
 0x479   : > { %6687 = vst.msk [vmem:[%s12446_s17 + $0x68] sm:$0xff] %vm3706_vm4, %v6655_v8  ;;  %v6654_v25 = vmax.f32 %v6622_v60, 0.0  ;;  %v6625_v49 = vadd.f32 %v12427_v38, %v6586_v55  ;;  %v6585_v48 = vmul.f32 %v12420_v22, %v6546_v45  ;;  %v6549_v12 = vadd.f32 %v8967_v16, %v6281_v57  ;;  %v13292_v57 = vld [vmem:[#allocation49_spill] sm:$0xff]  ;;  %v13295_v16 = vld [vmem:[#allocation52_spill] sm:$0xff]  ;;  %v13303_v3 = vld [vmem:[#allocation15_spill] sm:$0xff] }
 0x47a   : > { %v6453_v61 = vpop.f32.mrf.mxu0  ;;  %v6017_v51 = vadd.f32 %v13290_v62, %v5752_v42  ;;  %v5755_v8 = vadd.f32 %v13292_v57, %v13291_v46  ;;  %v6284_v55 = vadd.f32 %v12501_v24, %v6015_v34  ;;  %v13299_v34 = vld [vmem:[#allocation32_spill] sm:$0xff]  ;;  %v13301_v32 = vld [vmem:[#allocation53_spill] sm:$0xff]  ;;  %v13304_v42 = vld [vmem:[#allocation11_spill] sm:$0xff] }
 0x47b   : > { %6686 = vst.msk [vmem:[%s12446_s17 + $0x60] sm:$0xff] %vm3706_vm4, %v6654_v25  ;;  %v6657_v10 = vmax.f32 %v6625_v49, 0.0  ;;  %v6624_v17 = vadd.f32 %v12427_v38, %v6585_v48  ;;  %v6588_v15 = vmul.f32 %v12420_v22, %v6549_v12  ;;  %v6548_v20 = vadd.f32 %v6453_v61, %v6280_v56  ;;  %v6235_v48 = vpop.f32.mrf.mxu1  ;;  %v13298_v61 = vld [vmem:[#allocation18_spill] sm:$0xff]  ;;  %v13305_v62 = vld [vmem:[#allocation59_spill] sm:$0xff]  ;;  %v13306_v46 = vld [vmem:[#allocation21_spill] sm:$0xff] }
 0x47c   : > { %v8970_v4 = vpop.f32.mrf.mxu0  ;;  %v6020_v26 = vadd.f32 %v13293_v33, %v5755_v8  ;;  %v5754_v56 = vadd.f32 %v13295_v16, %v13294_v50  ;;  %v6287_v49 = vadd.f32 %v12519_v44, %v6018_v13  ;;  %v13302_v13 = vld [vmem:[#allocation19_spill] sm:$0xff]  ;;  %v13307_v57 = vld [vmem:[#allocation30_spill] sm:$0xff] }
 0x47d   : > { %6689 = vst.msk [vmem:[%s12446_s17 + $0x78] sm:$0xff] %vm3706_vm4, %v6657_v10  ;;  %v6656_v37 = vmax.f32 %v6624_v17, 0.0  ;;  %v6627_v7 = vadd.f32 %v12427_v38, %v6588_v15  ;;  %v6587_v52 = vmul.f32 %v12420_v22, %v6548_v20  ;;  %v6551_v5 = vadd.f32 %v8970_v4, %v6283_v19  ;;  %v13309_v50 = vld [vmem:[#allocation31_spill] sm:$0xff] }
 0x47e   : > { %v6463_v54 = vpop.f32.mrf.mxu0  ;;  %v6019_v28 = vadd.f32 %v13296_v23, %v5754_v56  ;;  %v5757_v19 = vadd.f32 %v13298_v61, %v13297_v40  ;;  %v6286_v17 = vadd.f32 %v12537_v63, %v6017_v51  ;;  %v5756_v4 = vadd.f32 %v13301_v32, %v13300_v31  ;;  %v13310_v23 = vld [vmem:[#allocation42_spill] sm:$0xff] }
 0x47f   : > { %6688 = vst.msk [vmem:[%s12446_s17 + $0x70] sm:$0xff] %vm3706_vm4, %v6656_v37  ;;  %v6659_v0 = vmax.f32 %v6627_v7, 0.0  ;;  %v6626_v35 = vadd.f32 %v12427_v38, %v6587_v52  ;;  %v6590_v58 = vmul.f32 %v12420_v22, %v6551_v5  ;;  %v6550_v47 = vadd.f32 %v6463_v54, %v6282_v9  ;;  %v8935_v7 = vpop.f32.mrf.mxu1 }
 0x480   : > { %v8973_v60 = vpop.f32.mrf.mxu0  ;;  %v6022_v53 = vadd.f32 %v13299_v34, %v5757_v19  ;;  %v6289_v37 = vadd.f32 %v12555_v59, %v6020_v26  ;;  %v6021_v18 = vadd.f32 %v13302_v13, %v5756_v4  ;;  %v5759_v54 = vadd.f32 %v13304_v42, %v13303_v3  ;;  %v13308_v26 = vld [vmem:[#allocation22_spill] sm:$0xff] }
 0x481   : > { %6691 = vst.msk [vmem:[%s12446_s17 + $0x88] sm:$0xff] %vm3706_vm4, %v6659_v0  ;;  %v6658_v29 = vmax.f32 %v6626_v35, 0.0  ;;  %v6629_v45 = vadd.f32 %v12427_v38, %v6590_v58  ;;  %v6589_v30 = vmul.f32 %v12420_v22, %v6550_v47  ;;  %v6553_v36 = vadd.f32 %v8973_v60, %v6285_v14 }
 0x482   : > { %v6473_v25 = vpop.f32.mrf.mxu0  ;;  %v6288_v0 = vadd.f32 %v12573_v11, %v6019_v28  ;;  %v6024_v51 = vadd.f32 %v13305_v62, %v5759_v54  ;;  %v5758_v8 = vadd.f32 %v13307_v57, %v13306_v46  ;;  %v5761_v16 = vadd.f32 %v13309_v50, %v13308_v26  ;;  %v13311_v28 = vld [vmem:[#allocation51_spill] sm:$0xff] }
 0x483   : > { %6690 = vst.msk [vmem:[%s12446_s17 + $0x80] sm:$0xff] %vm3706_vm4, %v6658_v29  ;;  %v6661_v24 = vmax.f32 %v6629_v45, 0.0  ;;  %v6628_v12 = vadd.f32 %v12427_v38, %v6589_v30  ;;  %v6592_v41 = vmul.f32 %v12420_v22, %v6553_v36  ;;  %v6552_v43 = vadd.f32 %v6473_v25, %v6284_v55  ;;  %v6245_v29 = vpop.f32.mrf.mxu1 }
 0x484   : > { %v8976_v10 = vpop.f32.mrf.mxu0  ;;  %v6291_v55 = vadd.f32 %v8932_v2, %v6022_v53  ;;  %v6023_v33 = vadd.f32 %v12399_v21, %v5758_v8  ;;  %v6290_v25 = vadd.f32 %v6235_v48, %v6021_v18  ;;  %v5760_v21 = vadd.f32 %v13311_v28, %v13310_v23 }
 0x485   : > { %6693 = vst.msk [vmem:[%s12446_s17 + $0x98] sm:$0xff] %vm3706_vm4, %v6661_v24  ;;  %v6660_v44 = vmax.f32 %v6628_v12, 0.0  ;;  %v6631_v15 = vadd.f32 %v12427_v38, %v6592_v41  ;;  %v6591_v20 = vmul.f32 %v12420_v22, %v6552_v43  ;;  %v6555_v27 = vadd.f32 %v8976_v10, %v6287_v49  ;;  %v8938_v49 = vpop.f32.mrf.mxu1 }
 0x486   : > { %v6483_v9 = vpop.f32.mrf.mxu0  ;;  %v6026_v43 = vadd.f32 %v12405_v1, %v5761_v16  ;;  %v6293_v61 = vadd.f32 %v8935_v7, %v6024_v51 }
 0x487   : > { %6692 = vst.msk [vmem:[%s12446_s17 + $0x90] sm:$0xff] %vm3706_vm4, %v6660_v44  ;;  %v6663_v63 = vmax.f32 %v6631_v15, 0.0  ;;  %v6630_v52 = vadd.f32 %v12427_v38, %v6591_v20  ;;  %v6594_v5 = vmul.f32 %v12420_v22, %v6555_v27  ;;  %v6554_v6 = vadd.f32 %v6483_v9, %v6286_v17  ;;  %v6255_v1 = vpop.f32.mrf.mxu1 }
 0x488   : > { %v8979_v14 = vpop.f32.mrf.mxu0  ;;  %v6025_v44 = vadd.f32 %v12409_v39, %v5760_v21  ;;  %v6292_v20 = vadd.f32 %v6245_v29, %v6023_v33  ;;  %v6295_v32 = vadd.f32 %v8938_v49, %v6026_v43 }
 0x489   : > { %6695 = vst.msk [vmem:[%s12446_s17 + $0xa8] sm:$0xff] %vm3706_vm4, %v6663_v63  ;;  %v6662_v59 = vmax.f32 %v6630_v52, 0.0  ;;  %v6633_v35 = vadd.f32 %v12427_v38, %v6594_v5  ;;  %v6593_v58 = vmul.f32 %v12420_v22, %v6554_v6  ;;  %v6557_v47 = vadd.f32 %v8979_v14, %v6289_v37 }
 0x48a   : > { %v6493_v60 = vpop.f32.mrf.mxu0  ;;  %v6294_v63 = vadd.f32 %v6255_v1, %v6025_v44 }
 0x48b   : > { %6694 = vst.msk [vmem:[%s12446_s17 + $0xa0] sm:$0xff] %vm3706_vm4, %v6662_v59  ;;  %v6665_v11 = vmax.f32 %v6633_v35, 0.0  ;;  %v6632_v45 = vadd.f32 %v12427_v38, %v6593_v58  ;;  %v6596_v30 = vmul.f32 %v12420_v22, %v6557_v47  ;;  %v6556_v36 = vadd.f32 %v6493_v60, %v6288_v0 }
 0x48c   : > { %v8982_v56 = vpop.f32.mrf.mxu0 }
 0x48d   : > { %6697 = vst.msk [vmem:[%s12446_s17 + $0xb8] sm:$0xff] %vm3706_vm4, %v6665_v11  ;;  %v6664_v2 = vmax.f32 %v6632_v45, 0.0  ;;  %v6635_v24 = vadd.f32 %v12427_v38, %v6596_v30  ;;  %v6595_v12 = vmul.f32 %v12420_v22, %v6556_v36  ;;  %v6559_v41 = vadd.f32 %v8982_v56, %v6291_v55 }
 0x48e   : > { %v6503_v40 = vpop.f32.mrf.mxu0 }
 0x48f   : > { %6696 = vst.msk [vmem:[%s12446_s17 + $0xb0] sm:$0xff] %vm3706_vm4, %v6664_v2  ;;  %v6667_v48 = vmax.f32 %v6635_v24, 0.0  ;;  %v6634_v19 = vadd.f32 %v12427_v38, %v6595_v12  ;;  %v6598_v10 = vmul.f32 %v12420_v22, %v6559_v41  ;;  %v6558_v17 = vadd.f32 %v6503_v40, %v6290_v25 }
 0x490   : > { %v8985_v15 = vpop.f32.mrf.mxu0 }
 0x491   : > { %6699 = vst.msk [vmem:[%s12446_s17 + $0xc8] sm:$0xff] %vm3706_vm4, %v6667_v48  ;;  %v6666_v27 = vmax.f32 %v6634_v19, 0.0  ;;  %v6637_v34 = vadd.f32 %v12427_v38, %v6598_v10  ;;  %v6597_v53 = vmul.f32 %v12420_v22, %v6558_v17  ;;  %v6561_v31 = vadd.f32 %v8985_v15, %v6293_v61 }
 0x492   : > { %v6513_v4 = vpop.f32.mrf.mxu0 }
 0x493   : > { %6698 = vst.msk [vmem:[%s12446_s17 + $0xc0] sm:$0xff] %vm3706_vm4, %v6666_v27  ;;  %v6669_v9 = vmax.f32 %v6637_v34, 0.0  ;;  %v6636_v39 = vadd.f32 %v12427_v38, %v6597_v53  ;;  %v6600_v37 = vmul.f32 %v12420_v22, %v6561_v31  ;;  %v6560_v7 = vadd.f32 %v6513_v4, %v6292_v20 }
 0x494   : > { %v8988_v52 = vpop.f32.mrf.mxu0 }
 0x495   : > { %6701 = vst.msk [vmem:[%s12446_s17 + $0xd8] sm:$0xff] %vm3706_vm4, %v6669_v9  ;;  %v6668_v5 = vmax.f32 %v6636_v39, 0.0  ;;  %v6639_v6 = vadd.f32 %v12427_v38, %v6600_v37  ;;  %v6599_v13 = vmul.f32 %v12420_v22, %v6560_v7  ;;  %v6563_v18 = vadd.f32 %v8988_v52, %v6295_v32 }
 0x496   : > { %v6523_v3 = vpop.f32.mrf.mxu0 }
 0x497   : > { %6700 = vst.msk [vmem:[%s12446_s17 + $0xd0] sm:$0xff] %vm3706_vm4, %v6668_v5  ;;  %v6671_v42 = vmax.f32 %v6639_v6, 0.0  ;;  %v6638_v54 = vadd.f32 %v12427_v38, %v6599_v13  ;;  %v6602_v14 = vmul.f32 %v12420_v22, %v6563_v18  ;;  %v6562_v0 = vadd.f32 %v6523_v3, %v6294_v63 }
 0x499   : > { %6703 = vst.msk [vmem:[%s12446_s17 + $0xe8] sm:$0xff] %vm3706_vm4, %v6671_v42  ;;  %v6670_v59 = vmax.f32 %v6638_v54, 0.0  ;;  %v6641_v35 = vadd.f32 %v12427_v38, %v6602_v14  ;;  %v6601_v58 = vmul.f32 %v12420_v22, %v6562_v0 }
 0x49b   : > { %6702 = vst.msk [vmem:[%s12446_s17 + $0xe0] sm:$0xff] %vm3706_vm4, %v6670_v59  ;;  %v6673_v47 = vmax.f32 %v6641_v35, 0.0  ;;  %v6640_v62 = vadd.f32 %v12427_v38, %v6601_v58 }
 0x49d   : > { %6705 = vst.msk [vmem:[%s12446_s17 + $0xf8] sm:$0xff] %vm3706_vm4, %v6673_v47  ;;  %v6672_v51 = vmax.f32 %v6640_v62, 0.0 }
 0x49f   : > { %6704 = vst.msk [vmem:[%s12446_s17 + $0xf0] sm:$0xff] %vm3706_vm4, %v6672_v51 }
 0x4a0 PF: > { %s20_s13 = sadd.s32 1, %s9009_s13  }
 0x4a1   : > { %p17_p4 = scmp.ge.s32.totalorder %s20_s13, 4  }
 0x4a3   :  { %19 = sbr.rel (!%p17_p4) target bundleno = 1 (0x1), region = 107 }

</bundles_post_ra>
